<compile_context>
chip_gen: v5e
topology: v5e:2x2
jax: 0.10.0
libtpu: 0.0.40
codegen_flags: <defaults>
</compile_context>

<pallas_src>
import numpy as np
import jax
import jax.numpy as jnp
from jax.experimental import pallas as pl
from jax.experimental.pallas import tpu as pltpu


# ----------------------------- Pallas kernel -------------------------------
#
# Data layout: every activation is a 2-D (batch_tile*8, lanes) array whose
# sublane-row index is 8*sample + q.  The 32 H-padded input rows of a sample
# are packed 4-per-sublane-row ("quads", q in [0,8)), so every later H
# operation (conv row taps, 2x2/2 pooling over H) is a lane slice/add or a
# whole-row shift, and each layer is one 2-D matmul against a band matrix.
# Rows whose q is beyond a layer's valid range carry finite garbage and are
# never read by later valid rows; the final logits live in rows with q == 0.


def _sigmoid(x):
    # One EUP issue per element instead of exp + reciprocal.
    return 0.5 * (1.0 + jnp.tanh(0.5 * x))


def _shift_up(a, k):
    """Sublane rows shifted up by k (2-D array).  The wrapped rows only ever
    land in per-sample padding rows, which are never consumed."""
    if k == 0:
        return a
    return jnp.concatenate([a[k:, :], a[:k, :]], axis=0)


def _lenet_kernel(x_ref, b1_ref, bias1_ref, b2_ref, bias2_ref,
                  w1_ref, fb1_ref, w2_ref, fb2_ref, w3_ref, fb3_ref,
                  out_ref):
    f32 = jnp.float32
    cdt = b1_ref.dtype                      # matmul-operand dtype (bf16)

    x = x_ref[...].astype(cdt)                                   # (R, 112)

    # ---- conv1 (5x5, 1->6, pad=2): one matmul, K = 2 quads * 112 = 224. ----
    x1 = jnp.concatenate([x, _shift_up(x, 1)], axis=1)           # (R, 224)
    s1 = _sigmoid(jnp.dot(x1, b1_ref[...], preferred_element_type=f32)
                  + bias1_ref[...])                              # (R, 672) f32

    # ---- pool1 over H: lane adds (4 conv rows / sublane row -> 2 pooled). --
    p1 = (0.5 * jnp.concatenate(
        [s1[:, 0:168] + s1[:, 168:336],
         s1[:, 336:504] + s1[:, 504:672]], axis=1)).astype(cdt)  # (R, 336)

    # ---- conv2 (5x5, 6->16) with the pool1 W-average folded into its band
    # matrix: one matmul, K = 3 sublane rows * 336 = 1008. ----
    x2 = jnp.concatenate([p1, _shift_up(p1, 1), _shift_up(p1, 2)], axis=1)
    s2 = _sigmoid(jnp.dot(x2, b2_ref[...], preferred_element_type=f32)
                  + bias2_ref[...])                              # (R, 320) f32

    # ---- pool2 over H: lane add (W-average + Flatten folded into fc1). ----
    x3 = (0.5 * (s2[:, 0:160] + s2[:, 160:320])).astype(cdt)     # (R, 160)

    # ---- fc1: gather the 5 pooled rows of each sample into lanes, then one
    # (R, 800) x (800, 120) matmul; fc2 / fc3 follow. ----
    xf = jnp.concatenate([_shift_up(x3, g) for g in range(5)], axis=1)  # (R,800)
    h = jnp.dot(xf, w1_ref[...], preferred_element_type=f32) + fb1_ref[...]
    h = jnp.dot(h.astype(cdt), w2_ref[...], preferred_element_type=f32) \
        + fb2_ref[...]
    out = jnp.dot(h.astype(cdt), w3_ref[...], preferred_element_type=f32) \
        + fb3_ref[...]
    out_ref[...] = out.astype(out_ref.dtype)        # rows with q == 0 are valid


# --------------------- one-time host-side weight re-layout ------------------

def prepare_params(params, compute_dtype=jnp.bfloat16):
    """Re-layout PyTorch-style LeNet parameters into the kernel's lane-dense
    band matrices.  Runs once, outside jit, on tiny arrays."""
    (w1, b1, w2, b2, fw1, fb1, fw2, fb2, fw3, fb3) = (
        np.asarray(p, np.float32) for p in params)

    # conv1 band matrix.  K index: d*112 + r*28 + c  (d: which of the two
    # gathered quads, r: row inside the quad, c: unpadded column -- conv1's W
    # padding is baked in by clipping).  Out lane: rr*168 + ow*6 + oc.
    B1s = np.zeros((224, 672), np.float32)
    for rr in range(4):
        for kh in range(5):
            d, r = divmod(rr + kh, 4)
            for ow in range(28):
                for kw in range(5):
                    c = ow + kw - 2
                    if 0 <= c < 28:
                        B1s[d * 112 + r * 28 + c,
                            rr * 168 + ow * 6: rr * 168 + ow * 6 + 6] += \
                            w1[:, 0, kh, kw]
    bias1 = np.tile(b1, 112)[None, :]                          # (1, 672)

    # conv2 band matrix with pool1's W-average (factor 0.5) folded in.
    # K index: d*336 + u*168 + w*6 + ic  (d: sublane-row offset, u: which of
    # the two H-pooled rows in that sublane row, w: pre-W-pool column).
    # Out lane: rr2*160 + ow*16 + oc.
    B2s = np.zeros((1008, 320), np.float32)
    for rr2 in range(2):
        for kh in range(5):
            d, u = divmod(rr2 + kh, 2)
            for ow in range(10):
                for kw in range(5):
                    cw = ow + kw                               # pool1 column
                    for w in (2 * cw, 2 * cw + 1):             # pre-pool cols
                        for ic in range(6):
                            B2s[d * 336 + u * 168 + w * 6 + ic,
                                rr2 * 160 + ow * 16: rr2 * 160 + ow * 16 + 16] \
                                += 0.5 * w2[:, ic, kh, kw]
    bias2 = np.tile(b2, 20)[None, :]                           # (1, 320)

    # fc1 with pool2's W-average (0.5) and the torch Flatten order folded in.
    # Input lane: g*160 + ow*16 + oc  (g: pooled row, ow: pre-W-pool column).
    W1p = np.zeros((800, 120), np.float32)
    for g in range(5):
        for ow in range(10):
            for oc in range(16):
                W1p[g * 160 + ow * 16 + oc, :] = \
                    0.5 * fw1[:, oc * 25 + g * 5 + ow // 2]

    cd = compute_dtype
    return (jnp.asarray(B1s, cd), jnp.asarray(bias1, jnp.float32),
            jnp.asarray(B2s, cd), jnp.asarray(bias2, jnp.float32),
            jnp.asarray(W1p, cd), jnp.asarray(fb1[None, :], jnp.float32),
            jnp.asarray(fw2.T.copy(), cd), jnp.asarray(fb2[None, :], jnp.float32),
            jnp.asarray(fw3.T.copy(), cd), jnp.asarray(fb3[None, :], jnp.float32))


# ------------------------------- forward ------------------------------------

def _pick_tile_and_vmem(n):
    """Per-generation batch tile and scoped-VMEM limit."""
    try:
        kind = jax.devices()[0].device_kind.lower()
    except Exception:
        kind = ""
    is_v5e = ("v5 lite" in kind) or ("v5e" in kind) or ("v5litepod" in kind)
    is_v7 = "v7" in kind
    base = 128 if is_v5e else 256
    vmem = (48 << 20) if is_v7 else (64 << 20)
    nt = min(base, n)
    # v7x: make sure the "parallel" grid has >= 2 steps so both TCs get work.
    if is_v7 and 16 <= n <= base:
        nt = -(-n // 2)
    return max(nt, 1), vmem


def lenet_forward(x_nchw, prep, *, batch_tile=None):
    """Fused LeNet forward.  x_nchw: (N, 1, 28, 28) float32 -> (N, 10)."""
    N = x_nchw.shape[0]
    nt, vmem_limit = ((batch_tile, 64 << 20) if batch_tile
                      else _pick_tile_and_vmem(N))

    # Host-side re-layout (cheap, fused by XLA): pad H by 2 for conv1 (the W
    # padding is baked into the band matrix) and pack 4 rows per sublane row.
    xh = jnp.pad(x_nchw[:, 0, :, :].astype(jnp.float32),
                 ((0, 0), (2, 2), (0, 0)))                     # (N, 32, 28)
    xh = xh.reshape(N * 8, 112)                                # row = 8*n + quad

    Np = -(-N // nt) * nt
    if Np != N:
        xh = jnp.pad(xh, ((0, (Np - N) * 8), (0, 0)))

    weight_specs = [pl.BlockSpec(p.shape, lambda i: (0, 0)) for p in prep]
    out = pl.pallas_call(
        _lenet_kernel,
        out_shape=jax.ShapeDtypeStruct((Np * 8, 10), jnp.float32),
        grid=(Np // nt,),
        in_specs=[pl.BlockSpec((nt * 8, 112), lambda i: (i, 0))] + weight_specs,
        out_specs=pl.BlockSpec((nt * 8, 10), lambda i: (i, 0)),
        compiler_params=pltpu.CompilerParams(
            dimension_semantics=("parallel",),
            vmem_limit_bytes=vmem_limit),
    )(xh, *prep)
    # Row 8*n + 0 of each sample holds its logits.
    return out.reshape(Np, 8, 10)[:N, 0, :]


# -------------------------- params / reference ------------------------------

def init_params(key):
    ks = jax.random.split(key, 10)

    def u(k, shape, fan_in):
        bound = 1.0 / np.sqrt(fan_in)
        return jax.random.uniform(k, shape, jnp.float32, -bound, bound)

    w1 = u(ks[0], (6, 1, 5, 5), 25);    b1 = u(ks[1], (6,), 25)
    w2 = u(ks[2], (16, 6, 5, 5), 150);  b2 = u(ks[3], (16,), 150)
    fw1 = u(ks[4], (120, 400), 400);    fb1 = u(ks[5], (120,), 400)
    fw2 = u(ks[6], (84, 120), 120);     fb2 = u(ks[7], (84,), 120)
    fw3 = u(ks[8], (10, 84), 84);       fb3 = u(ks[9], (10,), 84)
    return (w1, b1, w2, b2, fw1, fb1, fw2, fb2, fw3, fb3)


def reference_forward(x, params):
    (w1, b1, w2, b2, fw1, fb1, fw2, fb2, fw3, fb3) = params
    dn = ("NCHW", "OIHW", "NCHW")
    y = jax.lax.conv_general_dilated(x, w1, (1, 1), ((2, 2), (2, 2)),
                                     dimension_numbers=dn)
    y = jax.nn.sigmoid(y + b1[None, :, None, None])
    y = jax.lax.reduce_window(y, 0.0, jax.lax.add, (1, 1, 2, 2),
                              (1, 1, 2, 2), "VALID") * 0.25
    y = jax.lax.conv_general_dilated(y, w2, (1, 1), "VALID",
                                     dimension_numbers=dn)
    y = jax.nn.sigmoid(y + b2[None, :, None, None])
    y = jax.lax.reduce_window(y, 0.0, jax.lax.add, (1, 1, 2, 2),
                              (1, 1, 2, 2), "VALID") * 0.25
    y = y.reshape(y.shape[0], -1)
    y = y @ fw1.T + fb1
    y = y @ fw2.T + fb2
    y = y @ fw3.T + fb3
    return y


if __name__ == "__main__":
    key = jax.random.PRNGKey(0)
    k_x, k_p = jax.random.split(key)
    # fc1's 400 = 16*5*5 pins the spatial size: input must be 1x28x28.
    x = jax.random.normal(k_x, (2, 1, 28, 28), dtype=jnp.float32)
    params = init_params(k_p)
    prep = prepare_params(params)            # once, outside jit

    fwd = jax.jit(lenet_forward)
    out = jax.block_until_ready(fwd(x, prep))

    ref = reference_forward(x, params)
    # Tolerance has margin for bf16 matmul operands (f32 accumulation) and the
    # MXU's default f32 precision in the reference.
    np.testing.assert_allclose(np.asarray(out), np.asarray(ref),
                               rtol=2e-2, atol=2e-2)
    assert out.shape == (2, 10) and out.dtype == jnp.float32
    print("KERNEL_OK")
</pallas_src>

<mosaic_0001>
module attributes {stable_mosaic.version = 11 : i64} {
  func.func @_lenet_kernel(%arg0: i32, %arg1: memref<16x112xf32, #tpu.memory_space<vmem>>, %arg2: memref<224x672xbf16, #tpu.memory_space<vmem>>, %arg3: memref<1x672xf32, #tpu.memory_space<vmem>>, %arg4: memref<1008x320xbf16, #tpu.memory_space<vmem>>, %arg5: memref<1x320xf32, #tpu.memory_space<vmem>>, %arg6: memref<800x120xbf16, #tpu.memory_space<vmem>>, %arg7: memref<1x120xf32, #tpu.memory_space<vmem>>, %arg8: memref<120x84xbf16, #tpu.memory_space<vmem>>, %arg9: memref<1x84xf32, #tpu.memory_space<vmem>>, %arg10: memref<84x10xbf16, #tpu.memory_space<vmem>>, %arg11: memref<1x10xf32, #tpu.memory_space<vmem>>, %arg12: memref<16x10xf32, #tpu.memory_space<vmem>>) attributes {dimension_semantics = [#tpu.dimension_semantics<parallel>], iteration_bounds = array<i64: 1>, scalar_prefetch = 0 : i64, scratch_operands = 0 : i64, tpu.core_type = #tpu.core_type<tc>, window_params = [{transform_indices = @transform_0, window_bounds = array<i64: 16, 112>}, {pipeline_mode = #tpu.pipeline_mode<synchronous>, transform_indices = @transform_1, window_bounds = array<i64: 224, 672>}, {pipeline_mode = #tpu.pipeline_mode<synchronous>, transform_indices = @transform_2, window_bounds = array<i64: 1, 672>}, {pipeline_mode = #tpu.pipeline_mode<synchronous>, transform_indices = @transform_3, window_bounds = array<i64: 1008, 320>}, {pipeline_mode = #tpu.pipeline_mode<synchronous>, transform_indices = @transform_4, window_bounds = array<i64: 1, 320>}, {pipeline_mode = #tpu.pipeline_mode<synchronous>, transform_indices = @transform_5, window_bounds = array<i64: 800, 120>}, {pipeline_mode = #tpu.pipeline_mode<synchronous>, transform_indices = @transform_6, window_bounds = array<i64: 1, 120>}, {pipeline_mode = #tpu.pipeline_mode<synchronous>, transform_indices = @transform_7, window_bounds = array<i64: 120, 84>}, {pipeline_mode = #tpu.pipeline_mode<synchronous>, transform_indices = @transform_8, window_bounds = array<i64: 1, 84>}, {pipeline_mode = #tpu.pipeline_mode<synchronous>, transform_indices = @transform_9, window_bounds = array<i64: 84, 10>}, {pipeline_mode = #tpu.pipeline_mode<synchronous>, transform_indices = @transform_10, window_bounds = array<i64: 1, 10>}, {transform_indices = @transform_11, window_bounds = array<i64: 16, 10>}]} {
    %c0 = arith.constant 0 : index
    %c0_0 = arith.constant 0 : index
    %0 = vector.load %arg1[%c0, %c0_0] : memref<16x112xf32, #tpu.memory_space<vmem>>, vector<16x112xf32>
    %1 = arith.truncf %0 : vector<16x112xf32> to vector<16x112xbf16>
    %2 = vector.extract_strided_slice %1 {offsets = [1, 0], sizes = [15, 112], strides = [1, 1]} : vector<16x112xbf16> to vector<15x112xbf16>
    %3 = vector.extract_strided_slice %1 {offsets = [0, 0], sizes = [1, 112], strides = [1, 1]} : vector<16x112xbf16> to vector<1x112xbf16>
    %4 = tpu.concatenate %2, %3 in 0 : vector<15x112xbf16>, vector<1x112xbf16> -> vector<16x112xbf16>
    %5 = tpu.concatenate %1, %4 in 1 : vector<16x112xbf16>, vector<16x112xbf16> -> vector<16x224xbf16>
    %c0_1 = arith.constant 0 : index
    %c0_2 = arith.constant 0 : index
    %6 = vector.load %arg2[%c0_1, %c0_2] : memref<224x672xbf16, #tpu.memory_space<vmem>>, vector<224x672xbf16>
    %cst = arith.constant dense<0.000000e+00> : vector<16x672xf32>
    %7 = tpu.matmul %5, %6, %cst {dimension_numbers = #tpu.dot_dimension_numbers<[1], [0], [0], [1], [0, 0, 1, 1], [], []>} : vector<16x224xbf16>, vector<224x672xbf16>, vector<16x672xf32> -> vector<16x672xf32>
    %c0_3 = arith.constant 0 : index
    %c0_4 = arith.constant 0 : index
    %8 = vector.load %arg3[%c0_3, %c0_4] : memref<1x672xf32, #tpu.memory_space<vmem>>, vector<1x672xf32>
    %9 = vector.broadcast %8 : vector<1x672xf32> to vector<16x672xf32>
    %10 = arith.addf %7, %9 : vector<16x672xf32>
    %cst_5 = arith.constant 5.000000e-01 : f32
    %11 = vector.broadcast %cst_5 : f32 to vector<16x672xf32>
    %12 = arith.mulf %11, %10 : vector<16x672xf32>
    %13 = math.tanh %12 : vector<16x672xf32>
    %cst_6 = arith.constant 1.000000e+00 : f32
    %14 = vector.broadcast %cst_6 : f32 to vector<16x672xf32>
    %15 = arith.addf %14, %13 : vector<16x672xf32>
    %cst_7 = arith.constant 5.000000e-01 : f32
    %16 = vector.broadcast %cst_7 : f32 to vector<16x672xf32>
    %17 = arith.mulf %16, %15 : vector<16x672xf32>
    %18 = vector.extract_strided_slice %17 {offsets = [0, 0], sizes = [16, 168], strides = [1, 1]} : vector<16x672xf32> to vector<16x168xf32>
    %19 = vector.extract_strided_slice %17 {offsets = [0, 168], sizes = [16, 168], strides = [1, 1]} : vector<16x672xf32> to vector<16x168xf32>
    %20 = arith.addf %18, %19 : vector<16x168xf32>
    %21 = vector.extract_strided_slice %17 {offsets = [0, 336], sizes = [16, 168], strides = [1, 1]} : vector<16x672xf32> to vector<16x168xf32>
    %22 = vector.extract_strided_slice %17 {offsets = [0, 504], sizes = [16, 168], strides = [1, 1]} : vector<16x672xf32> to vector<16x168xf32>
    %23 = arith.addf %21, %22 : vector<16x168xf32>
    %24 = tpu.concatenate %20, %23 in 1 : vector<16x168xf32>, vector<16x168xf32> -> vector<16x336xf32>
    %cst_8 = arith.constant 5.000000e-01 : f32
    %25 = vector.broadcast %cst_8 : f32 to vector<16x336xf32>
    %26 = arith.mulf %25, %24 : vector<16x336xf32>
    %27 = arith.truncf %26 : vector<16x336xf32> to vector<16x336xbf16>
    %28 = vector.extract_strided_slice %27 {offsets = [1, 0], sizes = [15, 336], strides = [1, 1]} : vector<16x336xbf16> to vector<15x336xbf16>
    %29 = vector.extract_strided_slice %27 {offsets = [0, 0], sizes = [1, 336], strides = [1, 1]} : vector<16x336xbf16> to vector<1x336xbf16>
    %30 = tpu.concatenate %28, %29 in 0 : vector<15x336xbf16>, vector<1x336xbf16> -> vector<16x336xbf16>
    %31 = vector.extract_strided_slice %27 {offsets = [2, 0], sizes = [14, 336], strides = [1, 1]} : vector<16x336xbf16> to vector<14x336xbf16>
    %32 = vector.extract_strided_slice %27 {offsets = [0, 0], sizes = [2, 336], strides = [1, 1]} : vector<16x336xbf16> to vector<2x336xbf16>
    %33 = tpu.concatenate %31, %32 in 0 : vector<14x336xbf16>, vector<2x336xbf16> -> vector<16x336xbf16>
    %34 = tpu.concatenate %27, %30, %33 in 1 : vector<16x336xbf16>, vector<16x336xbf16>, vector<16x336xbf16> -> vector<16x1008xbf16>
    %c0_9 = arith.constant 0 : index
    %c0_10 = arith.constant 0 : index
    %35 = vector.load %arg4[%c0_9, %c0_10] : memref<1008x320xbf16, #tpu.memory_space<vmem>>, vector<1008x320xbf16>
    %cst_11 = arith.constant dense<0.000000e+00> : vector<16x320xf32>
    %36 = tpu.matmul %34, %35, %cst_11 {dimension_numbers = #tpu.dot_dimension_numbers<[1], [0], [0], [1], [0, 0, 1, 1], [], []>} : vector<16x1008xbf16>, vector<1008x320xbf16>, vector<16x320xf32> -> vector<16x320xf32>
    %c0_12 = arith.constant 0 : index
    %c0_13 = arith.constant 0 : index
    %37 = vector.load %arg5[%c0_12, %c0_13] : memref<1x320xf32, #tpu.memory_space<vmem>>, vector<1x320xf32>
    %38 = vector.broadcast %37 : vector<1x320xf32> to vector<16x320xf32>
    %39 = arith.addf %36, %38 : vector<16x320xf32>
    %cst_14 = arith.constant 5.000000e-01 : f32
    %40 = vector.broadcast %cst_14 : f32 to vector<16x320xf32>
    %41 = arith.mulf %40, %39 : vector<16x320xf32>
    %42 = math.tanh %41 : vector<16x320xf32>
    %cst_15 = arith.constant 1.000000e+00 : f32
    %43 = vector.broadcast %cst_15 : f32 to vector<16x320xf32>
    %44 = arith.addf %43, %42 : vector<16x320xf32>
    %cst_16 = arith.constant 5.000000e-01 : f32
    %45 = vector.broadcast %cst_16 : f32 to vector<16x320xf32>
    %46 = arith.mulf %45, %44 : vector<16x320xf32>
    %47 = vector.extract_strided_slice %46 {offsets = [0, 0], sizes = [16, 160], strides = [1, 1]} : vector<16x320xf32> to vector<16x160xf32>
    %48 = vector.extract_strided_slice %46 {offsets = [0, 160], sizes = [16, 160], strides = [1, 1]} : vector<16x320xf32> to vector<16x160xf32>
    %49 = arith.addf %47, %48 : vector<16x160xf32>
    %cst_17 = arith.constant 5.000000e-01 : f32
    %50 = vector.broadcast %cst_17 : f32 to vector<16x160xf32>
    %51 = arith.mulf %50, %49 : vector<16x160xf32>
    %52 = arith.truncf %51 : vector<16x160xf32> to vector<16x160xbf16>
    %53 = vector.extract_strided_slice %52 {offsets = [1, 0], sizes = [15, 160], strides = [1, 1]} : vector<16x160xbf16> to vector<15x160xbf16>
    %54 = vector.extract_strided_slice %52 {offsets = [0, 0], sizes = [1, 160], strides = [1, 1]} : vector<16x160xbf16> to vector<1x160xbf16>
    %55 = tpu.concatenate %53, %54 in 0 : vector<15x160xbf16>, vector<1x160xbf16> -> vector<16x160xbf16>
    %56 = vector.extract_strided_slice %52 {offsets = [2, 0], sizes = [14, 160], strides = [1, 1]} : vector<16x160xbf16> to vector<14x160xbf16>
    %57 = vector.extract_strided_slice %52 {offsets = [0, 0], sizes = [2, 160], strides = [1, 1]} : vector<16x160xbf16> to vector<2x160xbf16>
    %58 = tpu.concatenate %56, %57 in 0 : vector<14x160xbf16>, vector<2x160xbf16> -> vector<16x160xbf16>
    %59 = vector.extract_strided_slice %52 {offsets = [3, 0], sizes = [13, 160], strides = [1, 1]} : vector<16x160xbf16> to vector<13x160xbf16>
    %60 = vector.extract_strided_slice %52 {offsets = [0, 0], sizes = [3, 160], strides = [1, 1]} : vector<16x160xbf16> to vector<3x160xbf16>
    %61 = tpu.concatenate %59, %60 in 0 : vector<13x160xbf16>, vector<3x160xbf16> -> vector<16x160xbf16>
    %62 = vector.extract_strided_slice %52 {offsets = [4, 0], sizes = [12, 160], strides = [1, 1]} : vector<16x160xbf16> to vector<12x160xbf16>
    %63 = vector.extract_strided_slice %52 {offsets = [0, 0], sizes = [4, 160], strides = [1, 1]} : vector<16x160xbf16> to vector<4x160xbf16>
    %64 = tpu.concatenate %62, %63 in 0 : vector<12x160xbf16>, vector<4x160xbf16> -> vector<16x160xbf16>
    %65 = tpu.concatenate %52, %55, %58, %61, %64 in 1 : vector<16x160xbf16>, vector<16x160xbf16>, vector<16x160xbf16>, vector<16x160xbf16>, vector<16x160xbf16> -> vector<16x800xbf16>
    %c0_18 = arith.constant 0 : index
    %c0_19 = arith.constant 0 : index
    %66 = vector.load %arg6[%c0_18, %c0_19] : memref<800x120xbf16, #tpu.memory_space<vmem>>, vector<800x120xbf16>
    %cst_20 = arith.constant dense<0.000000e+00> : vector<16x120xf32>
    %67 = tpu.matmul %65, %66, %cst_20 {dimension_numbers = #tpu.dot_dimension_numbers<[1], [0], [0], [1], [0, 0, 1, 1], [], []>} : vector<16x800xbf16>, vector<800x120xbf16>, vector<16x120xf32> -> vector<16x120xf32>
    %c0_21 = arith.constant 0 : index
    %c0_22 = arith.constant 0 : index
    %68 = vector.load %arg7[%c0_21, %c0_22] : memref<1x120xf32, #tpu.memory_space<vmem>>, vector<1x120xf32>
    %69 = vector.broadcast %68 : vector<1x120xf32> to vector<16x120xf32>
    %70 = arith.addf %67, %69 : vector<16x120xf32>
    %71 = arith.truncf %70 : vector<16x120xf32> to vector<16x120xbf16>
    %c0_23 = arith.constant 0 : index
    %c0_24 = arith.constant 0 : index
    %72 = vector.load %arg8[%c0_23, %c0_24] : memref<120x84xbf16, #tpu.memory_space<vmem>>, vector<120x84xbf16>
    %cst_25 = arith.constant dense<0.000000e+00> : vector<16x84xf32>
    %73 = tpu.matmul %71, %72, %cst_25 {dimension_numbers = #tpu.dot_dimension_numbers<[1], [0], [0], [1], [0, 0, 1, 1], [], []>} : vector<16x120xbf16>, vector<120x84xbf16>, vector<16x84xf32> -> vector<16x84xf32>
    %c0_26 = arith.constant 0 : index
    %c0_27 = arith.constant 0 : index
    %74 = vector.load %arg9[%c0_26, %c0_27] : memref<1x84xf32, #tpu.memory_space<vmem>>, vector<1x84xf32>
    %75 = vector.broadcast %74 : vector<1x84xf32> to vector<16x84xf32>
    %76 = arith.addf %73, %75 : vector<16x84xf32>
    %77 = arith.truncf %76 : vector<16x84xf32> to vector<16x84xbf16>
    %c0_28 = arith.constant 0 : index
    %c0_29 = arith.constant 0 : index
    %78 = vector.load %arg10[%c0_28, %c0_29] : memref<84x10xbf16, #tpu.memory_space<vmem>>, vector<84x10xbf16>
    %cst_30 = arith.constant dense<0.000000e+00> : vector<16x10xf32>
    %79 = tpu.matmul %77, %78, %cst_30 {dimension_numbers = #tpu.dot_dimension_numbers<[1], [0], [0], [1], [0, 0, 1, 1], [], []>} : vector<16x84xbf16>, vector<84x10xbf16>, vector<16x10xf32> -> vector<16x10xf32>
    %c0_31 = arith.constant 0 : index
    %c0_32 = arith.constant 0 : index
    %80 = vector.load %arg11[%c0_31, %c0_32] : memref<1x10xf32, #tpu.memory_space<vmem>>, vector<1x10xf32>
    %81 = vector.broadcast %80 : vector<1x10xf32> to vector<16x10xf32>
    %82 = arith.addf %79, %81 : vector<16x10xf32>
    %c0_33 = arith.constant 0 : index
    %c0_34 = arith.constant 0 : index
    %83 = vector.load %arg12[%c0_33, %c0_34] : memref<16x10xf32, #tpu.memory_space<vmem>>, vector<16x10xf32>
    tpu.vector_store %arg12[%c0_33, %c0_34], %82 {strides = array<i32>} : memref<16x10xf32, #tpu.memory_space<vmem>>, vector<16x10xf32>,
    return
  }
  func.func @transform_0(%arg0: i32) -> (i32, i32) {
    %c0_i32 = arith.constant 0 : i32
    %c0_i32_0 = arith.constant 0 : i32
    return %arg0, %c0_i32 : i32, i32
  }
  func.func @transform_1(%arg0: i32) -> (i32, i32) {
    %c0_i32 = arith.constant 0 : i32
    %c0_i32_0 = arith.constant 0 : i32
    %c0_i32_1 = arith.constant 0 : i32
    return %c0_i32, %c0_i32_0 : i32, i32
  }
  func.func @transform_2(%arg0: i32) -> (i32, i32) {
    %c0_i32 = arith.constant 0 : i32
    %c0_i32_0 = arith.constant 0 : i32
    %c0_i32_1 = arith.constant 0 : i32
    return %c0_i32, %c0_i32_0 : i32, i32
  }
  func.func @transform_3(%arg0: i32) -> (i32, i32) {
    %c0_i32 = arith.constant 0 : i32
    %c0_i32_0 = arith.constant 0 : i32
    %c0_i32_1 = arith.constant 0 : i32
    return %c0_i32, %c0_i32_0 : i32, i32
  }
  func.func @transform_4(%arg0: i32) -> (i32, i32) {
    %c0_i32 = arith.constant 0 : i32
    %c0_i32_0 = arith.constant 0 : i32
    %c0_i32_1 = arith.constant 0 : i32
    return %c0_i32, %c0_i32_0 : i32, i32
  }
  func.func @transform_5(%arg0: i32) -> (i32, i32) {
    %c0_i32 = arith.constant 0 : i32
    %c0_i32_0 = arith.constant 0 : i32
    %c0_i32_1 = arith.constant 0 : i32
    return %c0_i32, %c0_i32_0 : i32, i32
  }
  func.func @transform_6(%arg0: i32) -> (i32, i32) {
    %c0_i32 = arith.constant 0 : i32
    %c0_i32_0 = arith.constant 0 : i32
    %c0_i32_1 = arith.constant 0 : i32
    return %c0_i32, %c0_i32_0 : i32, i32
  }
  func.func @transform_7(%arg0: i32) -> (i32, i32) {
    %c0_i32 = arith.constant 0 : i32
    %c0_i32_0 = arith.constant 0 : i32
    %c0_i32_1 = arith.constant 0 : i32
    return %c0_i32, %c0_i32_0 : i32, i32
  }
  func.func @transform_8(%arg0: i32) -> (i32, i32) {
    %c0_i32 = arith.constant 0 : i32
    %c0_i32_0 = arith.constant 0 : i32
    %c0_i32_1 = arith.constant 0 : i32
    return %c0_i32, %c0_i32_0 : i32, i32
  }
  func.func @transform_9(%arg0: i32) -> (i32, i32) {
    %c0_i32 = arith.constant 0 : i32
    %c0_i32_0 = arith.constant 0 : i32
    %c0_i32_1 = arith.constant 0 : i32
    return %c0_i32, %c0_i32_0 : i32, i32
  }
  func.func @transform_10(%arg0: i32) -> (i32, i32) {
    %c0_i32 = arith.constant 0 : i32
    %c0_i32_0 = arith.constant 0 : i32
    %c0_i32_1 = arith.constant 0 : i32
    return %c0_i32, %c0_i32_0 : i32, i32
  }
  func.func @transform_11(%arg0: i32) -> (i32, i32) {
    %c0_i32 = arith.constant 0 : i32
    %c0_i32_0 = arith.constant 0 : i32
    return %arg0, %c0_i32 : i32, i32
  }
}

</mosaic_0001>

<bundles_post_ra>
// kernel: lenet_forward.1
= control target key start
LH: loop header
LB: loop body
LE: loop exit
PB: predicated region body
PF: predicated region fallthrough
CT: control target
= control target key end

     0   :  { %vm62_vm0 = vcmask 1047552   ;;  %vm63_vm1 = vsmask.f32 7424  ;;  %vm591_vm3 = vcmask 785408   ;;  %vm69_vm4 = vcmask 916480   ;;  %s5191_s19 = smov 80   ;;  %s7361_s0 = inlined_call_operand.vmem [shape: f32[16,112], index: 0, kind: input, shape index: {}]   ;;  %s7362_s1 = inlined_call_operand.vmem [shape: bf16[224,672], index: 1, kind: input, shape index: {}]   ;;  %s7363_s2 = inlined_call_operand.vmem [shape: f32[1,672], index: 2, kind: input, shape index: {}]   ;;  %s7364_s3 = inlined_call_operand.vmem [shape: bf16[1008,320], index: 3, kind: input, shape index: {}]   ;;  %s7365_s4 = inlined_call_operand.vmem [shape: f32[1,320], index: 4, kind: input, shape index: {}]   ;;  %s7366_s5 = inlined_call_operand.vmem [shape: bf16[800,120], index: 5, kind: input, shape index: {}]   ;;  %s7367_s6 = inlined_call_operand.vmem [shape: f32[1,120], index: 6, kind: input, shape index: {}]   ;;  %s7368_s8 = inlined_call_operand.vmem [shape: f32[1,84], index: 8, kind: input, shape index: {}]   ;;  %s7369_s7 = inlined_call_operand.vmem [shape: bf16[120,84], index: 7, kind: input, shape index: {}]   ;;  %s7370_s9 = inlined_call_operand.vmem [shape: bf16[84,10], index: 9, kind: input, shape index: {}]   ;;  %s7371_s10 = inlined_call_operand.vmem [shape: f32[1,10], index: 10, kind: input, shape index: {}]   ;;  %s7372_s11 = inlined_call_operand.vmem [shape: f32[16,10], index: 11, kind: output, shape index: {}]  }
   0x1   :  { %v39_v0 = vld [vmem:[%s7361_s0] sm:$0xff]  ;;  %v40_v1 = vld [vmem:[%s7361_s0 + $0x8] sm:$0xff]  ;;  %v3626_v4 = vld [vmem:[%s7362_s1 + $0x150] sm:$0xf]  ;;  %s5189_s0 = smov 112   ;;  %vm822_vm5 = vcmask 719872  }
   0x2   :  { %v41_v2 = vpack.c.bf16 %v39_v0, %v39_v0  ;;  %v42_v3 = vpack.c.bf16 %v40_v1, %v40_v1  ;;  %v4853_v5 = vld [vmem:[%s7362_s1 + $0x164] sm:$0xf0]  ;;  %v4850_v6 = vld [vmem:[%s7362_s1 + $0x154] sm:$0xf]  ;;  %v3628_v8 = vld [vmem:[%s7362_s1 + $0x168] sm:$0xf0] }
   0x3   :  { %v3627_v7 = vor.u32 %v4853_v5, %v3626_v4  ;;  %v3602_v9 = vld [vmem:[%s7362_s1 + $0x120] sm:$0xf]  ;;  %v4847_v10 = vld [vmem:[%s7362_s1 + $0x134] sm:$0xf0]  ;;  %v3631_v13 = vor.u32 %v4850_v6, %v3628_v8  ;;  %v4844_v14 = vld [vmem:[%s7362_s1 + $0x124] sm:$0xf] }
   0x4   :  { %v45_v11 = vunpack.c.l.b16 %v41_v2  ;;  %v46_v12 = vunpack.c.l.b16 %v42_v3  ;;  %v3604_v15 = vld [vmem:[%s7362_s1 + $0x138] sm:$0xf0]  ;;  %v3770_v16 = vld [vmem:[%s7362_s1 + $0x270] sm:$0xf]  ;;  %v3603_v17 = vor.u32 %v4847_v10, %v3602_v9  ;;  %v4889_v19 = vld [vmem:[%s7362_s1 + $0x284] sm:$0xf0] }
   0x5   :  { %594 = vmatpush.bf16.msra.mxu0 %v3627_v7  ;;  %v3607_v18 = vor.u32 %v4844_v14, %v3604_v15  ;;  %v4886_v20 = vld [vmem:[%s7362_s1 + $0x274] sm:$0xf]  ;;  %v3772_v21 = vld [vmem:[%s7362_s1 + $0x288] sm:$0xf0]  ;;  %622 = vmatpush.bf16.msra.mxu2 %v3631_v13  ;;  %v3771_v24 = vor.u32 %v4889_v19, %v3770_v16  ;;  %v3578_v26 = vld [vmem:[%s7362_s1 + $0xf0] sm:$0xf] }
   0x6   :  { %v5297_v22 = vpack.c.b16 %v46_v12, %v45_v11  ;;  %v56_v23 = vpack.c.b16 %v45_v11, %v45_v11  ;;  %v3775_v25 = vor.u32 %v4886_v20, %v3772_v21  ;;  %v4841_v27 = vld [vmem:[%s7362_s1 + $0x104] sm:$0xf0]  ;;  %v4838_v28 = vld [vmem:[%s7362_s1 + $0xf4] sm:$0xf]  ;;  %v3580_v29 = vld [vmem:[%s7362_s1 + $0x108] sm:$0xf0] }
   0x7   :  { %v3746_v30 = vld [vmem:[%s7362_s1 + $0x240] sm:$0xf]  ;;  %v4883_v31 = vld [vmem:[%s7362_s1 + $0x254] sm:$0xf0]  ;;  %610 = vmatpush.bf16.msra.mxu1 %v3771_v24  ;;  %v4880_v35 = vld [vmem:[%s7362_s1 + $0x244] sm:$0xf]  ;;  %v3579_v36 = vor.u32 %v4841_v27, %v3578_v26  ;;  %v3583_v44 = vor.u32 %v4838_v28, %v3580_v29 }
   0x8   :  { %v49_v32 = vshrl.u32 %v5297_v22, 16  ;;  %v51_v33 = vshll.u32 %v5297_v22, 16  ;;  %v58_v34 = vshll.u32 %v56_v23, 16  ;;  %638 = vmatpush.bf16.msra.mxu3 %v3775_v25  ;;  %v3747_v37 = vor.u32 %v4883_v31, %v3746_v30  ;;  %v3748_v38 = vld [vmem:[%s7362_s1 + $0x258] sm:$0xf0]  ;;  %vm5333_vm2 = vmand %vm62_vm0, %vm63_vm1  ;;  %s5192_s12 = smov 32  }
   0x9   :  { %595 = vmatpush.bf16.msra.mxu0 %v3603_v17  ;;  %v3554_v39 = vld [vmem:[%s7362_s1 + $0xc0] sm:$0xf]  ;;  %v4835_v40 = vld [vmem:[%s7362_s1 + $0xd4] sm:$0xf0]  ;;  %623 = vmatpush.bf16.msra.mxu2 %v3607_v18  ;;  %v3751_v45 = vor.u32 %v4880_v35, %v3748_v38  ;;  %v4832_v46 = vld [vmem:[%s7362_s1 + $0xc4] sm:$0xf] }
   0xa   :  { %v53_v41 = vrot.slane %v51_v33, 1  ;;  %v60_v42 = vrot.slane %v58_v34, 1  ;;  %v3556_v47 = vld [vmem:[%s7362_s1 + $0xd8] sm:$0xf0]  ;;  %v3722_v48 = vld [vmem:[%s7362_s1 + $0x210] sm:$0xf]  ;;  %v3555_v54 = vor.u32 %v4835_v40, %v3554_v39 }
   0xb   :  { %v4877_v49 = vld [vmem:[%s7362_s1 + $0x224] sm:$0xf0]  ;;  %v4874_v50 = vld [vmem:[%s7362_s1 + $0x214] sm:$0xf]  ;;  %611 = vmatpush.bf16.msra.mxu1 %v3747_v37  ;;  %v3724_v53 = vld [vmem:[%s7362_s1 + $0x228] sm:$0xf0]  ;;  %v3559_v60 = vor.u32 %v4832_v46, %v3556_v47 }
   0xc   :  { %v54_v51 = vor.u32 %v53_v41, %v49_v32  ;;  %639 = vmatpush.bf16.msra.mxu3 %v3751_v45  ;;  %v3723_v52 = vor.u32 %v4877_v49, %v3722_v48  ;;  %v3727_v55 = vor.u32 %v4874_v50, %v3724_v53  ;;  %v3530_v56 = vld [vmem:[%s7362_s1 + $0x90] sm:$0xf]  ;;  %v4829_v57 = vld [vmem:[%s7362_s1 + $0xa4] sm:$0xf0]  ;;  %v3698_v58 = vld [vmem:[%s7362_s1 + $0x1e0] sm:$0xf] }
   0xd   :  { %596 = vmatpush.bf16.msra.mxu0 %v3579_v36  ;;  %624 = vmatpush.bf16.msra.mxu2 %v3583_v44  ;;  %v4871_v61 = vld [vmem:[%s7362_s1 + $0x1f4] sm:$0xf0]  ;;  %v4868_v62 = vld [vmem:[%s7362_s1 + $0x1e4] sm:$0xf]  ;;  %v3700_v63 = vld [vmem:[%s7362_s1 + $0x1f8] sm:$0xf0]  ;;  %v3531_v5 = vor.u32 %v4829_v57, %v3530_v56 }
   0xe   :  { %v65_v59 = vsel %vm5333_vm2, %v54_v51, %v60_v42  ;;  %v4826_v0 = vld [vmem:[%s7362_s1 + $0x94] sm:$0xf]  ;;  %v3532_v1 = vld [vmem:[%s7362_s1 + $0xa8] sm:$0xf0]  ;;  %v3699_v2 = vor.u32 %v4871_v61, %v3698_v58  ;;  %v3703_v3 = vor.u32 %v4868_v62, %v3700_v63  ;;  %v3674_v4 = vld [vmem:[%s7362_s1 + $0x1b0] sm:$0xf] }
   0xf   :  { %67 = vrot.lane.b32.xlu0 %v65_v59, %s5189_s0  ;;  %612 = vmatpush.bf16.msra.mxu1 %v3723_v52  ;;  %v4865_v6 = vld [vmem:[%s7362_s1 + $0x1c4] sm:$0xf0]  ;;  %v4862_v7 = vld [vmem:[%s7362_s1 + $0x1b4] sm:$0xf]  ;;  %v3676_v8 = vld [vmem:[%s7362_s1 + $0x1c8] sm:$0xf0]  ;;  %v3535_v9 = vor.u32 %v4826_v0, %v3532_v1 }
  0x10   :  { %640 = vmatpush.bf16.msra.mxu3 %v3727_v55  ;;  %v3506_v10 = vld [vmem:[%s7362_s1 + $0x60] sm:$0xf]  ;;  %v4823_v11 = vld [vmem:[%s7362_s1 + $0x74] sm:$0xf0]  ;;  %v4820_v12 = vld [vmem:[%s7362_s1 + $0x64] sm:$0xf]  ;;  %v3675_v14 = vor.u32 %v4865_v6, %v3674_v4  ;;  %v3679_v15 = vor.u32 %v4862_v7, %v3676_v8 }
  0x11   :  { %597 = vmatpush.bf16.msra.mxu0 %v3555_v54  ;;  %625 = vmatpush.bf16.msra.mxu2 %v3559_v60  ;;  %v3508_v13 = vld [vmem:[%s7362_s1 + $0x78] sm:$0xf0]  ;;  %v3482_v16 = vld [vmem:[%s7362_s1 + $0x30] sm:$0xf]  ;;  %v4817_v17 = vld [vmem:[%s7362_s1 + $0x44] sm:$0xf0]  ;;  %v3507_v19 = vor.u32 %v4823_v11, %v3506_v10 }
  0x12   :  { %v3650_v18 = vld [vmem:[%s7362_s1 + $0x180] sm:$0xf]  ;;  %v4859_v20 = vld [vmem:[%s7362_s1 + $0x194] sm:$0xf0]  ;;  %v4856_v21 = vld [vmem:[%s7362_s1 + $0x184] sm:$0xf]  ;;  %v3511_v24 = vor.u32 %v4820_v12, %v3508_v13  ;;  %v3483_v33 = vor.u32 %v4817_v17, %v3482_v16 }
  0x13   :  { %613 = vmatpush.bf16.msra.mxu1 %v3699_v2  ;;  %v3652_v23 = vld [vmem:[%s7362_s1 + $0x198] sm:$0xf0]  ;;  %v4814_v25 = vld [vmem:[%s7362_s1 + $0x34] sm:$0xf]  ;;  %v3634_v26 = vld [vmem:[%s7362_s1 + $0x158] sm:$0xf]  ;;  %v3651_v31 = vor.u32 %v4859_v20, %v3650_v18 }
  0x14   :  { %641 = vmatpush.bf16.msra.mxu3 %v3703_v3  ;;  %v4854_v27 = vld [vmem:[%s7362_s1 + $0x16c] sm:$0xf0]  ;;  %v3484_v28 = vld [vmem:[%s7362_s1 + $0x48] sm:$0xf0]  ;;  %v3778_v29 = vld [vmem:[%s7362_s1 + $0x278] sm:$0xf]  ;;  %v3655_v32 = vor.u32 %v4856_v21, %v3652_v23 }
  0x15   :  { %598 = vmatpush.bf16.msra.mxu0 %v3531_v5  ;;  %626 = vmatpush.bf16.msra.mxu2 %v3535_v9  ;;  %v4890_v30 = vld [vmem:[%s7362_s1 + $0x28c] sm:$0xf0]  ;;  %v3458_v34 = vld [vmem:[%s7362_s1] sm:$0xf]  ;;  %v4811_v35 = vld [vmem:[%s7362_s1 + $0x14] sm:$0xf0]  ;;  %v3635_v37 = vor.u32 %v4854_v27, %v3634_v26  ;;  %v3487_v38 = vor.u32 %v4814_v25, %v3484_v28 }
  0x16   :  { %v4808_v36 = vld [vmem:[%s7362_s1 + $0x4] sm:$0xf]  ;;  %v3460_v39 = vld [vmem:[%s7362_s1 + $0x18] sm:$0xf0]  ;;  %v3779_v40 = vor.u32 %v4890_v30, %v3778_v29  ;;  %v3610_v41 = vld [vmem:[%s7362_s1 + $0x128] sm:$0xf]  ;;  %v3459_v50 = vor.u32 %v4811_v35, %v3458_v34 }
  0x17   :  { %614 = vmatpush.bf16.msra.mxu1 %v3675_v14  ;;  %v4848_v42 = vld [vmem:[%s7362_s1 + $0x13c] sm:$0xf0]  ;;  %v4851_v44 = vld [vmem:[%s7362_s1 + $0x15c] sm:$0xf]  ;;  %v3636_v45 = vld [vmem:[%s7362_s1 + $0x170] sm:$0xf0]  ;;  %v3463_v52 = vor.u32 %v4808_v36, %v3460_v39 }
  0x18   :  { %642 = vmatpush.bf16.msra.mxu3 %v3679_v15  ;;  %v4887_v46 = vld [vmem:[%s7362_s1 + $0x27c] sm:$0xf]  ;;  %v3780_v47 = vld [vmem:[%s7362_s1 + $0x290] sm:$0xf0]  ;;  %v3754_v48 = vld [vmem:[%s7362_s1 + $0x248] sm:$0xf]  ;;  %v3611_v51 = vor.u32 %v4848_v42, %v3610_v41  ;;  %v3639_v53 = vor.u32 %v4851_v44, %v3636_v45 }
  0x19   :  { %599 = vmatpush.bf16.msra.mxu0 %v3507_v19  ;;  %627 = vmatpush.bf16.msra.mxu2 %v3511_v24  ;;  %v4884_v49 = vld [vmem:[%s7362_s1 + $0x25c] sm:$0xf0]  ;;  %v3586_v54 = vld [vmem:[%s7362_s1 + $0xf8] sm:$0xf]  ;;  %v4842_v55 = vld [vmem:[%s7362_s1 + $0x10c] sm:$0xf0]  ;;  %v3783_v56 = vor.u32 %v4887_v46, %v3780_v47 }
  0x1a   :  { %v3755_v57 = vor.u32 %v4884_v49, %v3754_v48  ;;  %v4845_v58 = vld [vmem:[%s7362_s1 + $0x12c] sm:$0xf]  ;;  %v3612_v59 = vld [vmem:[%s7362_s1 + $0x140] sm:$0xf0]  ;;  %v3730_v62 = vld [vmem:[%s7362_s1 + $0x218] sm:$0xf]  ;;  %v3587_v0 = vor.u32 %v4842_v55, %v3586_v54 }
  0x1b   :  { %615 = vmatpush.bf16.msra.mxu1 %v3651_v31  ;;  %v4881_v60 = vld [vmem:[%s7362_s1 + $0x24c] sm:$0xf]  ;;  %v3756_v61 = vld [vmem:[%s7362_s1 + $0x260] sm:$0xf0]  ;;  %v4878_v63 = vld [vmem:[%s7362_s1 + $0x22c] sm:$0xf0]  ;;  %v3615_v1 = vor.u32 %v4845_v58, %v3612_v59 }
  0x1c   :  { %643 = vmatpush.bf16.msra.mxu3 %v3655_v32  ;;  %v3562_v2 = vld [vmem:[%s7362_s1 + $0xc8] sm:$0xf]  ;;  %v4836_v3 = vld [vmem:[%s7362_s1 + $0xdc] sm:$0xf0]  ;;  %v3759_v4 = vor.u32 %v4881_v60, %v3756_v61  ;;  %v3731_v5 = vor.u32 %v4878_v63, %v3730_v62  ;;  %v4839_v6 = vld [vmem:[%s7362_s1 + $0xfc] sm:$0xf] }
  0x1d   :  { %600 = vmatpush.bf16.msra.mxu0 %v3483_v33  ;;  %628 = vmatpush.bf16.msra.mxu2 %v3487_v38  ;;  %v3588_v7 = vld [vmem:[%s7362_s1 + $0x110] sm:$0xf0]  ;;  %v4875_v8 = vld [vmem:[%s7362_s1 + $0x21c] sm:$0xf]  ;;  %v3706_v10 = vld [vmem:[%s7362_s1 + $0x1e8] sm:$0xf]  ;;  %v3563_v12 = vor.u32 %v4836_v3, %v3562_v2 }
  0x1e   :  { %v3732_v9 = vld [vmem:[%s7362_s1 + $0x230] sm:$0xf0]  ;;  %v4872_v11 = vld [vmem:[%s7362_s1 + $0x1fc] sm:$0xf0]  ;;  %v3591_v13 = vor.u32 %v4839_v6, %v3588_v7  ;;  %v3538_v14 = vld [vmem:[%s7362_s1 + $0x98] sm:$0xf] }
  0x1f   :  { %650 = vmatpush.bf16.msrb.mxu1 %v3635_v37  ;;  %v4830_v15 = vld [vmem:[%s7362_s1 + $0xac] sm:$0xf0]  ;;  %v3735_v16 = vor.u32 %v4875_v8, %v3732_v9  ;;  %v3707_v17 = vor.u32 %v4872_v11, %v3706_v10  ;;  %v4833_v18 = vld [vmem:[%s7362_s1 + $0xcc] sm:$0xf]  ;;  %v3564_v19 = vld [vmem:[%s7362_s1 + $0xe0] sm:$0xf0] }
  0x20   :  { %666 = vmatpush.bf16.msrb.mxu3 %v3779_v40  ;;  %v4869_v20 = vld [vmem:[%s7362_s1 + $0x1ec] sm:$0xf]  ;;  %v3708_v21 = vld [vmem:[%s7362_s1 + $0x200] sm:$0xf0]  ;;  %v3682_v23 = vld [vmem:[%s7362_s1 + $0x1b8] sm:$0xf]  ;;  %v3539_v25 = vor.u32 %v4830_v15, %v3538_v14  ;;  %v3567_v26 = vor.u32 %v4833_v18, %v3564_v19 }
  0x21   :  { %601 = vmatpush.bf16.msra.mxu0 %v3459_v50  ;;  %629 = vmatpush.bf16.msra.mxu2 %v3463_v52  ;;  %v4866_v24 = vld [vmem:[%s7362_s1 + $0x1cc] sm:$0xf0]  ;;  %v3711_v27 = vor.u32 %v4869_v20, %v3708_v21  ;;  %v4827_v29 = vld [vmem:[%s7362_s1 + $0x9c] sm:$0xf]  ;;  %v3540_v30 = vld [vmem:[%s7362_s1 + $0xb0] sm:$0xf0] }
  0x22   :  { %v3683_v28 = vor.u32 %v4866_v24, %v3682_v23  ;;  %v4863_v31 = vld [vmem:[%s7362_s1 + $0x1bc] sm:$0xf]  ;;  %v3684_v32 = vld [vmem:[%s7362_s1 + $0x1d0] sm:$0xf0]  ;;  %v3543_v33 = vor.u32 %v4827_v29, %v3540_v30  ;;  %v3514_v35 = vld [vmem:[%s7362_s1 + $0x68] sm:$0xf] }
  0x23   :  { %651 = vmatpush.bf16.msrb.mxu1 %v3611_v51  ;;  %v3687_v34 = vor.u32 %v4863_v31, %v3684_v32  ;;  %v4824_v36 = vld [vmem:[%s7362_s1 + $0x7c] sm:$0xf0]  ;;  %v3658_v37 = vld [vmem:[%s7362_s1 + $0x188] sm:$0xf]  ;;  %v4821_v40 = vld [vmem:[%s7362_s1 + $0x6c] sm:$0xf] }
  0x24   :  { %667 = vmatpush.bf16.msrb.mxu3 %v3755_v57  ;;  %v3515_v38 = vor.u32 %v4824_v36, %v3514_v35  ;;  %v4860_v39 = vld [vmem:[%s7362_s1 + $0x19c] sm:$0xf0]  ;;  %v3516_v41 = vld [vmem:[%s7362_s1 + $0x80] sm:$0xf0]  ;;  %v4857_v45 = vld [vmem:[%s7362_s1 + $0x18c] sm:$0xf] }
  0x25   :  { %678 = vmatpush.bf16.msrb.mxu0 %v3639_v53  ;;  %694 = vmatpush.bf16.msrb.mxu2 %v3783_v56  ;;  %v3659_v42 = vor.u32 %v4860_v39, %v3658_v37  ;;  %v3519_v44 = vor.u32 %v4821_v40, %v3516_v41  ;;  %v3660_v46 = vld [vmem:[%s7362_s1 + $0x1a0] sm:$0xf0]  ;;  %v3490_v48 = vld [vmem:[%s7362_s1 + $0x38] sm:$0xf]  ;;  %v4818_v49 = vld [vmem:[%s7362_s1 + $0x4c] sm:$0xf0] }
  0x26   :  { %v3663_v47 = vor.u32 %v4857_v45, %v3660_v46  ;;  %v4815_v50 = vld [vmem:[%s7362_s1 + $0x3c] sm:$0xf]  ;;  %v3491_v51 = vor.u32 %v4818_v49, %v3490_v48  ;;  %v3492_v52 = vld [vmem:[%s7362_s1 + $0x50] sm:$0xf0]  ;;  %v3466_v54 = vld [vmem:[%s7362_s1 + $0x8] sm:$0xf] }
  0x27   :  { %652 = vmatpush.bf16.msrb.mxu1 %v3587_v0  ;;  %v3495_v53 = vor.u32 %v4815_v50, %v3492_v52  ;;  %v4812_v55 = vld [vmem:[%s7362_s1 + $0x1c] sm:$0xf0]  ;;  %v4809_v56 = vld [vmem:[%s7362_s1 + $0xc] sm:$0xf]  ;;  %v3468_v58 = vld [vmem:[%s7362_s1 + $0x20] sm:$0xf0] }
  0x28   :  { %668 = vmatpush.bf16.msrb.mxu3 %v3731_v5  ;;  %v3467_v57 = vor.u32 %v4812_v55, %v3466_v54  ;;  %v3471_v59 = vor.u32 %v4809_v56, %v3468_v58  ;;  %v3642_v60 = vld [vmem:[%s7362_s1 + $0x160] sm:$0xf]  ;;  %v4855_v61 = vld [vmem:[%s7362_s1 + $0x174] sm:$0xf0]  ;;  %v4852_v62 = vld [vmem:[%s7362_s1 + $0x164] sm:$0xf] }
  0x29   :  { %679 = vmatpush.bf16.msrb.mxu0 %v3615_v1  ;;  %695 = vmatpush.bf16.msrb.mxu2 %v3759_v4  ;;  %v3644_v63 = vld [vmem:[%s7362_s1 + $0x178] sm:$0xf0]  ;;  %v3786_v0 = vld [vmem:[%s7362_s1 + $0x280] sm:$0xf]  ;;  %v4891_v1 = vld [vmem:[%s7362_s1 + $0x294] sm:$0xf0]  ;;  %v3643_v4 = vor.u32 %v4855_v61, %v3642_v60 }
  0x2a   :  { %v4888_v2 = vld [vmem:[%s7362_s1 + $0x284] sm:$0xf]  ;;  %v3788_v3 = vld [vmem:[%s7362_s1 + $0x298] sm:$0xf0]  ;;  %v3647_v5 = vor.u32 %v4852_v62, %v3644_v63  ;;  %v3618_v6 = vld [vmem:[%s7362_s1 + $0x130] sm:$0xf]  ;;  %v3787_v11 = vor.u32 %v4891_v1, %v3786_v0 }
  0x2b   :  { %653 = vmatpush.bf16.msrb.mxu1 %v3563_v12  ;;  %v4849_v7 = vld [vmem:[%s7362_s1 + $0x144] sm:$0xf0]  ;;  %v4846_v9 = vld [vmem:[%s7362_s1 + $0x134] sm:$0xf]  ;;  %v3620_v10 = vld [vmem:[%s7362_s1 + $0x148] sm:$0xf0]  ;;  %v3791_v12 = vor.u32 %v4888_v2, %v3788_v3 }
  0x2c   :  { %669 = vmatpush.bf16.msrb.mxu3 %v3707_v17  ;;  %v4885_v15 = vld [vmem:[%s7362_s1 + $0x264] sm:$0xf0]  ;;  %v3764_v17 = vld [vmem:[%s7362_s1 + $0x268] sm:$0xf0]  ;;  %v3623_v18 = vor.u32 %v4846_v9, %v3620_v10  ;;  %v3594_v19 = vld [vmem:[%s7362_s1 + $0x100] sm:$0xf] }
  0x2d   :  { %680 = vmatpush.bf16.msrb.mxu0 %v3591_v13  ;;  %696 = vmatpush.bf16.msrb.mxu2 %v3735_v16  ;;  %v3762_v13 = vld [vmem:[%s7362_s1 + $0x250] sm:$0xf]  ;;  %v4882_v16 = vld [vmem:[%s7362_s1 + $0x254] sm:$0xf]  ;;  %v4843_v20 = vld [vmem:[%s7362_s1 + $0x114] sm:$0xf0] }
  0x2e   :  { %v4840_v21 = vld [vmem:[%s7362_s1 + $0x104] sm:$0xf]  ;;  %v3596_v23 = vld [vmem:[%s7362_s1 + $0x118] sm:$0xf0]  ;;  %v3763_v24 = vor.u32 %v4885_v15, %v3762_v13  ;;  %v3595_v30 = vor.u32 %v4843_v20, %v3594_v19  ;;  %v3570_v32 = vld [vmem:[%s7362_s1 + $0xd0] sm:$0xf] }
  0x2f   :  { %654 = vmatpush.bf16.msrb.mxu1 %v3539_v25  ;;  %v3767_v25 = vor.u32 %v4882_v16, %v3764_v17  ;;  %v3740_v29 = vld [vmem:[%s7362_s1 + $0x238] sm:$0xf0]  ;;  %v3599_v31 = vor.u32 %v4840_v21, %v3596_v23  ;;  %v3572_v35 = vld [vmem:[%s7362_s1 + $0xe8] sm:$0xf0]  ;;  %v4873_v39 = vld [vmem:[%s7362_s1 + $0x204] sm:$0xf0] }
  0x30   :  { %670 = vmatpush.bf16.msrb.mxu3 %v3683_v28  ;;  %v4876_v28 = vld [vmem:[%s7362_s1 + $0x224] sm:$0xf]  ;;  %v4870_v40 = vld [vmem:[%s7362_s1 + $0x1f4] sm:$0xf]  ;;  %v3716_v41 = vld [vmem:[%s7362_s1 + $0x208] sm:$0xf0] }
  0x31   :  { %681 = vmatpush.bf16.msrb.mxu0 %v3567_v26  ;;  %697 = vmatpush.bf16.msrb.mxu2 %v3711_v27  ;;  %v3738_v26 = vld [vmem:[%s7362_s1 + $0x220] sm:$0xf]  ;;  %v4879_v27 = vld [vmem:[%s7362_s1 + $0x234] sm:$0xf0]  ;;  %v3743_v37 = vor.u32 %v4876_v28, %v3740_v29  ;;  %v3548_v48 = vld [vmem:[%s7362_s1 + $0xb8] sm:$0xf0]  ;;  %v3719_v50 = vor.u32 %v4870_v40, %v3716_v41 }
  0x32   :  { %v3739_v36 = vor.u32 %v4879_v27, %v3738_v26  ;;  %v3546_v45 = vld [vmem:[%s7362_s1 + $0xa0] sm:$0xf]  ;;  %v4831_v46 = vld [vmem:[%s7362_s1 + $0xb4] sm:$0xf0]  ;;  %v3692_v54 = vld [vmem:[%s7362_s1 + $0x1d8] sm:$0xf0] }
  0x33   :  { %655 = vmatpush.bf16.msrb.mxu1 %v3515_v38  ;;  %v3714_v38 = vld [vmem:[%s7362_s1 + $0x1f0] sm:$0xf]  ;;  %v4867_v52 = vld [vmem:[%s7362_s1 + $0x1d4] sm:$0xf0]  ;;  %v3547_v55 = vor.u32 %v4831_v46, %v3546_v45  ;;  %v4825_v58 = vld [vmem:[%s7362_s1 + $0x84] sm:$0xf0] }
  0x34   :  { %671 = vmatpush.bf16.msrb.mxu3 %v3659_v42  ;;  %v3715_v49 = vor.u32 %v4873_v39, %v3714_v38  ;;  %v3524_v60 = vld [vmem:[%s7362_s1 + $0x88] sm:$0xf0]  ;;  %v3666_v63 = vld [vmem:[%s7362_s1 + $0x190] sm:$0xf]  ;;  %v4861_v0 = vld [vmem:[%s7362_s1 + $0x1a4] sm:$0xf0] }
  0x35   :  { %682 = vmatpush.bf16.msrb.mxu0 %v3543_v33  ;;  %698 = vmatpush.bf16.msrb.mxu2 %v3687_v34  ;;  %v4837_v33 = vld [vmem:[%s7362_s1 + $0xe4] sm:$0xf0]  ;;  %v4834_v34 = vld [vmem:[%s7362_s1 + $0xd4] sm:$0xf]  ;;  %v3668_v2 = vld [vmem:[%s7362_s1 + $0x1a8] sm:$0xf0]  ;;  %v3667_v10 = vor.u32 %v4861_v0, %v3666_v63 }
  0x36   :  { %v3571_v42 = vor.u32 %v4837_v33, %v3570_v32  ;;  %v4858_v1 = vld [vmem:[%s7362_s1 + $0x194] sm:$0xf]  ;;  %v3500_v9 = vld [vmem:[%s7362_s1 + $0x58] sm:$0xf0]  ;;  %v3474_v15 = vld [vmem:[%s7362_s1 + $0x10] sm:$0xf] }
  0x37   :  { %656 = vmatpush.bf16.msrb.mxu1 %v3491_v51  ;;  %v3690_v51 = vld [vmem:[%s7362_s1 + $0x1c0] sm:$0xf]  ;;  %v4813_v16 = vld [vmem:[%s7362_s1 + $0x24] sm:$0xf0]  ;;  %v4810_v17 = vld [vmem:[%s7362_s1 + $0x14] sm:$0xf] }
  0x38   :  { %v3691_v61 = vor.u32 %v4867_v52, %v3690_v51  ;;  %v5805_v20 = vld [vmem:[%s7363_s2] sm:$0x3f]  ;;  %vm881_vm6 = vcmask 326656   ;;  %vm958_vm7 = vcmask 1046528   ;;  %vm979_vm8 = vcmask 654336   ;;  %s5194_s25 = smov 64  }
  0x39   :  { %683 = vmatpush.bf16.msrb.mxu0 %v3519_v44  ;;  %699 = vmatpush.bf16.msrb.mxu2 %v3663_v47  ;;  %v3575_v44 = vor.u32 %v4834_v34, %v3572_v35  ;;  %v4828_v47 = vld [vmem:[%s7362_s1 + $0xa4] sm:$0xf]  ;;  %v159_v21 = vperm.slane %v5805_v20, 0  ;;  %v162_v35 = vperm.slane %v5805_v20, 3  ;;  %v163_v51 = vperm.slane %v5805_v20, 4  ;;  %v5091_v43 = vld [vmem:[%s7366_s5 + $0x50] sm:$0xff] }
  0x3a   :  { %v3551_v56 = vor.u32 %v4828_v47, %v3548_v48  ;;  %v164_v52 = vperm.slane %v5805_v20, 5  ;;  %vm993_vm9 = vcmask 261120   ;;  %vm2734_vm10 = vsmask.f32 6400 }
  0x3b   :  { %657 = vmatpush.bf16.msrb.mxu1 %v3467_v57  ;;  %v3522_v57 = vld [vmem:[%s7362_s1 + $0x70] sm:$0xf]  ;;  %vm2742_vm11 = vcmask 1045504   ;;  %vm2735_vm12 = vmand %vm958_vm7, %vm2734_vm10  ;;  %vm2764_vm13 = vcmask 523264   ;;  %vm3360_vm14 = vcmask 1043456   ;;  %vm3431_vm15 = vcmask 1041408  }
  0x3c   :  { %v3523_v3 = vor.u32 %v4825_v58, %v3522_v57  ;;  %vm3356_vm0 = vcmask 982016   ;;  %vm3427_vm1 = vcmask 687104  }
  0x3d   :  { %684 = vmatpush.bf16.msrb.mxu0 %v3495_v53  ;;  %v4864_v53 = vld [vmem:[%s7362_s1 + $0x1c4] sm:$0xf] }
  0x3e   :  { %v3695_v62 = vor.u32 %v4864_v53, %v3692_v54 }
  0x41   :  { %685 = vmatpush.bf16.msrb.mxu0 %v3471_v59  ;;  %v4822_v59 = vld [vmem:[%s7362_s1 + $0x74] sm:$0xf] }
  0x81   :  { %v5639_v8 = vpop.permute.xlu0 %67 }
  0x82   :  { %3792 = vmatmul.msk.bf16.vlgmr.msra.gmra.mxu1 %vm591_vm3, %v5639_v8  ;;  %3793 = vmatmul.msk.bf16.vlgmr.msra.gmra.mxu3 %vm591_vm3, %v5639_v8  ;;  %v5657_v14 = vsel %vm69_vm4, %v5297_v22, %v5639_v8  ;;  %v3619_v22 = vor.u32 %v4849_v7, %v3618_v6  ;;  %v4819_v6 = vld [vmem:[%s7362_s1 + $0x54] sm:$0xf0]  ;;  %v4816_v7 = vld [vmem:[%s7362_s1 + $0x44] sm:$0xf] }
  0x83   :  { %602 = vmatmul.bf16.vlgmr.msra.gmra.mxu0 %v5657_v14  ;;  %630 = vmatmul.bf16.vlgmr.msra.gmra.mxu2 %v5657_v14  ;;  %v3503_v13 = vor.u32 %v4816_v7, %v3500_v9 }
  0x84   :  { %706 = vmatpush.bf16.msra.mxu3 %v3643_v4  ;;  %734 = vmatpush.bf16.msra.mxu2 %v3647_v5  ;;  %v3527_v4 = vor.u32 %v4822_v59, %v3524_v60  ;;  %v3498_v5 = vld [vmem:[%s7362_s1 + $0x40] sm:$0xf]  ;;  %v160_v60 = vperm.slane %v5805_v20, 1 }
  0x85   :  { %722 = vmatpush.bf16.msra.mxu1 %v3787_v11  ;;  %750 = vmatpush.bf16.msra.mxu0 %v3791_v12  ;;  %v3671_v11 = vor.u32 %v4858_v1, %v3668_v2  ;;  %v3499_v12 = vor.u32 %v4819_v6, %v3498_v5  ;;  %v161_v1 = vperm.slane %v5805_v20, 2 }
  0x88   :  { %707 = vmatpush.bf16.msra.mxu3 %v3619_v22  ;;  %735 = vmatpush.bf16.msra.mxu2 %v3623_v18  ;;  %v3476_v22 = vld [vmem:[%s7362_s1 + $0x28] sm:$0xf0]  ;;  %v3475_v18 = vor.u32 %v4813_v16, %v3474_v15  ;;  %s5190_s1 = smov 88  }
  0x89   :  { %723 = vmatpush.bf16.msra.mxu1 %v3763_v24  ;;  %751 = vmatpush.bf16.msra.mxu0 %v3767_v25  ;;  %v3479_v19 = vor.u32 %v4810_v17, %v3476_v22 }
  0x8c   :  { %708 = vmatpush.bf16.msra.mxu3 %v3595_v30  ;;  %736 = vmatpush.bf16.msra.mxu2 %v3599_v31 }
  0x8d   :  { %724 = vmatpush.bf16.msra.mxu1 %v3739_v36  ;;  %752 = vmatpush.bf16.msra.mxu0 %v3743_v37 }
  0x90   :  { %709 = vmatpush.bf16.msra.mxu3 %v3571_v42  ;;  %737 = vmatpush.bf16.msra.mxu2 %v3575_v44 }
  0x91   :  { %725 = vmatpush.bf16.msra.mxu1 %v3715_v49  ;;  %753 = vmatpush.bf16.msra.mxu0 %v3719_v50 }
  0x92   :  { %658 = vmatmul.bf16.vlgmr.msrb.gmra.mxu1 %v5657_v14  ;;  %3794 = vmatmul.msk.bf16.vlgmr.msrb.gmra.mxu3 %vm591_vm3, %v5639_v8 }
  0x93   :  { %686 = vmatmul.bf16.vlgmr.msrb.gmra.mxu0 %v5657_v14  ;;  %3795 = vmatmul.msk.bf16.vlgmr.msrb.gmra.mxu2 %vm591_vm3, %v5639_v8 }
  0x94   :  { %710 = vmatpush.bf16.msra.mxu3 %v3547_v55  ;;  %738 = vmatpush.bf16.msra.mxu2 %v3551_v56 }
  0x95   :  { %726 = vmatpush.bf16.msra.mxu1 %v3691_v61  ;;  %754 = vmatpush.bf16.msra.mxu0 %v3695_v62 }
  0x98   :  { %711 = vmatpush.bf16.msra.mxu3 %v3523_v3  ;;  %739 = vmatpush.bf16.msra.mxu2 %v3527_v4 }
  0x99   :  { %727 = vmatpush.bf16.msra.mxu1 %v3667_v10  ;;  %755 = vmatpush.bf16.msra.mxu0 %v3671_v11 }
  0x9c   :  { %712 = vmatpush.bf16.msra.mxu3 %v3499_v12  ;;  %740 = vmatpush.bf16.msra.mxu2 %v3503_v13 }
  0xa0   :  { %713 = vmatpush.bf16.msra.mxu3 %v3475_v18  ;;  %741 = vmatpush.bf16.msra.mxu2 %v3479_v19 }
  0xa2   :  { %3796 = vmatmul.msk.bf16.vlgmr.msra.gmra.mxu1 %vm591_vm3, %v5639_v8 }
  0xa3   :  { %714 = vmatmul.bf16.vlgmr.msra.gmra.mxu3 %v5657_v14  ;;  %742 = vmatmul.bf16.vlgmr.msra.gmra.mxu2 %v5657_v14 }
  0xa4   :  { %3797 = vmatmul.msk.bf16.vlgmr.msra.gmra.mxu0 %vm591_vm3, %v5639_v8 }
  0xff   :  { %v617_v23 = vpop.f32.mrf.mxu1 }
 0x100   :  { %v603_v24 = vpop.f32.mrf.mxu0 }
 0x101   :  { %v604_v25 = vadd.f32 %v603_v24, %v159_v21 }
 0x103   :  { %v5808_v26 = vadd.f32 %v617_v23, %v604_v25 }
 0x105   :  { %v645_v27 = vpop.f32.mrf.mxu3 }
 0x106   :  { %v631_v28 = vpop.f32.mrf.mxu2 }
 0x107   :  { %v619_v29 = vpop.f32.mrf.mxu1  ;;  %v632_v3 = vadd.f32 %v631_v28, %v160_v60 }
 0x108   :  { %v605_v30 = vpop.f32.mrf.mxu0 }
 0x109   :  { %v606_v14 = vadd.f32 %v605_v30, %v159_v21  ;;  %v646_v13 = vadd.f32 %v645_v27, %v632_v3 }
 0x10b   :  { %v5810_v31 = vadd.f32 %v619_v29, %v606_v14  ;;  %v763_v24 = vmul.f32 0.5, %v646_v13  ;;  %v3968_v13 = vld [vmem:[%s7364_s3 + $0x150] sm:$0xf] }
 0x10d   :  { %v647_v8 = vpop.f32.mrf.mxu3 }
 0x10e   :  { %v633_v32 = vpop.f32.mrf.mxu2 }
 0x10f   :  { %v659_v34 = vpop.f32.mrf.mxu1  ;;  %v634_v6 = vadd.f32 %v633_v32, %v160_v60 }
 0x110   :  { %v687_v33 = vpop.f32.mrf.mxu0  ;;  %v660_v10 = vadd.f32 %v659_v34, %v161_v1 }
 0x111   :  { %v688_v36 = vadd.f32 %v687_v33, %v162_v35  ;;  %v648_v19 = vadd.f32 %v647_v8, %v634_v6  ;;  %v3884_v6 = vld [vmem:[%s7364_s3 + $0xa8] sm:$0xf] }
 0x113   :  { %v769_v29 = vmul.f32 0.5, %v648_v19  ;;  %v3956_v19 = vld [vmem:[%s7364_s3 + $0x138] sm:$0xf] }
 0x115   :  { %v673_v37 = vpop.f32.mrf.mxu3 }
 0x116   :  { %v701_v38 = vpop.f32.mrf.mxu2  ;;  %v674_v17 = vadd.f32 %v673_v37, %v660_v10 }
 0x117   :  { %v702_v39 = vadd.f32 %v701_v38, %v688_v36  ;;  %v661_v42 = vpop.f32.mrf.mxu1 }
 0x118   :  { %v689_v41 = vpop.f32.mrf.mxu0  ;;  %v764_v28 = vmul.f32 0.5, %v674_v17  ;;  %v662_v32 = vadd.f32 %v661_v42, %v161_v1 }
 0x119   :  { %v765_v40 = vmul.f32 0.5, %v702_v39  ;;  %v690_v44 = vadd.f32 %v689_v41, %v162_v35 }
 0x11b   :  { %5152 = vtanh.f32 %v765_v40 }
 0x11d   :  { %v675_v45 = vpop.f32.mrf.mxu3 }
 0x11e   :  { %v703_v46 = vpop.f32.mrf.mxu2  ;;  %v676_v27 = vadd.f32 %v675_v45, %v662_v32  ;;  %v3836_v32 = vld [vmem:[%s7364_s3 + $0x48] sm:$0xf] }
 0x11f   :  { %v704_v47 = vadd.f32 %v703_v46, %v690_v44  ;;  %v729_v54 = vpop.f32.mrf.mxu1 }
 0x120   :  { %v770_v36 = vmul.f32 0.5, %v676_v27  ;;  %v4902_v27 = vld [vmem:[%s7364_s3 + $0x50] sm:$0xf0] }
 0x121   :  { %v5153_v48 = vpop.eup %5152  ;;  %v771_v49 = vmul.f32 0.5, %v704_v47  ;;  %v757_v55 = vpop.f32.mrf.mxu0 }
 0x122   :  { %v789_v50 = vadd.f32 1.0, %v5153_v48 }
 0x123   :  { %5154 = vtanh.f32 %v771_v49 }
 0x124   :  { %v5815_v53 = vmul.f32 0.5, %v789_v50 }
 0x126   :  { %v715_v56 = vpop.f32.mrf.mxu3  ;;  %v743_v57 = vpop.f32.mrf.mxu2  ;;  %839 = vrot.lane.b32.xlu0 %v5815_v53, %s5190_s1 }
 0x127   :  { %v716_v58 = vadd.f32 %v715_v56, %v163_v51  ;;  %v744_v59 = vadd.f32 %v743_v57, %v164_v52  ;;  %v731_v15 = vpop.f32.mrf.mxu1 }
 0x129   :  { %v5155_v61 = vpop.eup %5154  ;;  %v730_v62 = vadd.f32 %v729_v54, %v716_v58  ;;  %v758_v63 = vadd.f32 %v757_v55, %v744_v59  ;;  %v759_v16 = vpop.f32.mrf.mxu0 }
 0x12a   :  { %v795_v0 = vadd.f32 1.0, %v5155_v61 }
 0x12b   :  { %v766_v2 = vmul.f32 0.5, %v730_v62  ;;  %v767_v5 = vmul.f32 0.5, %v758_v63 }
 0x12c   :  { %v5821_v4 = vmul.f32 0.5, %v795_v0 }
 0x12d   :  { %5156 = vtanh.f32 %v766_v2 }
 0x12e   :  { %v717_v7 = vpop.f32.mrf.mxu3  ;;  %v745_v9 = vpop.f32.mrf.mxu2  ;;  %845 = vrot.lane.b32.xlu2 %v5821_v4, %s5190_s1  ;;  %5158 = vtanh.f32 %v767_v5 }
 0x12f   :  { %v718_v11 = vadd.f32 %v717_v7, %v163_v51  ;;  %v746_v12 = vadd.f32 %v745_v9, %v164_v52  ;;  %v4914_v7 = vld [vmem:[%s7364_s3 + $0xb0] sm:$0xf0] }
 0x130   :  { %v3885_v9 = vor.u32 %v4914_v7, %v3884_v6 }
 0x131   :  { %v732_v22 = vadd.f32 %v731_v15, %v718_v11  ;;  %v760_v18 = vadd.f32 %v759_v16, %v746_v12  ;;  %v3872_v11 = vld [vmem:[%s7364_s3 + $0x90] sm:$0xf]  ;;  %v4911_v12 = vld [vmem:[%s7364_s3 + $0x98] sm:$0xf0] }
 0x132   :  { %2277 = vmatpush.bf16.msrb.mxu1 %v3885_v9  ;;  %v3873_v15 = vor.u32 %v4911_v12, %v3872_v11  ;;  %v4935_v16 = vld [vmem:[%s7364_s3 + $0x158] sm:$0xf0] }
 0x133   :  { %v5157_v20 = vpop.eup %5156  ;;  %v772_v21 = vmul.f32 0.5, %v732_v22  ;;  %v773_v23 = vmul.f32 0.5, %v760_v18  ;;  %v3969_v17 = vor.u32 %v4935_v16, %v3968_v13  ;;  %v3860_v22 = vld [vmem:[%s7364_s3 + $0x78] sm:$0xf]  ;;  %v4908_v18 = vld [vmem:[%s7364_s3 + $0x80] sm:$0xf0] }
 0x134   :  { %v790_v25 = vadd.f32 1.0, %v5157_v20  ;;  %v5159_v14 = vpop.eup %5158  ;;  %v3861_v20 = vor.u32 %v4908_v18, %v3860_v22  ;;  %v4076_v16 = vld [vmem:[%s7364_s3 + $0x228] sm:$0xf] }
 0x135   :  { %5160 = vtanh.f32 %v772_v21  ;;  %v791_v33 = vadd.f32 1.0, %v5159_v14  ;;  %v4932_v21 = vld [vmem:[%s7364_s3 + $0x140] sm:$0xf0] }
 0x136   :  { %5162 = vtanh.f32 %v773_v23  ;;  %v802_v30 = vmul.f32 0.5, %v790_v25  ;;  %2278 = vmatpush.bf16.msrb.mxu1 %v3873_v15  ;;  %v3848_v23 = vld [vmem:[%s7364_s3 + $0x60] sm:$0xf]  ;;  %v3957_v25 = vor.u32 %v4932_v21, %v3956_v19  ;;  %v5010_v19 = vld [vmem:[%s7364_s3 + $0x3b0] sm:$0xf0] }
 0x137   :  { %5164 = vtanh.f32 %v763_v24  ;;  %v803_v39 = vmul.f32 0.5, %v791_v33  ;;  %v4905_v24 = vld [vmem:[%s7364_s3 + $0x68] sm:$0xf0]  ;;  %v3932_v33 = vld [vmem:[%s7364_s3 + $0x108] sm:$0xf] }
 0x138   :  { %841 = vrot.lane.b32.xlu1 %v802_v30, %s5190_s1  ;;  %5166 = vtanh.f32 %v764_v28  ;;  %v3944_v28 = vld [vmem:[%s7364_s3 + $0x120] sm:$0xf]  ;;  %v3849_v30 = vor.u32 %v4905_v24, %v3848_v23  ;;  %v4959_v21 = vld [vmem:[%s7364_s3 + $0x218] sm:$0xf0]  ;;  %v4172_v24 = vld [vmem:[%s7364_s3 + $0x2e8] sm:$0xf] }
 0x139   :  { %5168 = vtanh.f32 %v769_v29  ;;  %v4929_v29 = vld [vmem:[%s7364_s3 + $0x128] sm:$0xf0] }
 0x13a   :  { %5170 = vtanh.f32 %v770_v36  ;;  %2279 = vmatpush.bf16.msrb.mxu1 %v3861_v20  ;;  %v3945_v14 = vor.u32 %v4929_v29, %v3944_v28  ;;  %v3824_v36 = vld [vmem:[%s7364_s3 + $0x30] sm:$0xf] }
 0x13b   :  { %v5161_v8 = vpop.eup %5160  ;;  %v4064_v20 = vld [vmem:[%s7364_s3 + $0x210] sm:$0xf] }
 0x13c   :  { %v5163_v34 = vpop.eup %5162  ;;  %v796_v35 = vadd.f32 1.0, %v5161_v8  ;;  %v4926_v8 = vld [vmem:[%s7364_s3 + $0x110] sm:$0xf0]  ;;  %v4256_v28 = vld [vmem:[%s7364_s3 + $0x390] sm:$0xf]  ;;  %v4065_v29 = vor.u32 %v4959_v21, %v4064_v20 }
 0x13d   :  { %v797_v37 = vadd.f32 1.0, %v5163_v34  ;;  %v5165_v38 = vpop.eup %5164  ;;  %v3837_v34 = vor.u32 %v4902_v27, %v3836_v32  ;;  %v4052_v32 = vld [vmem:[%s7364_s3 + $0x1f8] sm:$0xf]  ;;  %v4956_v27 = vld [vmem:[%s7364_s3 + $0x200] sm:$0xf0] }
 0x13e   :  { %v808_v40 = vmul.f32 0.5, %v796_v35  ;;  %v5167_v41 = vpop.eup %5166  ;;  %v787_v45 = vadd.f32 1.0, %v5165_v38  ;;  %2280 = vmatpush.bf16.msrb.mxu1 %v3849_v30  ;;  %v3933_v35 = vor.u32 %v4926_v8, %v3932_v33  ;;  %v3920_v38 = vld [vmem:[%s7364_s3 + $0xf0] sm:$0xf]  ;;  %v4220_v21 = vld [vmem:[%s7364_s3 + $0x348] sm:$0xf] }
 0x13f   :  { %v809_v44 = vmul.f32 0.5, %v797_v37  ;;  %v5169_v46 = vpop.eup %5168  ;;  %v788_v42 = vadd.f32 1.0, %v5167_v41  ;;  %v4899_v37 = vld [vmem:[%s7364_s3 + $0x38] sm:$0xf0] }
 0x140   :  { %843 = vrot.lane.b32.xlu1 %v803_v39, %s5190_s1  ;;  %847 = vrot.lane.b32.xlu2 %v808_v40, %s5190_s1  ;;  %v793_v47 = vadd.f32 1.0, %v5169_v46  ;;  %v5829_v49 = vmul.f32 0.5, %v787_v45  ;;  %v5171_v50 = vpop.eup %5170  ;;  %v4923_v39 = vld [vmem:[%s7364_s3 + $0xf8] sm:$0xf0]  ;;  %v3825_v40 = vor.u32 %v4899_v37, %v3824_v36  ;;  %v4896_v45 = vld [vmem:[%s7364_s3 + $0x20] sm:$0xf0] }
 0x141   :  { %849 = vrot.lane.b32.xlu0 %v809_v44, %s5190_s1  ;;  %v800_v48 = vmul.f32 0.5, %v788_v42  ;;  %v794_v52 = vadd.f32 1.0, %v5171_v50  ;;  %v3921_v41 = vor.u32 %v4923_v39, %v3920_v38  ;;  %v3812_v42 = vld [vmem:[%s7364_s3 + $0x18] sm:$0xf]  ;;  %v4920_v50 = vld [vmem:[%s7364_s3 + $0xe0] sm:$0xf0] }
 0x142   :  { %v5831_v51 = vmul.f32 0.5, %v793_v47  ;;  %2281 = vmatpush.bf16.msrb.mxu1 %v3837_v34  ;;  %v3908_v47 = vld [vmem:[%s7364_s3 + $0xd8] sm:$0xf]  ;;  %v4160_v34 = vld [vmem:[%s7364_s3 + $0x2d0] sm:$0xf] }
 0x143   :  { %v806_v54 = vmul.f32 0.5, %v794_v52  ;;  %v768_v52 = vmul.f32 0.5, %v5810_v31  ;;  %v4917_v31 = vld [vmem:[%s7364_s3 + $0xc8] sm:$0xf0]  ;;  %v4244_v36 = vld [vmem:[%s7364_s3 + $0x378] sm:$0xf] }
 0x145   :  { %5172 = vtanh.f32 %v768_v52  ;;  %v4040_v52 = vld [vmem:[%s7364_s3 + $0x1e0] sm:$0xf] }
 0x146   :  { %2282 = vmatpush.bf16.msrb.mxu1 %v3825_v40  ;;  %v5004_v40 = vld [vmem:[%s7364_s3 + $0x380] sm:$0xf0] }
 0x148   :  { %814 = vrot.lane.b32.xlu1 %v5829_v49, %s5190_s1  ;;  %816 = vrot.lane.b32.xlu2 %v800_v48, %s5190_s1 }
 0x149   :  { %818 = vrot.lane.b32.xlu0 %v5831_v51, %s5190_s1 }
 0x150   :  { %820 = vrot.lane.b32.xlu1 %v806_v54, %s5190_s1 }
 0x188   :  { %v846_v55 = vpop.permute.xlu2 %845 }
 0x198   :  { %v840_v59 = vpop.permute.xlu0 %839 }
 0x19a   :  { %v848_v56 = vpop.permute.xlu2 %847 }
 0x19b   :  { %v853_v57 = vsel %vm822_vm5, %v846_v55, %v848_v56  ;;  %v3800_v55 = vld [vmem:[%s7364_s3] sm:$0xf] }
 0x19c   :  { %v861_v58 = vadd.f32 %v853_v57, %v806_v54  ;;  %v3909_v54 = vor.u32 %v4920_v50, %v3908_v47  ;;  %v3896_v57 = vld [vmem:[%s7364_s3 + $0xc0] sm:$0xf]  ;;  %v4053_v50 = vor.u32 %v4956_v27, %v4052_v32  ;;  %v4947_v32 = vld [vmem:[%s7364_s3 + $0x1b8] sm:$0xf0] }
 0x19e   :  { %871 = vrot.lane.b32.xlu1 %v861_v58, %s5190_s1 }
 0x1a2   :  { %v5921_v44 = vpop.permute.xlu2 %816 }
 0x1a3   :  { %v830_v37 = vadd.f32 %v5921_v44, %v5829_v49 }
 0x1aa   :  { %v842_v60 = vpop.permute.xlu1 %841 }
 0x1ab   :  { %v851_v61 = vsel %vm822_vm5, %v840_v59, %v842_v60 }
 0x1ac   :  { %v859_v62 = vadd.f32 %v851_v61, %v800_v48  ;;  %v3813_v48 = vor.u32 %v4896_v45, %v3812_v42  ;;  %v762_v61 = vmul.f32 0.5, %v5808_v26 }
 0x1ae   :  { %867 = vrot.lane.b32.xlu2 %v859_v62, %s5190_s1  ;;  %2283 = vmatpush.bf16.msrb.mxu1 %v3813_v48  ;;  %5174 = vtanh.f32 %v762_v61 }
 0x1b2   :  { %v844_v63 = vpop.permute.xlu1 %843 }
 0x1b3   :  { %v852_v0 = vsel %vm822_vm5, %v842_v60, %v844_v63  ;;  %v850_v1 = vpop.permute.xlu0 %849  ;;  %v3897_v60 = vor.u32 %v4917_v31, %v3896_v57  ;;  %v5173_v63 = vpop.eup %5172  ;;  %v4245_v31 = vor.u32 %v5004_v40, %v4244_v36  ;;  %v4208_v40 = vld [vmem:[%s7364_s3 + $0x330] sm:$0xf] }
 0x1b4   :  { %v860_v2 = vadd.f32 %v852_v0, %v5815_v53  ;;  %v854_v3 = vsel %vm822_vm5, %v848_v56, %v850_v1  ;;  %v3980_v53 = vld [vmem:[%s7364_s3 + $0x168] sm:$0xf]  ;;  %v4893_v56 = vld [vmem:[%s7364_s3 + $0x8] sm:$0xf0]  ;;  %v792_v0 = vadd.f32 1.0, %v5173_v63 }
 0x1b5   :  { %v862_v5 = vadd.f32 %v854_v3, %v5821_v4  ;;  %v4938_v4 = vld [vmem:[%s7364_s3 + $0x170] sm:$0xf0]  ;;  %v3801_v58 = vor.u32 %v4893_v56, %v3800_v55  ;;  %v4980_v55 = vld [vmem:[%s7364_s3 + $0x2c0] sm:$0xf0]  ;;  %v5031_v63 = vld [vmem:[%s7364_s3 + $0x458] sm:$0xf0] }
 0x1b6   :  { %869 = vrot.lane.b32.xlu0 %v860_v2, %s5190_s1  ;;  %v3981_v10 = vor.u32 %v4938_v4, %v3980_v53  ;;  %v804_v7 = vmul.f32 0.5, %v792_v0 }
 0x1b7   :  { %873 = vrot.lane.b32.xlu2 %v862_v5, %s5190_s1  ;;  %2284 = vmatpush.bf16.msrb.mxu1 %v3801_v58  ;;  %v5175_v5 = vpop.eup %5174 }
 0x1b8   :  { %2291 = vmatpush.bf16.msrb.mxu3 %v3981_v10  ;;  %v786_v4 = vadd.f32 1.0, %v5175_v5 }
 0x1ba   :  { %v815_v46 = vpop.permute.xlu1 %814  ;;  %v798_v11 = vmul.f32 0.5, %v786_v4 }
 0x1bb   :  { %v819_v3 = vpop.permute.xlu0 %818  ;;  %v823_v22 = vsel %vm822_vm5, %v815_v46, %v5921_v44  ;;  %v5034_v46 = vld [vmem:[%s7364_s3 + $0x470] sm:$0xf0] }
 0x1bc   :  { %2292 = vmatpush.bf16.msrb.mxu3 %v3969_v17  ;;  %v4962_v17 = vld [vmem:[%s7364_s3 + $0x230] sm:$0xf0]  ;;  %v829_v33 = vadd.f32 %v823_v22, %v798_v11 }
 0x1bd   :  { %v4077_v18 = vor.u32 %v4962_v17, %v4076_v16  ;;  %v4028_v16 = vld [vmem:[%s7364_s3 + $0x1c8] sm:$0xf]  ;;  %v4950_v17 = vld [vmem:[%s7364_s3 + $0x1d0] sm:$0xf0] }
 0x1be   :  { %v884_v56 = vmul.f32 0.5, %v829_v33 }
 0x1bf   :  { %2305 = vmatpush.bf16.msrb.mxu0 %v4077_v18 }
 0x1c0   :  { %2293 = vmatpush.bf16.msrb.mxu3 %v3957_v25  ;;  %v4986_v25 = vld [vmem:[%s7364_s3 + $0x2f0] sm:$0xf0] }
 0x1c1   :  { %v4173_v30 = vor.u32 %v4986_v25, %v4172_v24 }
 0x1c2   :  { %v821_v62 = vpop.permute.xlu1 %820 }
 0x1c3   :  { %v824_v6 = vsel %vm822_vm5, %v819_v3, %v821_v62  ;;  %v832_v9 = vadd.f32 %v821_v62, %v5831_v51  ;;  %v4268_v51 = vld [vmem:[%s7364_s3 + $0x3a8] sm:$0xf]  ;;  %2319 = vmatpush.bf16.msrb.mxu2 %v4173_v30  ;;  %2306 = vmatpush.bf16.msrb.mxu0 %v4065_v29  ;;  %v4232_v62 = vld [vmem:[%s7364_s3 + $0x360] sm:$0xf]  ;;  %v5001_v3 = vld [vmem:[%s7364_s3 + $0x368] sm:$0xf0]  ;;  %v4029_v30 = vor.u32 %v4950_v17, %v4028_v16 }
 0x1c4   :  { %2294 = vmatpush.bf16.msrb.mxu3 %v3945_v14  ;;  %v831_v10 = vadd.f32 %v824_v6, %v804_v7  ;;  %v4269_v23 = vor.u32 %v5010_v19, %v4268_v51  ;;  %v5007_v14 = vld [vmem:[%s7364_s3 + $0x398] sm:$0xf0]  ;;  %v4136_v6 = vld [vmem:[%s7364_s3 + $0x2a0] sm:$0xf]  ;;  %v4977_v7 = vld [vmem:[%s7364_s3 + $0x2a8] sm:$0xf0]  ;;  %v4233_v51 = vor.u32 %v5001_v3, %v4232_v62 }
 0x1c5   :  { %v4257_v8 = vor.u32 %v5007_v14, %v4256_v28  ;;  %v4137_v22 = vor.u32 %v4977_v7, %v4136_v6  ;;  %v4016_v14 = vld [vmem:[%s7364_s3 + $0x1b0] sm:$0xf]  ;;  %v4196_v7 = vld [vmem:[%s7364_s3 + $0x318] sm:$0xf]  ;;  %v3992_v16 = vld [vmem:[%s7364_s3 + $0x180] sm:$0xf] }
 0x1c6   :  { %v887_v12 = vmul.f32 0.5, %v831_v10  ;;  %2333 = vmatpush.bf16.msra.mxu1 %v4269_v23  ;;  %v4340_v10 = vld [vmem:[%s7364_s3 + $0x438] sm:$0xf]  ;;  %v4998_v23 = vld [vmem:[%s7364_s3 + $0x350] sm:$0xf0] }
 0x1c7   :  { %2307 = vmatpush.bf16.msrb.mxu0 %v4053_v50  ;;  %v4941_v17 = vld [vmem:[%s7364_s3 + $0x188] sm:$0xf0] }
 0x1c8   :  { %2295 = vmatpush.bf16.msrb.mxu3 %v3933_v35  ;;  %v4983_v35 = vld [vmem:[%s7364_s3 + $0x2d8] sm:$0xf0] }
 0x1c9   :  { %v4161_v39 = vor.u32 %v4983_v35, %v4160_v34  ;;  %v4124_v34 = vld [vmem:[%s7364_s3 + $0x288] sm:$0xf]  ;;  %v4974_v35 = vld [vmem:[%s7364_s3 + $0x290] sm:$0xf0] }
 0x1ca   :  { %2334 = vmatpush.bf16.msra.mxu1 %v4257_v8 }
 0x1cb   :  { %2320 = vmatpush.bf16.msrb.mxu2 %v4161_v39  ;;  %v4221_v39 = vor.u32 %v4998_v23, %v4220_v21  ;;  %v4184_v21 = vld [vmem:[%s7364_s3 + $0x300] sm:$0xf]  ;;  %v4989_v23 = vld [vmem:[%s7364_s3 + $0x308] sm:$0xf0] }
 0x1cc   :  { %2296 = vmatpush.bf16.msrb.mxu3 %v3921_v41  ;;  %v4364_v41 = vld [vmem:[%s7364_s3 + $0x468] sm:$0xf] }
 0x1cd   :  { %v4365_v49 = vor.u32 %v5034_v46, %v4364_v41  ;;  %v4995_v41 = vld [vmem:[%s7364_s3 + $0x338] sm:$0xf0] }
 0x1ce   :  { %2335 = vmatpush.bf16.msra.mxu1 %v4245_v31  ;;  %v4004_v31 = vld [vmem:[%s7364_s3 + $0x198] sm:$0xf] }
 0x1d0   :  { %2297 = vmatpush.bf16.msrb.mxu3 %v3909_v54  ;;  %v4148_v54 = vld [vmem:[%s7364_s3 + $0x2b8] sm:$0xf] }
 0x1d1   :  { %v4149_v61 = vor.u32 %v4980_v55, %v4148_v54  ;;  %v5025_v54 = vld [vmem:[%s7364_s3 + $0x428] sm:$0xf0] }
 0x1d2   :  { %2336 = vmatpush.bf16.msra.mxu1 %v4233_v51  ;;  %v4100_v51 = vld [vmem:[%s7364_s3 + $0x258] sm:$0xf] }
 0x1d3   :  { %2321 = vmatpush.bf16.msrb.mxu2 %v4149_v61 }
 0x1d4   :  { %2298 = vmatpush.bf16.msrb.mxu3 %v3897_v60  ;;  %v4352_v60 = vld [vmem:[%s7364_s3 + $0x450] sm:$0xf] }
 0x1d5   :  { %v4353_v5 = vor.u32 %v5031_v63, %v4352_v60  ;;  %v4125_v63 = vor.u32 %v4974_v35, %v4124_v34  ;;  %v4185_v34 = vor.u32 %v4989_v23, %v4184_v21  ;;  %v5046_v23 = vld [vmem:[%s7364_s3 + $0x4d0] sm:$0xf0] }
 0x1d6   :  { %2337 = vmatpush.bf16.msra.mxu1 %v4221_v39 }
 0x1d7   :  { %2322 = vmatpush.bf16.msrb.mxu2 %v4137_v22 }
 0x1d8   :  { %2347 = vmatpush.bf16.msra.mxu3 %v4365_v49  ;;  %v4328_v49 = vld [vmem:[%s7364_s3 + $0x420] sm:$0xf] }
 0x1d9   :  { %v4329_v6 = vor.u32 %v5025_v54, %v4328_v49  ;;  %v5055_v49 = vld [vmem:[%s7364_s3 + $0x518] sm:$0xf0]  ;;  %v4910_v54 = vld [vmem:[%s7364_s3 + $0x94] sm:$0xf] }
 0x1db   :  { %2323 = vmatpush.bf16.msrb.mxu2 %v4125_v63 }
 0x1dc   :  { %2348 = vmatpush.bf16.msra.mxu3 %v4353_v5  ;;  %v4209_v5 = vor.u32 %v4995_v41, %v4208_v40  ;;  %v4088_v40 = vld [vmem:[%s7364_s3 + $0x240] sm:$0xf]  ;;  %v4965_v41 = vld [vmem:[%s7364_s3 + $0x248] sm:$0xf0] }
 0x1de   :  { %2338 = vmatpush.bf16.msra.mxu1 %v4209_v5 }
 0x208   :  { %v868_v59 = vpop.permute.xlu2 %867 }
 0x210   :  { %v872_v1 = vpop.permute.xlu1 %871 }
 0x211   :  { %v874_v2 = vpop.permute.xlu2 %873 }
 0x212   :  { %v876_v53 = vsel %vm822_vm5, %v872_v1, %v874_v2  ;;  %v889_v15 = vmul.f32 0.5, %v874_v2 }
 0x213   :  { %v883_v26 = vsel %vm881_vm6, %v832_v9, %v876_v53 }
 0x214   :  { %v888_v13 = vmul.f32 0.5, %v883_v26  ;;  %v893_v42 = vpack.c.bf16 %v889_v15, %v889_v15  ;;  %v5028_v26 = vld [vmem:[%s7364_s3 + $0x440] sm:$0xf0] }
 0x215   :  { %v4341_v24 = vor.u32 %v5028_v26, %v4340_v10 }
 0x216   :  { %v892_v44 = vpack.c.bf16 %v888_v13, %v887_v12  ;;  %v903_v0 = vunpack.c.l.b16 %v893_v42 }
 0x217   :  { %2349 = vmatpush.bf16.msra.mxu3 %v4341_v24 }
 0x218   :  { %v901_v53 = vunpack.c.l.b16 %v892_v44  ;;  %v902_v9 = vunpack.c.h.b16 %v892_v44 }
 0x21b   :  { %2350 = vmatpush.bf16.msra.mxu3 %v4329_v6  ;;  %v4937_v6 = vld [vmem:[%s7364_s3 + $0x16c] sm:$0xf] }
 0x228   :  { %v870_v38 = vpop.permute.xlu0 %869 }
 0x229   :  { %v875_v45 = vsel %vm822_vm5, %v868_v59, %v870_v38  ;;  %v886_v47 = vmul.f32 0.5, %v870_v38  ;;  %v4953_v59 = vld [vmem:[%s7364_s3 + $0x1e8] sm:$0xf0] }
 0x22a   :  { %v882_v48 = vsel %vm881_vm6, %v830_v37, %v875_v45  ;;  %v4041_v4 = vor.u32 %v4953_v59, %v4040_v52  ;;  %v4017_v52 = vor.u32 %v4947_v32, %v4016_v14  ;;  %v4944_v59 = vld [vmem:[%s7364_s3 + $0x1a0] sm:$0xf0]  ;;  %v5019_v14 = vld [vmem:[%s7364_s3 + $0x3f8] sm:$0xf0]  ;;  %v4913_v32 = vld [vmem:[%s7364_s3 + $0xac] sm:$0xf] }
 0x22b   :  { %v885_v57 = vmul.f32 0.5, %v882_v48  ;;  %v891_v58 = vpack.c.bf16 %v886_v47, %v886_v47  ;;  %v4005_v26 = vor.u32 %v4944_v59, %v4004_v31 }
 0x22c   :  { %2308 = vmatpush.bf16.msrb.mxu0 %v4041_v4 }
 0x22d   :  { %v890_v1 = vpack.c.bf16 %v885_v57, %v884_v56  ;;  %v900_v2 = vunpack.c.l.b16 %v891_v58 }
 0x22f   :  { %v898_v11 = vunpack.c.l.b16 %v890_v1  ;;  %v899_v12 = vunpack.c.h.b16 %v890_v1  ;;  %v6049_v13 = vpack.c.b16 %v903_v0, %v900_v2  ;;  %v6051_v15 = vpack.c.b16 %v900_v2, %v900_v2  ;;  %v4112_v0 = vld [vmem:[%s7364_s3 + $0x270] sm:$0xf]  ;;  %v4971_v1 = vld [vmem:[%s7364_s3 + $0x278] sm:$0xf0] }
 0x230   :  { %2309 = vmatpush.bf16.msrb.mxu0 %v4029_v30  ;;  %v3993_v30 = vor.u32 %v4941_v17, %v3992_v16 }
 0x231   :  { %v6059_v18 = vpack.c.b16 %v901_v53, %v898_v11  ;;  %v6061_v19 = vpack.c.b16 %v902_v9, %v899_v12  ;;  %v924_v20 = vshll.u32 %v6049_v13, 16  ;;  %v943_v25 = vshll.u32 %v6051_v15, 16  ;;  %v4992_v53 = vld [vmem:[%s7364_s3 + $0x320] sm:$0xf0] }
 0x232   :  { %v6071_v28 = vpack.c.b16 %v899_v12, %v899_v12  ;;  %v6073_v29 = vpack.c.b16 %v898_v11, %v898_v11  ;;  %v922_v27 = vshrl.u32 %v6049_v13, 16  ;;  %v954_v50 = vrot.slane %v6049_v13, 1  ;;  %v4316_v11 = vld [vmem:[%s7364_s3 + $0x408] sm:$0xf]  ;;  %v5022_v12 = vld [vmem:[%s7364_s3 + $0x410] sm:$0xf0] }
 0x233   :  { %2285 = vmatmul.bf16.vlgmr.msrb.gmra.mxu1 %v6059_v18  ;;  %2299 = vmatmul.bf16.vlgmr.msrb.gmra.mxu3 %v6061_v19  ;;  %v926_v33 = vrot.slane %v924_v20, 1  ;;  %v917_v8 = vshll.u32 %v6061_v19, 16  ;;  %v910_v37 = vshll.u32 %v6059_v18, 16  ;;  %v945_v42 = vrot.slane %v943_v25, 1  ;;  %v4968_v20 = vld [vmem:[%s7364_s3 + $0x260] sm:$0xf0] }
 0x234   :  { %v939_v36 = vshll.u32 %v6071_v28, 16  ;;  %v935_v38 = vshll.u32 %v6073_v29, 16  ;;  %v915_v45 = vshrl.u32 %v6061_v19, 16  ;;  %v908_v44 = vshrl.u32 %v6059_v18, 16  ;;  %2310 = vmatpush.bf16.msrb.mxu0 %v4017_v52  ;;  %v4304_v25 = vld [vmem:[%s7364_s3 + $0x3f0] sm:$0xf] }
 0x235   :  { %v927_v46 = vor.u32 %v926_v33, %v922_v27  ;;  %v919_v47 = vrot.slane %v917_v8, 1  ;;  %v912_v48 = vrot.slane %v910_v37, 1  ;;  %v957_v58 = vrot.slane %v6051_v15, 1  ;;  %v3886_v27 = vld [vmem:[%s7364_s3 + $0xb4] sm:$0xf0] }
 0x236   :  { %v941_v57 = vrot.slane %v939_v36, 1  ;;  %v937_v61 = vrot.slane %v935_v38, 1  ;;  %v953_v62 = vrot.slane %v6061_v19, 1  ;;  %v956_v3 = vrot.slane %v6071_v28, 1  ;;  %v4460_v28 = vld [vmem:[%s7364_s3 + $0x528] sm:$0xf] }
 0x237   :  { %v951_v55 = vsel %vm5333_vm2, %v927_v46, %v945_v42  ;;  %v920_v56 = vor.u32 %v919_v47, %v915_v45  ;;  %v913_v60 = vor.u32 %v912_v48, %v908_v44  ;;  %v952_v4 = vrot.slane %v6059_v18, 1  ;;  %v4292_v46 = vld [vmem:[%s7364_s3 + $0x3d8] sm:$0xf]  ;;  %v5016_v45 = vld [vmem:[%s7364_s3 + $0x3e0] sm:$0xf0] }
 0x238   :  { %977 = vrot.lane.b32.xlu2 %v951_v55, %s5191_s19  ;;  %v955_v10 = vrot.slane %v6073_v29, 1  ;;  %v4113_v15 = vor.u32 %v4971_v1, %v4112_v0  ;;  %v4197_v22 = vor.u32 %v4992_v53, %v4196_v7  ;;  %v4317_v24 = vor.u32 %v5022_v12, %v4316_v11  ;;  %v5058_v29 = vld [vmem:[%s7364_s3 + $0x530] sm:$0xf0]  ;;  %2311 = vmatpush.bf16.msrb.mxu0 %v4005_v26  ;;  %v4448_v47 = vld [vmem:[%s7364_s3 + $0x510] sm:$0xf] }
 0x239   :  { %v950_v2 = vsel %vm5333_vm2, %v920_v56, %v941_v57  ;;  %v949_v9 = vsel %vm5333_vm2, %v913_v60, %v937_v61  ;;  %v967_v33 = vsel %vm958_vm7, %v954_v50, %v957_v58  ;;  %v4101_v8 = vor.u32 %v4968_v20, %v4100_v51  ;;  %v4544_v50 = vld [vmem:[%s7364_s3 + $0x5d0] sm:$0xf]  ;;  %v5079_v52 = vld [vmem:[%s7364_s3 + $0x5d8] sm:$0xf0]  ;;  %v3874_v56 = vld [vmem:[%s7364_s3 + $0x9c] sm:$0xf0] }
 0x23a   :  { %975 = vrot.lane.b32.xlu1 %v950_v2, %s5191_s19  ;;  %973 = vrot.lane.b32.xlu0 %v949_v9, %s5191_s19  ;;  %v4461_v35 = vor.u32 %v5058_v29, %v4460_v28  ;;  %v964_v36 = vsel %vm958_vm7, %v953_v62, %v956_v3  ;;  %v4305_v37 = vor.u32 %v5019_v14, %v4304_v25  ;;  %v4280_v57 = vld [vmem:[%s7364_s3 + $0x3c0] sm:$0xf]  ;;  %v5013_v58 = vld [vmem:[%s7364_s3 + $0x3c8] sm:$0xf0] }
 0x23b   :  { %2324 = vmatpush.bf16.msrb.mxu2 %v4113_v15  ;;  %2339 = vmatpush.bf16.msra.mxu1 %v4197_v22  ;;  %v3889_v38 = vor.u32 %v4913_v32, %v3886_v27  ;;  %v961_v39 = vsel %vm958_vm7, %v952_v4, %v955_v10  ;;  %v4089_v42 = vor.u32 %v4965_v41, %v4088_v40  ;;  %v4436_v60 = vld [vmem:[%s7364_s3 + $0x4f8] sm:$0xf]  ;;  %v5052_v61 = vld [vmem:[%s7364_s3 + $0x500] sm:$0xf0]  ;;  %v4907_v1 = vld [vmem:[%s7364_s3 + $0x7c] sm:$0xf] }
 0x23c   :  { %2351 = vmatpush.bf16.msra.mxu3 %v4317_v24  ;;  %2312 = vmatpush.bf16.msrb.mxu0 %v3993_v30  ;;  %v4293_v44 = vor.u32 %v5016_v45, %v4292_v46  ;;  %v4449_v48 = vor.u32 %v5055_v49, %v4448_v47  ;;  %v4545_v55 = vor.u32 %v5079_v52, %v4544_v50  ;;  %v4532_v62 = vld [vmem:[%s7364_s3 + $0x5b8] sm:$0xf]  ;;  %v5076_v0 = vld [vmem:[%s7364_s3 + $0x5c0] sm:$0xf0]  ;;  %v3862_v2 = vld [vmem:[%s7364_s3 + $0x84] sm:$0xf0] }
 0x23d   :  { %v3877_v31 = vor.u32 %v4910_v54, %v3874_v56  ;;  %v4281_v59 = vor.u32 %v5013_v58, %v4280_v57  ;;  %v4437_v63 = vor.u32 %v5052_v61, %v4436_v60  ;;  %v4533_v3 = vor.u32 %v5076_v0, %v4532_v62  ;;  %v3982_v7 = vld [vmem:[%s7364_s3 + $0x174] sm:$0xf0]  ;;  %v4424_v9 = vld [vmem:[%s7364_s3 + $0x4e0] sm:$0xf]  ;;  %v5049_v4 = vld [vmem:[%s7364_s3 + $0x4e8] sm:$0xf0] }
 0x23e   :  { %v3865_v5 = vor.u32 %v4907_v1, %v3862_v2  ;;  %v3985_v53 = vor.u32 %v4937_v6, %v3982_v7  ;;  %v4520_v10 = vld [vmem:[%s7364_s3 + $0x5a0] sm:$0xf]  ;;  %v4425_v26 = vor.u32 %v5049_v4, %v4424_v9  ;;  %v5073_v11 = vld [vmem:[%s7364_s3 + $0x5a8] sm:$0xf0]  ;;  %v4904_v12 = vld [vmem:[%s7364_s3 + $0x64] sm:$0xf] }
 0x23f   :  { %2325 = vmatpush.bf16.msrb.mxu2 %v4101_v8  ;;  %2340 = vmatpush.bf16.msra.mxu1 %v4185_v34  ;;  %v3850_v15 = vld [vmem:[%s7364_s3 + $0x6c] sm:$0xf0]  ;;  %v4521_v16 = vor.u32 %v5073_v11, %v4520_v10  ;;  %v4934_v51 = vld [vmem:[%s7364_s3 + $0x154] sm:$0xf]  ;;  %v3970_v22 = vld [vmem:[%s7364_s3 + $0x15c] sm:$0xf0] }
 0x240   :  { %991 = vrot.lane.b32.xlu2 %v967_v33, %s5192_s12  ;;  %2361 = vmatpush.bf16.msra.mxu0 %v4461_v35  ;;  %v3853_v17 = vor.u32 %v4904_v12, %v3850_v15  ;;  %v4412_v20 = vld [vmem:[%s7364_s3 + $0x4c8] sm:$0xf]  ;;  %v3973_v21 = vor.u32 %v4934_v51, %v3970_v22  ;;  %v5070_v25 = vld [vmem:[%s7364_s3 + $0x590] sm:$0xf0]  ;;  %v4901_v29 = vld [vmem:[%s7364_s3 + $0x4c] sm:$0xf] }
 0x241   :  { %2352 = vmatpush.bf16.msra.mxu3 %v4305_v37  ;;  %v4508_v24 = vld [vmem:[%s7364_s3 + $0x588] sm:$0xf]  ;;  %v4413_v28 = vor.u32 %v5046_v23, %v4412_v20  ;;  %v3838_v30 = vld [vmem:[%s7364_s3 + $0x54] sm:$0xf0]  ;;  %v4931_v14 = vld [vmem:[%s7364_s3 + $0x13c] sm:$0xf] }
 0x242   :  { %989 = vrot.lane.b32.xlu1 %v964_v36, %s5192_s12  ;;  %987 = vrot.lane.b32.xlu0 %v961_v39, %s5192_s12  ;;  %v4509_v32 = vor.u32 %v5070_v25, %v4508_v24  ;;  %v3958_v27 = vld [vmem:[%s7364_s3 + $0x144] sm:$0xf0]  ;;  %v4400_v33 = vld [vmem:[%s7364_s3 + $0x4b0] sm:$0xf]  ;;  %v3841_v34 = vor.u32 %v4901_v29, %v3838_v30 }
 0x243   :  { %2389 = vmatpush.bf16.msrb.mxu1 %v3889_v38  ;;  %2326 = vmatpush.bf16.msrb.mxu2 %v4089_v42  ;;  %v5043_v8 = vld [vmem:[%s7364_s3 + $0x4b8] sm:$0xf0]  ;;  %v3961_v35 = vor.u32 %v4931_v14, %v3958_v27  ;;  %v4496_v36 = vld [vmem:[%s7364_s3 + $0x570] sm:$0xf]  ;;  %v4898_v38 = vld [vmem:[%s7364_s3 + $0x34] sm:$0xf] }
 0x244   :  { %2362 = vmatpush.bf16.msra.mxu0 %v4449_v48  ;;  %v5067_v37 = vld [vmem:[%s7364_s3 + $0x578] sm:$0xf0]  ;;  %v3826_v39 = vld [vmem:[%s7364_s3 + $0x3c] sm:$0xf0]  ;;  %v4928_v40 = vld [vmem:[%s7364_s3 + $0x124] sm:$0xf]  ;;  %v4401_v46 = vor.u32 %v5043_v8, %v4400_v33 }
 0x245   :  { %2353 = vmatpush.bf16.msra.mxu3 %v4293_v44  ;;  %v3946_v41 = vld [vmem:[%s7364_s3 + $0x12c] sm:$0xf0]  ;;  %v4497_v42 = vor.u32 %v5067_v37, %v4496_v36  ;;  %v4388_v47 = vld [vmem:[%s7364_s3 + $0x498] sm:$0xf]  ;;  %v5040_v49 = vld [vmem:[%s7364_s3 + $0x4a0] sm:$0xf0]  ;;  %v3829_v48 = vor.u32 %v4898_v38, %v3826_v39 }
 0x246   :  { %v3949_v45 = vor.u32 %v4928_v40, %v3946_v41  ;;  %v4484_v44 = vld [vmem:[%s7364_s3 + $0x558] sm:$0xf]  ;;  %v5064_v50 = vld [vmem:[%s7364_s3 + $0x560] sm:$0xf0]  ;;  %v4925_v52 = vld [vmem:[%s7364_s3 + $0x10c] sm:$0xf]  ;;  %v4389_v57 = vor.u32 %v5040_v49, %v4388_v47 }
 0x247   :  { %2376 = vmatpush.bf16.msra.mxu2 %v4545_v55  ;;  %2390 = vmatpush.bf16.msrb.mxu1 %v3877_v31  ;;  %v3934_v54 = vld [vmem:[%s7364_s3 + $0x114] sm:$0xf0]  ;;  %v4895_v55 = vld [vmem:[%s7364_s3 + $0x1c] sm:$0xf]  ;;  %v3814_v56 = vld [vmem:[%s7364_s3 + $0x24] sm:$0xf0]  ;;  %v4485_v58 = vor.u32 %v5064_v50, %v4484_v44 }
 0x248   :  { %2363 = vmatpush.bf16.msra.mxu0 %v4437_v63  ;;  %v3937_v31 = vor.u32 %v4925_v52, %v3934_v54  ;;  %v4376_v60 = vld [vmem:[%s7364_s3 + $0x480] sm:$0xf]  ;;  %v5037_v61 = vld [vmem:[%s7364_s3 + $0x488] sm:$0xf0]  ;;  %v4892_v1 = vld [vmem:[%s7364_s3 + $0x4] sm:$0xf] }
 0x249   :  { %2354 = vmatpush.bf16.msra.mxu3 %v4281_v59  ;;  %v3817_v59 = vor.u32 %v4895_v55, %v3814_v56  ;;  %v4472_v62 = vld [vmem:[%s7364_s3 + $0x540] sm:$0xf]  ;;  %v4377_v63 = vor.u32 %v5037_v61, %v4376_v60  ;;  %v5061_v0 = vld [vmem:[%s7364_s3 + $0x548] sm:$0xf0]  ;;  %v3802_v2 = vld [vmem:[%s7364_s3 + $0xc] sm:$0xf0] }
 0x24a   :  { %v4922_v6 = vld [vmem:[%s7364_s3 + $0xf4] sm:$0xf]  ;;  %v3922_v7 = vld [vmem:[%s7364_s3 + $0xfc] sm:$0xf0]  ;;  %v4919_v9 = vld [vmem:[%s7364_s3 + $0xdc] sm:$0xf] }
 0x24b   :  { %2377 = vmatpush.bf16.msra.mxu2 %v4533_v3  ;;  %2391 = vmatpush.bf16.msrb.mxu1 %v3865_v5  ;;  %v4473_v3 = vor.u32 %v5061_v0, %v4472_v62  ;;  %v3805_v5 = vor.u32 %v4892_v1, %v3802_v2  ;;  %v3910_v4 = vld [vmem:[%s7364_s3 + $0xe4] sm:$0xf0]  ;;  %v3898_v11 = vld [vmem:[%s7364_s3 + $0xcc] sm:$0xf0]  ;;  %v4961_v15 = vld [vmem:[%s7364_s3 + $0x22c] sm:$0xf] }
 0x24c   :  { %2364 = vmatpush.bf16.msra.mxu0 %v4425_v26  ;;  %v3913_v10 = vor.u32 %v4919_v9, %v3910_v4  ;;  %v4916_v26 = vld [vmem:[%s7364_s3 + $0xc4] sm:$0xf]  ;;  %v4174_v51 = vld [vmem:[%s7364_s3 + $0x2f4] sm:$0xf0]  ;;  %v5009_v22 = vld [vmem:[%s7364_s3 + $0x3ac] sm:$0xf] }
 0x24d   :  { %2403 = vmatpush.bf16.msrb.mxu3 %v3985_v53  ;;  %v3925_v53 = vor.u32 %v4922_v6, %v3922_v7  ;;  %v3901_v12 = vor.u32 %v4916_v26, %v3898_v11  ;;  %v4270_v20 = vld [vmem:[%s7364_s3 + $0x3b4] sm:$0xf0]  ;;  %v4958_v29 = vld [vmem:[%s7364_s3 + $0x214] sm:$0xf]  ;;  %v4066_v27 = vld [vmem:[%s7364_s3 + $0x21c] sm:$0xf0] }
 0x24e   :  { %v4982_v33 = vld [vmem:[%s7364_s3 + $0x2d4] sm:$0xf]  ;;  %v4162_v8 = vld [vmem:[%s7364_s3 + $0x2dc] sm:$0xf0]  ;;  %v4955_v40 = vld [vmem:[%s7364_s3 + $0x1fc] sm:$0xf] }
 0x24f   :  { %2378 = vmatpush.bf16.msra.mxu2 %v4521_v16  ;;  %2392 = vmatpush.bf16.msrb.mxu1 %v3853_v17  ;;  %v4078_v16 = vld [vmem:[%s7364_s3 + $0x234] sm:$0xf0]  ;;  %v4985_v17 = vld [vmem:[%s7364_s3 + $0x2ec] sm:$0xf]  ;;  %v5006_v36 = vld [vmem:[%s7364_s3 + $0x394] sm:$0xf]  ;;  %v4165_v39 = vor.u32 %v4982_v33, %v4162_v8 }
 0x250   :  { %2365 = vmatpush.bf16.msra.mxu0 %v4413_v28  ;;  %v4081_v24 = vor.u32 %v4961_v15, %v4078_v16  ;;  %v4177_v25 = vor.u32 %v4985_v17, %v4174_v51  ;;  %v6399_v28 = vld [vmem:[%s7365_s4] sm:$0x7]  ;;  %v4054_v41 = vld [vmem:[%s7364_s3 + $0x204] sm:$0xf0]  ;;  %v5003_v47 = vld [vmem:[%s7364_s3 + $0x37c] sm:$0xf] }
 0x251   :  { %2404 = vmatpush.bf16.msrb.mxu3 %v3973_v21  ;;  %v4258_v37 = vld [vmem:[%s7364_s3 + $0x39c] sm:$0xf0]  ;;  %v1260_v38 = vperm.slane %v6399_v28, 0  ;;  %v4246_v44 = vld [vmem:[%s7364_s3 + $0x384] sm:$0xf0]  ;;  %v4057_v52 = vor.u32 %v4955_v40, %v4054_v41 }
 0x252   :  { %v4366_v50 = vld [vmem:[%s7364_s3 + $0x474] sm:$0xf0]  ;;  %v4952_v55 = vld [vmem:[%s7364_s3 + $0x1e4] sm:$0xf]  ;;  %v4042_v56 = vld [vmem:[%s7364_s3 + $0x1ec] sm:$0xf0] }
 0x253   :  { %2379 = vmatpush.bf16.msra.mxu2 %v4509_v32  ;;  %2393 = vmatpush.bf16.msrb.mxu1 %v3841_v34  ;;  %v4273_v32 = vor.u32 %v5009_v22, %v4270_v20  ;;  %v4976_v60 = vld [vmem:[%s7364_s3 + $0x2a4] sm:$0xf]  ;;  %v4138_v61 = vld [vmem:[%s7364_s3 + $0x2ac] sm:$0xf0]  ;;  %v5030_v2 = vld [vmem:[%s7364_s3 + $0x454] sm:$0xf]  ;;  %v4045_v6 = vor.u32 %v4952_v55, %v4042_v56 }
 0x254   :  { %2366 = vmatpush.bf16.msra.mxu0 %v4401_v46  ;;  %v4261_v46 = vor.u32 %v5006_v36, %v4258_v37  ;;  %v5000_v62 = vld [vmem:[%s7364_s3 + $0x364] sm:$0xf]  ;;  %v4234_v1 = vld [vmem:[%s7364_s3 + $0x36c] sm:$0xf0]  ;;  %v4141_v7 = vor.u32 %v4976_v60, %v4138_v61  ;;  %v4030_v9 = vld [vmem:[%s7364_s3 + $0x1d4] sm:$0xf0] }
 0x255   :  { %2405 = vmatpush.bf16.msrb.mxu3 %v3961_v35  ;;  %v4237_v4 = vor.u32 %v5000_v62, %v4234_v1  ;;  %v4973_v26 = vld [vmem:[%s7364_s3 + $0x28c] sm:$0xf]  ;;  %v4126_v11 = vld [vmem:[%s7364_s3 + $0x294] sm:$0xf0]  ;;  %v5027_v16 = vld [vmem:[%s7364_s3 + $0x43c] sm:$0xf] }
 0x256   :  { %v4222_v15 = vld [vmem:[%s7364_s3 + $0x354] sm:$0xf0]  ;;  %v4342_v17 = vld [vmem:[%s7364_s3 + $0x444] sm:$0xf0]  ;;  %v4129_v20 = vor.u32 %v4973_v26, %v4126_v11  ;;  %v4210_v36 = vld [vmem:[%s7364_s3 + $0x33c] sm:$0xf0] }
 0x257   :  { %2380 = vmatpush.bf16.msra.mxu2 %v4497_v42  ;;  %2394 = vmatpush.bf16.msrb.mxu1 %v3829_v48  ;;  %v4979_v42 = vld [vmem:[%s7364_s3 + $0x2bc] sm:$0xf]  ;;  %v5033_v48 = vld [vmem:[%s7364_s3 + $0x46c] sm:$0xf]  ;;  %v5024_v37 = vld [vmem:[%s7364_s3 + $0x424] sm:$0xf] }
 0x258   :  { %2367 = vmatpush.bf16.msra.mxu0 %v4389_v57  ;;  %v4943_v41 = vld [vmem:[%s7364_s3 + $0x19c] sm:$0xf]  ;;  %v4940_v56 = vld [vmem:[%s7364_s3 + $0x184] sm:$0xf]  ;;  %v4090_v60 = vld [vmem:[%s7364_s3 + $0x24c] sm:$0xf0] }
 0x259   :  { %2406 = vmatpush.bf16.msrb.mxu3 %v3949_v45  ;;  %v4150_v45 = vld [vmem:[%s7364_s3 + $0x2c4] sm:$0xf0]  ;;  %v4988_v61 = vld [vmem:[%s7364_s3 + $0x304] sm:$0xf]  ;;  %v4186_v62 = vld [vmem:[%s7364_s3 + $0x30c] sm:$0xf0] }
 0x25a   :  { %v4153_v54 = vor.u32 %v4979_v42, %v4150_v45  ;;  %v4306_v1 = vld [vmem:[%s7364_s3 + $0x3fc] sm:$0xf0]  ;;  %v4189_v26 = vor.u32 %v4988_v61, %v4186_v62 }
 0x25b   :  { %2381 = vmatpush.bf16.msra.mxu2 %v4485_v58  ;;  %2395 = vmatpush.bf16.msrb.mxu1 %v3817_v59  ;;  %v4369_v59 = vor.u32 %v5033_v48, %v4366_v50  ;;  %v4198_v48 = vld [vmem:[%s7364_s3 + $0x324] sm:$0xf0]  ;;  %v5021_v50 = vld [vmem:[%s7364_s3 + $0x40c] sm:$0xf] }
 0x25c   :  { %2368 = vmatpush.bf16.msra.mxu0 %v4377_v63 }
 0x25d   :  { %2407 = vmatpush.bf16.msrb.mxu3 %v3937_v31  ;;  %v4249_v31 = vor.u32 %v5003_v47, %v4246_v44  ;;  %v4967_v47 = vld [vmem:[%s7364_s3 + $0x25c] sm:$0xf] }
 0x25e   :  { %v4991_v44 = vld [vmem:[%s7364_s3 + $0x31c] sm:$0xf] }
 0x25f   :  { %2382 = vmatpush.bf16.msra.mxu2 %v4473_v3  ;;  %2396 = vmatpush.bf16.msrb.mxu1 %v3805_v5  ;;  %v4354_v3 = vld [vmem:[%s7364_s3 + $0x45c] sm:$0xf0] }
 0x261   :  { %2408 = vmatpush.bf16.msrb.mxu3 %v3925_v53  ;;  %v4949_v53 = vld [vmem:[%s7364_s3 + $0x1cc] sm:$0xf] }
 0x262   :  { %v4033_v22 = vor.u32 %v4949_v53, %v4030_v9 }
 0x265   :  { %2409 = vmatpush.bf16.msrb.mxu3 %v3913_v10  ;;  %v4357_v10 = vor.u32 %v5030_v2, %v4354_v3  ;;  %v5057_v2 = vld [vmem:[%s7364_s3 + $0x52c] sm:$0xf]  ;;  %v4462_v3 = vld [vmem:[%s7364_s3 + $0x534] sm:$0xf0] }
 0x269   :  { %2410 = vmatpush.bf16.msrb.mxu3 %v3901_v12  ;;  %v4997_v12 = vld [vmem:[%s7364_s3 + $0x34c] sm:$0xf] }
 0x292   :  { %v978_v21 = vpop.permute.xlu2 %977 }
 0x2ac   :  { %v976_v23 = vpop.permute.xlu1 %975  ;;  %v974_v14 = vpop.permute.xlu0 %973 }
 0x2ad   :  { %v6405_v30 = vsel %vm979_vm8, %v976_v23, %v978_v21  ;;  %v6417_v34 = vsel %vm979_vm8, %v974_v14, %v976_v23  ;;  %v6421_v35 = vsel %vm979_vm8, %v6049_v13, %v974_v14  ;;  %v4069_v13 = vor.u32 %v4958_v29, %v4066_v27  ;;  %v4018_v23 = vld [vmem:[%s7364_s3 + $0x1bc] sm:$0xf0]  ;;  %v4970_v14 = vld [vmem:[%s7364_s3 + $0x274] sm:$0xf] }
 0x2ae   :  { %2341 = vmatmul.bf16.vlgmr.msra.gmra.mxu1 %v6405_v30  ;;  %2313 = vmatmul.bf16.vlgmr.msrb.gmra.mxu0 %v6421_v35  ;;  %v4345_v29 = vor.u32 %v5027_v16, %v4342_v17  ;;  %v4994_v27 = vld [vmem:[%s7364_s3 + $0x334] sm:$0xf]  ;;  %v5015_v16 = vld [vmem:[%s7364_s3 + $0x3dc] sm:$0xf]  ;;  %v4294_v17 = vld [vmem:[%s7364_s3 + $0x3e4] sm:$0xf0] }
 0x2af   :  { %2327 = vmatmul.bf16.vlgmr.msrb.gmra.mxu2 %v6417_v34  ;;  %2431 = vmatpush.bf16.msrb.mxu0 %v4177_v25  ;;  %v4225_v25 = vor.u32 %v4997_v12, %v4222_v15  ;;  %v4213_v42 = vor.u32 %v4994_v27, %v4210_v36  ;;  %v4465_v12 = vor.u32 %v5057_v2, %v4462_v3  ;;  %v4282_v36 = vld [vmem:[%s7364_s3 + $0x3cc] sm:$0xf0] }
 0x2b0   :  { %2417 = vmatpush.bf16.msrb.mxu2 %v4081_v24  ;;  %2445 = vmatpush.bf16.msra.mxu1 %v4273_v32  ;;  %v2286_v49 = vpop.f32.mrf.mxu1  ;;  %v992_v24 = vpop.permute.xlu2 %991  ;;  %v4114_v32 = vld [vmem:[%s7364_s3 + $0x27c] sm:$0xf0] }
 0x2b1   :  { %v2287_v57 = vadd.f32 %v2286_v49, %v1260_v38  ;;  %v4117_v40 = vor.u32 %v4970_v14, %v4114_v32  ;;  %v4102_v49 = vld [vmem:[%s7364_s3 + $0x264] sm:$0xf0]  ;;  %v5012_v14 = vld [vmem:[%s7364_s3 + $0x3c4] sm:$0xf] }
 0x2b2   :  { %v4105_v55 = vor.u32 %v4967_v47, %v4102_v49  ;;  %v4939_v47 = vld [vmem:[%s7364_s3 + $0x178] sm:$0xf0]  ;;  %v4285_v49 = vor.u32 %v5012_v14, %v4282_v36 }
 0x2b3   :  { %2432 = vmatpush.bf16.msrb.mxu0 %v4165_v39  ;;  %v5039_v14 = vld [vmem:[%s7364_s3 + $0x49c] sm:$0xf] }
 0x2b4   :  { %2418 = vmatpush.bf16.msrb.mxu2 %v4069_v13  ;;  %2446 = vmatpush.bf16.msra.mxu1 %v4261_v46  ;;  %v988_v58 = vpop.permute.xlu0 %987  ;;  %v990_v51 = vpop.permute.xlu1 %989  ;;  %v4330_v13 = vld [vmem:[%s7364_s3 + $0x42c] sm:$0xf0]  ;;  %v4006_v46 = vld [vmem:[%s7364_s3 + $0x1a4] sm:$0xf0] }
 0x2b5   :  { %v6475_v63 = vsel %vm993_vm9, %v978_v21, %v988_v58  ;;  %v4946_v21 = vld [vmem:[%s7364_s3 + $0x1b4] sm:$0xf]  ;;  %v6529_v33 = vsel %vm993_vm9, %v990_v51, %v992_v24  ;;  %v6532_v8 = vsel %vm993_vm9, %v988_v58, %v990_v51  ;;  %v4333_v45 = vor.u32 %v5024_v37, %v4330_v13  ;;  %v4964_v58 = vld [vmem:[%s7364_s3 + $0x244] sm:$0xf]  ;;  %v3880_v24 = vld [vmem:[%s7364_s3 + $0x98] sm:$0xf] }
 0x2b6   :  { %v2300_v0 = vpop.f32.mrf.mxu3  ;;  %2355 = vmatmul.bf16.vlgmr.msra.gmra.mxu3 %v6475_v63  ;;  %v4021_v39 = vor.u32 %v4946_v21, %v4018_v23  ;;  %v4093_v9 = vor.u32 %v4964_v58, %v4090_v60  ;;  %v5054_v51 = vld [vmem:[%s7364_s3 + $0x514] sm:$0xf]  ;;  %v5075_v21 = vld [vmem:[%s7364_s3 + $0x5bc] sm:$0xf]  ;;  %v4534_v23 = vld [vmem:[%s7364_s3 + $0x5c4] sm:$0xf0] }
 0x2b7   :  { %v6486_v5 = vadd.f32 %v2300_v0, %v2287_v57  ;;  %2433 = vmatpush.bf16.msrb.mxu0 %v4153_v54  ;;  %2459 = vmatpush.bf16.msra.mxu3 %v4369_v59  ;;  %v4009_v54 = vor.u32 %v4943_v41, %v4006_v46  ;;  %v3994_v57 = vld [vmem:[%s7364_s3 + $0x18c] sm:$0xf0]  ;;  %v5018_v0 = vld [vmem:[%s7364_s3 + $0x3f4] sm:$0xf]  ;;  %v4537_v27 = vor.u32 %v5075_v21, %v4534_v23  ;;  %v5051_v37 = vld [vmem:[%s7364_s3 + $0x4fc] sm:$0xf] }
 0x2b8   :  { %2419 = vmatpush.bf16.msrb.mxu2 %v4057_v52  ;;  %2447 = vmatpush.bf16.msra.mxu1 %v4249_v31  ;;  %v4318_v52 = vld [vmem:[%s7364_s3 + $0x414] sm:$0xf0]  ;;  %v4201_v31 = vor.u32 %v4991_v44, %v4198_v48  ;;  %v3997_v53 = vor.u32 %v4940_v56, %v3994_v57  ;;  %v4309_v11 = vor.u32 %v5018_v0, %v4306_v1  ;;  %v4438_v13 = vld [vmem:[%s7364_s3 + $0x504] sm:$0xf0]  ;;  %v4522_v41 = vld [vmem:[%s7364_s3 + $0x5ac] sm:$0xf0] }
 0x2b9   :  { %v4321_v59 = vor.u32 %v5021_v50, %v4318_v52  ;;  %v3868_v46 = vld [vmem:[%s7364_s3 + $0x80] sm:$0xf]  ;;  %v4441_v44 = vor.u32 %v5051_v37, %v4438_v13  ;;  %v5048_v50 = vld [vmem:[%s7364_s3 + $0x4e4] sm:$0xf]  ;;  %v4426_v52 = vld [vmem:[%s7364_s3 + $0x4ec] sm:$0xf0] }
 0x2ba   :  { %v5069_v56 = vld [vmem:[%s7364_s3 + $0x58c] sm:$0xf]  ;;  %v4510_v57 = vld [vmem:[%s7364_s3 + $0x594] sm:$0xf0]  ;;  %v3856_v58 = vld [vmem:[%s7364_s3 + $0x68] sm:$0xf]  ;;  %v4429_v61 = vor.u32 %v5048_v50, %v4426_v52 }
 0x2bb   :  { %2434 = vmatpush.bf16.msrb.mxu0 %v4141_v7  ;;  %2460 = vmatpush.bf16.msra.mxu3 %v4357_v10  ;;  %v4546_v7 = vld [vmem:[%s7364_s3 + $0x5dc] sm:$0xf0]  ;;  %v4915_v10 = vld [vmem:[%s7364_s3 + $0xb8] sm:$0xf0]  ;;  %v4936_v60 = vld [vmem:[%s7364_s3 + $0x160] sm:$0xf0]  ;;  %v4513_v62 = vor.u32 %v5069_v56, %v4510_v57 }
 0x2bc   :  { %2420 = vmatpush.bf16.msrb.mxu2 %v4045_v6  ;;  %2448 = vmatpush.bf16.msra.mxu1 %v4237_v4  ;;  %v5078_v6 = vld [vmem:[%s7364_s3 + $0x5d4] sm:$0xf]  ;;  %v3892_v4 = vld [vmem:[%s7364_s3 + $0xb0] sm:$0xf]  ;;  %v5045_v0 = vld [vmem:[%s7364_s3 + $0x4cc] sm:$0xf] }
 0x2bd   :  { %v4549_v15 = vor.u32 %v5078_v6, %v4546_v7  ;;  %v4414_v1 = vld [vmem:[%s7364_s3 + $0x4d4] sm:$0xf0]  ;;  %v5066_v6 = vld [vmem:[%s7364_s3 + $0x574] sm:$0xf]  ;;  %v4498_v7 = vld [vmem:[%s7364_s3 + $0x57c] sm:$0xf0] }
 0x2be   :  { %2397 = vmatmul.bf16.vlgmr.msrb.gmra.mxu1 %v6059_v18  ;;  %2369 = vmatmul.bf16.vlgmr.msra.gmra.mxu0 %v6532_v8  ;;  %v4900_v21 = vld [vmem:[%s7364_s3 + $0x40] sm:$0xf0]  ;;  %v3952_v23 = vld [vmem:[%s7364_s3 + $0x128] sm:$0xf]  ;;  %v4474_v13 = vld [vmem:[%s7364_s3 + $0x54c] sm:$0xf0] }
 0x2bf   :  { %4554 = vmatmul.msk.bf16.vlgmr.msra.gmra.mxu2 %vm69_vm4, %v6529_v33  ;;  %2435 = vmatpush.bf16.msrb.mxu0 %v4129_v20  ;;  %v4450_v20 = vld [vmem:[%s7364_s3 + $0x51c] sm:$0xf0]  ;;  %v5060_v37 = vld [vmem:[%s7364_s3 + $0x544] sm:$0xf]  ;;  %v4378_v52 = vld [vmem:[%s7364_s3 + $0x48c] sm:$0xf0] }
 0x2c0   :  { %2421 = vmatpush.bf16.msrb.mxu2 %v4033_v22  ;;  %2449 = vmatpush.bf16.msra.mxu1 %v4225_v25  ;;  %v3893_v22 = vor.u32 %v4915_v10, %v3892_v4  ;;  %v4912_v25 = vld [vmem:[%s7364_s3 + $0xa0] sm:$0xf0]  ;;  %v4453_v32 = vor.u32 %v5054_v51, %v4450_v20  ;;  %v3964_v4 = vld [vmem:[%s7364_s3 + $0x140] sm:$0xf]  ;;  %v4933_v10 = vld [vmem:[%s7364_s3 + $0x148] sm:$0xf0] }
 0x2c1   :  { %2461 = vmatpush.bf16.msra.mxu3 %v4345_v29  ;;  %v4297_v29 = vor.u32 %v5015_v16, %v4294_v17  ;;  %v3965_v17 = vor.u32 %v4933_v10, %v3964_v4  ;;  %v5063_v51 = vld [vmem:[%s7364_s3 + $0x55c] sm:$0xf]  ;;  %v3832_v20 = vld [vmem:[%s7364_s3 + $0x38] sm:$0xf]  ;;  %v4060_v4 = vld [vmem:[%s7364_s3 + $0x200] sm:$0xf] }
 0x2c2   :  { %v3928_v57 = vld [vmem:[%s7364_s3 + $0xf8] sm:$0xf] }
 0x2c3   :  { %2436 = vmatpush.bf16.msrb.mxu0 %v4117_v40  ;;  %v5072_v40 = vld [vmem:[%s7364_s3 + $0x5a4] sm:$0xf] }
 0x2c4   :  { %2422 = vmatpush.bf16.msrb.mxu2 %v4021_v39  ;;  %2450 = vmatpush.bf16.msra.mxu1 %v4213_v42  ;;  %v3881_v39 = vor.u32 %v4912_v25, %v3880_v24  ;;  %v4909_v42 = vld [vmem:[%s7364_s3 + $0x88] sm:$0xf0]  ;;  %v4525_v48 = vor.u32 %v5072_v40, %v4522_v41  ;;  %v4930_v24 = vld [vmem:[%s7364_s3 + $0x130] sm:$0xf0]  ;;  %v3940_v41 = vld [vmem:[%s7364_s3 + $0x110] sm:$0xf] }
 0x2c5   :  { %2462 = vmatpush.bf16.msra.mxu3 %v4333_v45  ;;  %v3988_v45 = vld [vmem:[%s7364_s3 + $0x170] sm:$0xf]  ;;  %v3953_v36 = vor.u32 %v4930_v24, %v3952_v23  ;;  %v4897_v40 = vld [vmem:[%s7364_s3 + $0x28] sm:$0xf0]  ;;  %v4048_v23 = vld [vmem:[%s7364_s3 + $0x1e8] sm:$0xf] }
 0x2c6   :  { %2411 = vmatmul.bf16.vlgmr.msrb.gmra.mxu3 %v6061_v19  ;;  %v4954_v24 = vld [vmem:[%s7364_s3 + $0x1f0] sm:$0xf0] }
 0x2c7   :  { %2437 = vmatpush.bf16.msrb.mxu0 %v4105_v55  ;;  %v3989_v55 = vor.u32 %v4939_v47, %v3988_v45  ;;  %v4963_v45 = vld [vmem:[%s7364_s3 + $0x238] sm:$0xf0] }
 0x2c8   :  { %2423 = vmatpush.bf16.msrb.mxu2 %v4009_v54  ;;  %2451 = vmatpush.bf16.msra.mxu1 %v4201_v31  ;;  %v3869_v54 = vor.u32 %v4909_v42, %v3868_v46  ;;  %v4906_v31 = vld [vmem:[%s7364_s3 + $0x70] sm:$0xf0]  ;;  %v4927_v46 = vld [vmem:[%s7364_s3 + $0x118] sm:$0xf0]  ;;  %v4084_v42 = vld [vmem:[%s7364_s3 + $0x230] sm:$0xf] }
 0x2c9   :  { %2463 = vmatpush.bf16.msra.mxu3 %v4321_v59  ;;  %v3976_v59 = vld [vmem:[%s7364_s3 + $0x158] sm:$0xf]  ;;  %v3857_v2 = vor.u32 %v4906_v31, %v3856_v58  ;;  %v3941_v50 = vor.u32 %v4927_v46, %v3940_v41  ;;  %v4085_v56 = vor.u32 %v4963_v45, %v4084_v42  ;;  %v4924_v58 = vld [vmem:[%s7364_s3 + $0x100] sm:$0xf0]  ;;  %v4951_v41 = vld [vmem:[%s7364_s3 + $0x1d8] sm:$0xf0] }
 0x2ca   :  { %v3977_v3 = vor.u32 %v4936_v60, %v3976_v59  ;;  %v4072_v31 = vld [vmem:[%s7364_s3 + $0x218] sm:$0xf]  ;;  %v4960_v59 = vld [vmem:[%s7364_s3 + $0x220] sm:$0xf0]  ;;  %v4180_v60 = vld [vmem:[%s7364_s3 + $0x2f0] sm:$0xf] }
 0x2cb   :  { %2438 = vmatpush.bf16.msrb.mxu0 %v4093_v9  ;;  %v4903_v9 = vld [vmem:[%s7364_s3 + $0x58] sm:$0xf0]  ;;  %v4144_v45 = vld [vmem:[%s7364_s3 + $0x2a8] sm:$0xf] }
 0x2cc   :  { %2424 = vmatpush.bf16.msrb.mxu2 %v3997_v53  ;;  %2452 = vmatpush.bf16.msra.mxu1 %v4189_v26  ;;  %v3844_v53 = vld [vmem:[%s7364_s3 + $0x50] sm:$0xf]  ;;  %v4417_v26 = vor.u32 %v5045_v0, %v4414_v1  ;;  %v5011_v1 = vld [vmem:[%s7364_s3 + $0x3b8] sm:$0xf0] }
 0x2cd   :  { %2464 = vmatpush.bf16.msra.mxu3 %v4309_v11  ;;  %v4501_v11 = vor.u32 %v5066_v6, %v4498_v7  ;;  %v3845_v16 = vor.u32 %v4903_v9, %v3844_v53  ;;  %v4276_v0 = vld [vmem:[%s7364_s3 + $0x3b0] sm:$0xf]  ;;  %v4073_v6 = vor.u32 %v4960_v59, %v4072_v31  ;;  %v3916_v53 = vld [vmem:[%s7364_s3 + $0xe0] sm:$0xf]  ;;  %v4921_v9 = vld [vmem:[%s7364_s3 + $0xe8] sm:$0xf0] }
 0x2ce   :  { %2439 = vmatmul.bf16.vlgmr.msrb.gmra.mxu0 %v6417_v34  ;;  %v4277_v10 = vor.u32 %v5011_v1, %v4276_v0  ;;  %v4132_v31 = vld [vmem:[%s7364_s3 + $0x290] sm:$0xf]  ;;  %v4975_v59 = vld [vmem:[%s7364_s3 + $0x298] sm:$0xf0]  ;;  %v5029_v0 = vld [vmem:[%s7364_s3 + $0x448] sm:$0xf0] }
 0x2cf   :  { %2488 = vmatpush.bf16.msra.mxu0 %v4549_v15  ;;  %2425 = vmatmul.bf16.vlgmr.msrb.gmra.mxu2 %v6421_v35  ;;  %v4402_v15 = vld [vmem:[%s7364_s3 + $0x4bc] sm:$0xf0] }
 0x2d0   :  { %2473 = vmatpush.bf16.msra.mxu2 %v4465_v12  ;;  %2501 = vmatpush.bf16.msrb.mxu1 %v3893_v22  ;;  %v5042_v12 = vld [vmem:[%s7364_s3 + $0x4b4] sm:$0xf]  ;;  %v4486_v22 = vld [vmem:[%s7364_s3 + $0x564] sm:$0xf0] }
 0x2d1   :  { %2453 = vmatmul.bf16.vlgmr.msra.gmra.mxu1 %v6405_v30  ;;  %2465 = vmatpush.bf16.msra.mxu3 %v4297_v29  ;;  %v4405_v25 = vor.u32 %v5042_v12, %v4402_v15  ;;  %v4489_v29 = vor.u32 %v5063_v51, %v4486_v22  ;;  %v4984_v12 = vld [vmem:[%s7364_s3 + $0x2e0] sm:$0xf0]  ;;  %v4264_v15 = vld [vmem:[%s7364_s3 + $0x398] sm:$0xf]  ;;  %v3904_v51 = vld [vmem:[%s7364_s3 + $0xc8] sm:$0xf] }
 0x2d3   :  { %2489 = vmatpush.bf16.msra.mxu0 %v4537_v27  ;;  %v3833_v27 = vor.u32 %v4900_v21, %v3832_v20  ;;  %v4918_v21 = vld [vmem:[%s7364_s3 + $0xd0] sm:$0xf0] }
 0x2d4   :  { %2474 = vmatpush.bf16.msra.mxu2 %v4453_v32  ;;  %2502 = vmatpush.bf16.msrb.mxu1 %v3881_v39  ;;  %v4390_v32 = vld [vmem:[%s7364_s3 + $0x4a4] sm:$0xf0]  ;;  %v3820_v39 = vld [vmem:[%s7364_s3 + $0x20] sm:$0xf] }
 0x2d5   :  { %2466 = vmatpush.bf16.msra.mxu3 %v4285_v49  ;;  %v4393_v47 = vor.u32 %v5039_v14, %v4390_v32  ;;  %v4477_v49 = vor.u32 %v5060_v37, %v4474_v13  ;;  %v4981_v14 = vld [vmem:[%s7364_s3 + $0x2c8] sm:$0xf0]  ;;  %v4252_v32 = vld [vmem:[%s7364_s3 + $0x380] sm:$0xf]  ;;  %v5035_v37 = vld [vmem:[%s7364_s3 + $0x478] sm:$0xf0]  ;;  %v3905_v13 = vor.u32 %v4918_v21, %v3904_v51 }
 0x2d6   :  { %v4969_v21 = vld [vmem:[%s7364_s3 + $0x268] sm:$0xf0] }
 0x2d7   :  { %2490 = vmatpush.bf16.msra.mxu0 %v4525_v48  ;;  %v3821_v48 = vor.u32 %v4897_v40, %v3820_v39  ;;  %v4049_v39 = vor.u32 %v4954_v24, %v4048_v23  ;;  %v4204_v23 = vld [vmem:[%s7364_s3 + $0x320] sm:$0xf]  ;;  %v4993_v24 = vld [vmem:[%s7364_s3 + $0x328] sm:$0xf0] }
 0x2d8   :  { %2475 = vmatpush.bf16.msra.mxu2 %v4441_v44  ;;  %2503 = vmatpush.bf16.msrb.mxu1 %v3869_v54  ;;  %v5036_v44 = vld [vmem:[%s7364_s3 + $0x484] sm:$0xf]  ;;  %v3808_v54 = vld [vmem:[%s7364_s3 + $0x8] sm:$0xf] }
 0x2d9   :  { %2515 = vmatpush.bf16.msrb.mxu3 %v3989_v55  ;;  %v4894_v55 = vld [vmem:[%s7364_s3 + $0x10] sm:$0xf0] }
 0x2da   :  { %2467 = vmatmul.bf16.vlgmr.msra.gmra.mxu3 %v6475_v63 }
 0x2db   :  { %2491 = vmatpush.bf16.msra.mxu0 %v4513_v62  ;;  %v4381_v62 = vor.u32 %v5036_v44, %v4378_v52  ;;  %v5002_v44 = vld [vmem:[%s7364_s3 + $0x370] sm:$0xf0] }
 0x2dc   :  { %2476 = vmatpush.bf16.msra.mxu2 %v4429_v61  ;;  %2504 = vmatpush.bf16.msrb.mxu1 %v3857_v2  ;;  %v4987_v61 = vld [vmem:[%s7364_s3 + $0x2f8] sm:$0xf0]  ;;  %v3809_v2 = vor.u32 %v4894_v55, %v3808_v54  ;;  %v4024_v55 = vld [vmem:[%s7364_s3 + $0x1b8] sm:$0xf] }
 0x2dd   :  { %2516 = vmatpush.bf16.msrb.mxu3 %v3977_v3  ;;  %v3929_v3 = vor.u32 %v4924_v58, %v3928_v57  ;;  %v4181_v7 = vor.u32 %v4987_v61, %v4180_v60  ;;  %v4228_v60 = vld [vmem:[%s7364_s3 + $0x350] sm:$0xf]  ;;  %v4999_v61 = vld [vmem:[%s7364_s3 + $0x358] sm:$0xf0] }
 0x2df   :  { %2492 = vmatpush.bf16.msra.mxu0 %v4501_v11  ;;  %v4168_v11 = vld [vmem:[%s7364_s3 + $0x2d8] sm:$0xf] }
 0x2e0   :  { %2477 = vmatpush.bf16.msra.mxu2 %v4417_v26  ;;  %2505 = vmatpush.bf16.msrb.mxu1 %v3845_v16  ;;  %v4957_v26 = vld [vmem:[%s7364_s3 + $0x208] sm:$0xf0]  ;;  %v5008_v16 = vld [vmem:[%s7364_s3 + $0x3a0] sm:$0xf0]  ;;  %v4169_v20 = vor.u32 %v4984_v12, %v4168_v11  ;;  %v5026_v11 = vld [vmem:[%s7364_s3 + $0x430] sm:$0xf0] }
 0x2e1   :  { %2517 = vmatpush.bf16.msrb.mxu3 %v3965_v17  ;;  %v3917_v17 = vor.u32 %v4921_v9, %v3916_v53  ;;  %v4061_v22 = vor.u32 %v4957_v26, %v4060_v4  ;;  %v4120_v53 = vld [vmem:[%s7364_s3 + $0x278] sm:$0xf]  ;;  %v4972_v9 = vld [vmem:[%s7364_s3 + $0x280] sm:$0xf0]  ;;  %v4336_v26 = vld [vmem:[%s7364_s3 + $0x428] sm:$0xf] }
 0x2e2   :  { %v4216_v4 = vld [vmem:[%s7364_s3 + $0x338] sm:$0xf] }
 0x2e3   :  { %2493 = vmatpush.bf16.msra.mxu0 %v4489_v29  ;;  %v4156_v29 = vld [vmem:[%s7364_s3 + $0x2c0] sm:$0xf] }
 0x2e4   :  { %2478 = vmatpush.bf16.msra.mxu2 %v4405_v25  ;;  %2506 = vmatpush.bf16.msrb.mxu1 %v3833_v27  ;;  %v4265_v25 = vor.u32 %v5008_v16, %v4264_v15  ;;  %v5005_v27 = vld [vmem:[%s7364_s3 + $0x388] sm:$0xf0]  ;;  %v4157_v40 = vor.u32 %v4981_v14, %v4156_v29  ;;  %v4121_v15 = vor.u32 %v4972_v9, %v4120_v53  ;;  %v4000_v16 = vld [vmem:[%s7364_s3 + $0x188] sm:$0xf]  ;;  %v5023_v29 = vld [vmem:[%s7364_s3 + $0x418] sm:$0xf0] }
 0x2e5   :  { %2518 = vmatpush.bf16.msrb.mxu3 %v3953_v36  ;;  %v4372_v36 = vld [vmem:[%s7364_s3 + $0x470] sm:$0xf]  ;;  %v4253_v46 = vor.u32 %v5005_v27, %v4252_v32  ;;  %v5059_v32 = vld [vmem:[%s7364_s3 + $0x538] sm:$0xf0] }
 0x2e6   :  { %v4373_v42 = vor.u32 %v5035_v37, %v4372_v36  ;;  %v4468_v14 = vld [vmem:[%s7364_s3 + $0x530] sm:$0xf]  ;;  %v4096_v37 = vld [vmem:[%s7364_s3 + $0x248] sm:$0xf] }
 0x2e7   :  { %2494 = vmatpush.bf16.msra.mxu0 %v4477_v49  ;;  %v4240_v49 = vld [vmem:[%s7364_s3 + $0x368] sm:$0xf] }
 0x2e8   :  { %2479 = vmatpush.bf16.msra.mxu2 %v4393_v47  ;;  %2507 = vmatpush.bf16.msrb.mxu1 %v3821_v48  ;;  %v4978_v47 = vld [vmem:[%s7364_s3 + $0x2b0] sm:$0xf0]  ;;  %v4360_v48 = vld [vmem:[%s7364_s3 + $0x458] sm:$0xf]  ;;  %v4241_v57 = vor.u32 %v5002_v44, %v4240_v49  ;;  %v5056_v49 = vld [vmem:[%s7364_s3 + $0x520] sm:$0xf0] }
 0x2e9   :  { %2519 = vmatpush.bf16.msrb.mxu3 %v3941_v50  ;;  %v5032_v50 = vld [vmem:[%s7364_s3 + $0x460] sm:$0xf0]  ;;  %v4145_v54 = vor.u32 %v4978_v47, %v4144_v45  ;;  %v4456_v47 = vld [vmem:[%s7364_s3 + $0x518] sm:$0xf] }
 0x2ea   :  { %4555 = vmatmul.msk.bf16.vlgmr.msra.gmra.mxu0 %vm69_vm4, %v6529_v33  ;;  %v4361_v58 = vor.u32 %v5032_v50, %v4360_v48  ;;  %v5020_v45 = vld [vmem:[%s7364_s3 + $0x400] sm:$0xf0]  ;;  %v4552_v44 = vld [vmem:[%s7364_s3 + $0x5d8] sm:$0xf] }
 0x2eb   :  { %2529 = vmatpush.bf16.msrb.mxu0 %v4085_v56  ;;  %v4948_v56 = vld [vmem:[%s7364_s3 + $0x1c0] sm:$0xf0] }
 0x2ec   :  { %2480 = vmatpush.bf16.msra.mxu2 %v4381_v62  ;;  %2508 = vmatpush.bf16.msrb.mxu1 %v3809_v2  ;;  %v4348_v62 = vld [vmem:[%s7364_s3 + $0x440] sm:$0xf]  ;;  %v4025_v1 = vor.u32 %v4948_v56, %v4024_v55  ;;  %v4133_v2 = vor.u32 %v4975_v59, %v4132_v31  ;;  %v5080_v48 = vld [vmem:[%s7364_s3 + $0x5e0] sm:$0xf0]  ;;  %v4457_v55 = vor.u32 %v5056_v49, %v4456_v47  ;;  %v5053_v59 = vld [vmem:[%s7364_s3 + $0x508] sm:$0xf0] }
 0x2ed   :  { %2520 = vmatpush.bf16.msrb.mxu3 %v3929_v3  ;;  %v4945_v3 = vld [vmem:[%s7364_s3 + $0x1a8] sm:$0xf0]  ;;  %v4553_v56 = vor.u32 %v5080_v48, %v4552_v44  ;;  %v4444_v31 = vld [vmem:[%s7364_s3 + $0x500] sm:$0xf] }
 0x2ef   :  { %2530 = vmatpush.bf16.msrb.mxu0 %v4073_v6  ;;  %2481 = vmatmul.bf16.vlgmr.msra.gmra.mxu2 %v6532_v8  ;;  %v4229_v6 = vor.u32 %v4999_v61, %v4228_v60  ;;  %v4540_v60 = vld [vmem:[%s7364_s3 + $0x5c0] sm:$0xf]  ;;  %v5077_v61 = vld [vmem:[%s7364_s3 + $0x5c8] sm:$0xf0] }
 0x2f0   :  { %2543 = vmatpush.bf16.msrb.mxu2 %v4181_v7  ;;  %2557 = vmatpush.bf16.msra.mxu1 %v4277_v10  ;;  %v4349_v7 = vor.u32 %v5029_v0, %v4348_v62  ;;  %v4996_v10 = vld [vmem:[%s7364_s3 + $0x340] sm:$0xf0]  ;;  %v4445_v0 = vor.u32 %v5053_v59, %v4444_v31 }
 0x2f1   :  { %2509 = vmatmul.bf16.vlgmr.msrb.gmra.mxu1 %v6059_v18  ;;  %2521 = vmatpush.bf16.msrb.mxu3 %v3917_v17  ;;  %v4036_v18 = vld [vmem:[%s7364_s3 + $0x1d0] sm:$0xf]  ;;  %v4942_v17 = vld [vmem:[%s7364_s3 + $0x190] sm:$0xf0]  ;;  %v4217_v51 = vor.u32 %v4996_v10, %v4216_v4  ;;  %v5047_v10 = vld [vmem:[%s7364_s3 + $0x4d8] sm:$0xf0] }
 0x2f2   :  { %v4037_v52 = vor.u32 %v4951_v41, %v4036_v18  ;;  %v4001_v27 = vor.u32 %v4942_v17, %v4000_v16  ;;  %v4192_v18 = vld [vmem:[%s7364_s3 + $0x308] sm:$0xf]  ;;  %v4990_v41 = vld [vmem:[%s7364_s3 + $0x310] sm:$0xf0]  ;;  %v4420_v4 = vld [vmem:[%s7364_s3 + $0x4d0] sm:$0xf] }
 0x2f3   :  { %2531 = vmatpush.bf16.msrb.mxu0 %v4061_v22  ;;  %v4337_v22 = vor.u32 %v5026_v11, %v4336_v26  ;;  %v4516_v26 = vld [vmem:[%s7364_s3 + $0x590] sm:$0xf]  ;;  %v4421_v11 = vor.u32 %v5047_v10, %v4420_v4  ;;  %v5044_v16 = vld [vmem:[%s7364_s3 + $0x4c0] sm:$0xf0]  ;;  %v4504_v17 = vld [vmem:[%s7364_s3 + $0x578] sm:$0xf] }
 0x2f4   :  { %2544 = vmatpush.bf16.msrb.mxu2 %v4169_v20  ;;  %2558 = vmatpush.bf16.msra.mxu1 %v4265_v25  ;;  %v4108_v20 = vld [vmem:[%s7364_s3 + $0x260] sm:$0xf]  ;;  %v4324_v25 = vld [vmem:[%s7364_s3 + $0x410] sm:$0xf] }
 0x2f5   :  { %2522 = vmatpush.bf16.msrb.mxu3 %v3905_v13  ;;  %v4109_v36 = vor.u32 %v4969_v21, %v4108_v20  ;;  %v4205_v13 = vor.u32 %v4993_v24, %v4204_v23  ;;  %v4396_v21 = vld [vmem:[%s7364_s3 + $0x4a0] sm:$0xf]  ;;  %v5041_v23 = vld [vmem:[%s7364_s3 + $0x4a8] sm:$0xf0] }
 0x2f6   :  { %v4492_v24 = vld [vmem:[%s7364_s3 + $0x560] sm:$0xf] }
 0x2f7   :  { %2532 = vmatpush.bf16.msrb.mxu0 %v4049_v39  ;;  %v4325_v39 = vor.u32 %v5023_v29, %v4324_v25  ;;  %v4397_v25 = vor.u32 %v5041_v23, %v4396_v21 }
 0x2f8   :  { %2545 = vmatpush.bf16.msrb.mxu2 %v4157_v40  ;;  %2559 = vmatpush.bf16.msra.mxu1 %v4253_v46  ;;  %v4966_v40 = vld [vmem:[%s7364_s3 + $0x250] sm:$0xf0]  ;;  %v4469_v46 = vor.u32 %v5059_v32, %v4468_v14  ;;  %v4384_v14 = vld [vmem:[%s7364_s3 + $0x488] sm:$0xf] }
 0x2f9   :  { %2571 = vmatpush.bf16.msra.mxu3 %v4373_v42  ;;  %v4312_v42 = vld [vmem:[%s7364_s3 + $0x3f8] sm:$0xf]  ;;  %v4097_v50 = vor.u32 %v4966_v40, %v4096_v37  ;;  %v5038_v32 = vld [vmem:[%s7364_s3 + $0x490] sm:$0xf0] }
 0x2fa   :  { %2523 = vmatmul.bf16.vlgmr.msrb.gmra.mxu3 %v6061_v19  ;;  %v4012_v19 = vld [vmem:[%s7364_s3 + $0x1a0] sm:$0xf]  ;;  %v4385_v37 = vor.u32 %v5038_v32, %v4384_v14 }
 0x2fb   :  { %2533 = vmatpush.bf16.msrb.mxu0 %v4037_v52  ;;  %v4013_v12 = vor.u32 %v4945_v3, %v4012_v19  ;;  %v4193_v52 = vor.u32 %v4990_v41, %v4192_v18  ;;  %v4432_v19 = vld [vmem:[%s7364_s3 + $0x4e8] sm:$0xf]  ;;  %v5050_v3 = vld [vmem:[%s7364_s3 + $0x4f0] sm:$0xf0]  ;;  %v2302_v41 = vpop.f32.mrf.mxu3 }
 0x2fc   :  { %2546 = vmatpush.bf16.msrb.mxu2 %v4145_v54  ;;  %2560 = vmatpush.bf16.msra.mxu1 %v4241_v57  ;;  %v4313_v54 = vor.u32 %v5020_v45, %v4312_v42  ;;  %v4300_v57 = vld [vmem:[%s7364_s3 + $0x3e0] sm:$0xf]  ;;  %v4433_v9 = vor.u32 %v5050_v3, %v4432_v19 }
 0x2fd   :  { %2572 = vmatpush.bf16.msra.mxu3 %v4361_v58  ;;  %v5017_v58 = vld [vmem:[%s7364_s3 + $0x3e8] sm:$0xf0] }
 0x2fe   :  { %v4301_v62 = vor.u32 %v5017_v58, %v4300_v57 }
 0x2ff   :  { %2534 = vmatpush.bf16.msrb.mxu0 %v4025_v1  ;;  %v4288_v1 = vld [vmem:[%s7364_s3 + $0x3c8] sm:$0xf] }
 0x300   :  { %2547 = vmatpush.bf16.msrb.mxu2 %v4133_v2  ;;  %2561 = vmatpush.bf16.msra.mxu1 %v4229_v6  ;;  %v5014_v2 = vld [vmem:[%s7364_s3 + $0x3d0] sm:$0xf0]  ;;  %v4528_v6 = vld [vmem:[%s7364_s3 + $0x5a8] sm:$0xf] }
 0x301   :  { %2573 = vmatpush.bf16.msra.mxu3 %v4349_v7  ;;  %v5074_v7 = vld [vmem:[%s7364_s3 + $0x5b0] sm:$0xf0]  ;;  %v4289_v53 = vor.u32 %v5014_v2, %v4288_v1  ;;  %v1261_v2 = vperm.slane %v6399_v28, 1 }
 0x303   :  { %2535 = vmatpush.bf16.msrb.mxu0 %v4013_v12 }
 0x304   :  { %2548 = vmatpush.bf16.msrb.mxu2 %v4121_v15  ;;  %2562 = vmatpush.bf16.msra.mxu1 %v4217_v51  ;;  %v4408_v15 = vld [vmem:[%s7364_s3 + $0x4b8] sm:$0xf]  ;;  %v5068_v51 = vld [vmem:[%s7364_s3 + $0x580] sm:$0xf0] }
 0x305   :  { %2574 = vmatpush.bf16.msra.mxu3 %v4337_v22  ;;  %v4409_v22 = vor.u32 %v5044_v16, %v4408_v15  ;;  %v4505_v20 = vor.u32 %v5068_v51, %v4504_v17 }
 0x307   :  { %2536 = vmatpush.bf16.msrb.mxu0 %v4001_v27  ;;  %v4480_v27 = vld [vmem:[%s7364_s3 + $0x548] sm:$0xf] }
 0x308   :  { %2549 = vmatpush.bf16.msrb.mxu2 %v4109_v36  ;;  %2563 = vmatpush.bf16.msra.mxu1 %v4205_v13  ;;  %v5062_v36 = vld [vmem:[%s7364_s3 + $0x550] sm:$0xf0] }
 0x309   :  { %2575 = vmatpush.bf16.msra.mxu3 %v4325_v39  ;;  %v4481_v13 = vor.u32 %v5062_v36, %v4480_v27  ;;  %v2288_v39 = vpop.f32.mrf.mxu1 }
 0x30a   :  { %2537 = vmatmul.bf16.vlgmr.msrb.gmra.mxu0 %v6421_v35  ;;  %v4541_v35 = vor.u32 %v5077_v61, %v4540_v60  ;;  %v2289_v49 = vadd.f32 %v2288_v39, %v1260_v38 }
 0x30b   :  { %2585 = vmatpush.bf16.msra.mxu0 %v4469_v46 }
 0x30c   :  { %2550 = vmatpush.bf16.msrb.mxu2 %v4097_v50  ;;  %2564 = vmatpush.bf16.msra.mxu1 %v4193_v52  ;;  %v2303_v48 = vadd.f32 %v2302_v41, %v2289_v49 }
 0x30d   :  { %2576 = vmatpush.bf16.msra.mxu3 %v4313_v54 }
 0x30f   :  { %2586 = vmatpush.bf16.msra.mxu0 %v4457_v55  ;;  %2551 = vmatmul.bf16.vlgmr.msrb.gmra.mxu2 %v6417_v34  ;;  %v4529_v34 = vor.u32 %v5074_v7, %v4528_v6 }
 0x310   :  { %2600 = vmatpush.bf16.msra.mxu2 %v4553_v56  ;;  %2565 = vmatmul.bf16.vlgmr.msra.gmra.mxu1 %v6405_v30  ;;  %v5071_v30 = vld [vmem:[%s7364_s3 + $0x598] sm:$0xf0] }
 0x311   :  { %2577 = vmatpush.bf16.msra.mxu3 %v4301_v62  ;;  %v4517_v12 = vor.u32 %v5071_v30, %v4516_v26 }
 0x313   :  { %2587 = vmatpush.bf16.msra.mxu0 %v4445_v0 }
 0x314   :  { %2601 = vmatpush.bf16.msra.mxu2 %v4541_v35 }
 0x315   :  { %2578 = vmatpush.bf16.msra.mxu3 %v4289_v53 }
 0x317   :  { %2588 = vmatpush.bf16.msra.mxu0 %v4433_v9 }
 0x318   :  { %2602 = vmatpush.bf16.msra.mxu2 %v4529_v34  ;;  %2579 = vmatmul.bf16.vlgmr.msra.gmra.mxu3 %v6475_v63  ;;  %v5065_v63 = vld [vmem:[%s7364_s3 + $0x568] sm:$0xf0]  ;;  %s5193_s3 = smov 96  }
 0x319   :  { %v4493_v29 = vor.u32 %v5065_v63, %v4492_v24 }
 0x31b   :  { %2589 = vmatpush.bf16.msra.mxu0 %v4421_v11 }
 0x31c   :  { %2603 = vmatpush.bf16.msra.mxu2 %v4517_v12 }
 0x31f   :  { %2590 = vmatpush.bf16.msra.mxu0 %v4409_v22 }
 0x320   :  { %2604 = vmatpush.bf16.msra.mxu2 %v4505_v20 }
 0x323   :  { %2591 = vmatpush.bf16.msra.mxu0 %v4397_v25 }
 0x324   :  { %2605 = vmatpush.bf16.msra.mxu2 %v4493_v29 }
 0x327   :  { %2592 = vmatpush.bf16.msra.mxu0 %v4385_v37 }
 0x328   :  { %2606 = vmatpush.bf16.msra.mxu2 %v4481_v13 }
 0x32a   :  { %2593 = vmatmul.bf16.vlgmr.msra.gmra.mxu0 %v6532_v8 }
 0x32b   :  { %4556 = vmatmul.msk.bf16.vlgmr.msra.gmra.mxu2 %vm69_vm4, %v6529_v33  ;;  %v2314_v40 = vpop.f32.mrf.mxu0  ;;  %v2342_v46 = vpop.f32.mrf.mxu1 }
 0x32c   :  { %v2315_v18 = vadd.f32 %v2314_v40, %v6486_v5 }
 0x332   :  { %v2328_v42 = vpop.f32.mrf.mxu2 }
 0x333   :  { %v2329_v45 = vadd.f32 %v2328_v42, %v2315_v18  ;;  %v2316_v47 = vpop.f32.mrf.mxu0  ;;  %v2344_v33 = vpop.f32.mrf.mxu1 }
 0x334   :  { %v2317_v50 = vadd.f32 %v2316_v47, %v2303_v48 }
 0x335   :  { %v2343_v44 = vadd.f32 %v2342_v46, %v2329_v45 }
 0x339   :  { %v2356_v8 = vpop.f32.mrf.mxu3 }
 0x33a   :  { %v2330_v52 = vpop.f32.mrf.mxu2  ;;  %v2357_v55 = vadd.f32 %v2356_v8, %v2343_v44  ;;  %v5188_v44 = vld [vmem:[%s7365_s4] sm:$0x7] }
 0x33b   :  { %v2331_v54 = vadd.f32 %v2330_v52, %v2317_v50  ;;  %v2370_v56 = vpop.f32.mrf.mxu0  ;;  %v2398_v35 = vpop.f32.mrf.mxu1  ;;  %v1262_v48 = vperm.slane %v5188_v44, 2 }
 0x33c   :  { %v2371_v57 = vadd.f32 %v2370_v56, %v2357_v55  ;;  %v2399_v53 = vadd.f32 %v2398_v35, %v1261_v2 }
 0x33d   :  { %v2345_v58 = vadd.f32 %v2344_v33, %v2331_v54 }
 0x341   :  { %v2358_v5 = vpop.f32.mrf.mxu3 }
 0x342   :  { %v2384_v31 = vpop.f32.mrf.mxu2  ;;  %v2359_v59 = vadd.f32 %v2358_v5, %v2345_v58 }
 0x343   :  { %v7095_v60 = vadd.f32 %v2384_v31, %v2371_v57  ;;  %v2372_v61 = vpop.f32.mrf.mxu0  ;;  %v2400_v6 = vpop.f32.mrf.mxu1 }
 0x344   :  { %v2373_v62 = vadd.f32 %v2372_v61, %v2359_v59  ;;  %v2401_v26 = vadd.f32 %v2400_v6, %v1261_v2 }
 0x349   :  { %v2412_v1 = vpop.f32.mrf.mxu3 }
 0x34a   :  { %v2386_v0 = vpop.f32.mrf.mxu2  ;;  %v2413_v9 = vadd.f32 %v2412_v1, %v2399_v53 }
 0x34b   :  { %v7097_v38 = vadd.f32 %v2386_v0, %v2373_v62  ;;  %v2440_v19 = vpop.f32.mrf.mxu0 }
 0x34e   :  { %v2454_v11 = vpop.f32.mrf.mxu1 }
 0x351   :  { %v2414_v7 = vpop.f32.mrf.mxu3 }
 0x352   :  { %v2426_v3 = vpop.f32.mrf.mxu2  ;;  %v2415_v15 = vadd.f32 %v2414_v7, %v2401_v26 }
 0x353   :  { %v2427_v34 = vadd.f32 %v2426_v3, %v2413_v9  ;;  %v2442_v4 = vpop.f32.mrf.mxu0 }
 0x355   :  { %v2441_v30 = vadd.f32 %v2440_v19, %v2427_v34 }
 0x356   :  { %v2456_v24 = vpop.f32.mrf.mxu1 }
 0x357   :  { %v2455_v17 = vadd.f32 %v2454_v11, %v2441_v30 }
 0x35a   :  { %v2428_v10 = vpop.f32.mrf.mxu2 }
 0x35b   :  { %v2429_v16 = vadd.f32 %v2428_v10, %v2415_v15 }
 0x35d   :  { %v2468_v12 = vpop.f32.mrf.mxu3  ;;  %v2443_v28 = vadd.f32 %v2442_v4, %v2429_v16 }
 0x35e   :  { %v2469_v51 = vadd.f32 %v2468_v12, %v2455_v17 }
 0x35f   :  { %v2457_v25 = vadd.f32 %v2456_v24, %v2443_v28  ;;  %v5088_v28 = vld [vmem:[%s7366_s5 + $0x38] sm:$0xff]  ;;  %v5085_v24 = vld [vmem:[%s7366_s5 + $0x20] sm:$0xff] }
 0x360   :  { %3193 = vmatpush.bf16.msrb.mxu1 %v5088_v28 }
 0x365   :  { %v2470_v63 = vpop.f32.mrf.mxu3 }
 0x366   :  { %v2471_v14 = vadd.f32 %v2470_v63, %v2457_v25  ;;  %v5084_v63 = vld [vmem:[%s7366_s5 + $0x18] sm:$0xff]  ;;  %v5083_v25 = vld [vmem:[%s7366_s5 + $0x10] sm:$0xff] }
 0x367   :  { %v2496_v22 = vpop.f32.mrf.mxu0 }
 0x36e   :  { %v2510_v45 = vpop.f32.mrf.mxu1 }
 0x36f   :  { %v2498_v36 = vpop.f32.mrf.mxu0  ;;  %v2511_v54 = vadd.f32 %v2510_v45, %v1262_v48 }
 0x372   :  { %v2482_v20 = vpop.f32.mrf.mxu2 }
 0x373   :  { %v2483_v21 = vadd.f32 %v2482_v20, %v2469_v51 }
 0x375   :  { %v2497_v23 = vadd.f32 %v2496_v22, %v2483_v21  ;;  %v5087_v21 = vld [vmem:[%s7366_s5 + $0x30] sm:$0xff] }
 0x376   :  { %v2512_v52 = vpop.f32.mrf.mxu1  ;;  %3194 = vmatpush.bf16.msrb.mxu1 %v5087_v21 }
 0x377   :  { %v2614_v29 = vmul.f32 0.5, %v2497_v23  ;;  %v2513_v59 = vadd.f32 %v2512_v52, %v1262_v48  ;;  %v5086_v23 = vld [vmem:[%s7366_s5 + $0x28] sm:$0xff]  ;;  %v5096_v48 = vld [vmem:[%s7366_s5 + $0x78] sm:$0xff]  ;;  %v5095_v52 = vld [vmem:[%s7366_s5 + $0x70] sm:$0xff] }
 0x378   :  { %3207 = vmatpush.bf16.msrb.mxu2 %v5096_v48 }
 0x379   :  { %5176 = vtanh.f32 %v2614_v29  ;;  %v5082_v29 = vld [vmem:[%s7366_s5 + $0x8] sm:$0xff] }
 0x37a   :  { %v2484_v32 = vpop.f32.mrf.mxu2  ;;  %3195 = vmatpush.bf16.msrb.mxu1 %v5086_v23 }
 0x37b   :  { %v2485_v27 = vadd.f32 %v2484_v32, %v2471_v14  ;;  %v2613_v14 = vmul.f32 0.5, %v7095_v60  ;;  %v5081_v32 = vld [vmem:[%s7366_s5] sm:$0xff] }
 0x37c   :  { %3208 = vmatpush.bf16.msrb.mxu2 %v5095_v52  ;;  %v5102_v52 = vld [vmem:[%s7366_s5 + $0xa8] sm:$0xff] }
 0x37d   :  { %v2499_v37 = vadd.f32 %v2498_v36, %v2485_v27  ;;  %v2524_v47 = vpop.f32.mrf.mxu3  ;;  %v2616_v27 = vmul.f32 0.5, %v7097_v38  ;;  %v5104_v38 = vld [vmem:[%s7366_s5 + $0xb8] sm:$0xff] }
 0x37e   :  { %v2525_v33 = vadd.f32 %v2524_v47, %v2511_v54  ;;  %3196 = vmatpush.bf16.msrb.mxu1 %v5085_v24  ;;  %3221 = vmatpush.bf16.msrb.mxu3 %v5104_v38 }
 0x37f   :  { %v5177_v13 = vpop.eup %5176  ;;  %v2617_v39 = vmul.f32 0.5, %v2499_v37 }
 0x380   :  { %v2626_v40 = vadd.f32 1.0, %v5177_v13 }
 0x381   :  { %5178 = vtanh.f32 %v2617_v39 }
 0x382   :  { %v7100_v18 = vmul.f32 0.5, %v2626_v40  ;;  %3197 = vmatpush.bf16.msrb.mxu1 %v5084_v63 }
 0x384   :  { %2641 = vrot.lane.b32.xlu0 %v7100_v18, %s5193_s3 }
 0x385   :  { %v2526_v8 = vpop.f32.mrf.mxu3 }
 0x386   :  { %v2527_v62 = vadd.f32 %v2526_v8, %v2513_v59  ;;  %3198 = vmatpush.bf16.msrb.mxu1 %v5083_v25  ;;  %v5103_v8 = vld [vmem:[%s7366_s5 + $0xb0] sm:$0xff] }
 0x387   :  { %v5179_v41 = vpop.eup %5178  ;;  %v2538_v49 = vpop.f32.mrf.mxu0  ;;  %3222 = vmatpush.bf16.msrb.mxu3 %v5103_v8  ;;  %v5090_v8 = vld [vmem:[%s7366_s5 + $0x48] sm:$0xff] }
 0x388   :  { %v2629_v46 = vadd.f32 1.0, %v5179_v41  ;;  %v2539_v56 = vadd.f32 %v2538_v49, %v2525_v33 }
 0x38a   :  { %v7104_v42 = vmul.f32 0.5, %v2629_v46  ;;  %3199 = vmatpush.bf16.msrb.mxu1 %v5082_v29 }
 0x38b   :  { %3223 = vmatpush.bf16.msrb.mxu3 %v5102_v52  ;;  %v5149_v52 = vld [vmem:[%s7367_s6] ss:$0 sm:$0xff] }
 0x38c   :  { %2645 = vrot.lane.b32.xlu2 %v7104_v42, %s5193_s3 }
 0x38d   :  { %v2566_v57 = vpop.f32.mrf.mxu1 }
 0x38e   :  { %3200 = vmatpush.bf16.msrb.mxu1 %v5081_v32 }
 0x38f   :  { %v2540_v55 = vpop.f32.mrf.mxu0 }
 0x390   :  { %v2541_v35 = vadd.f32 %v2540_v55, %v2527_v62 }
 0x392   :  { %v2552_v50 = vpop.f32.mrf.mxu2 }
 0x393   :  { %v2553_v58 = vadd.f32 %v2552_v50, %v2539_v56 }
 0x395   :  { %v2567_v0 = vadd.f32 %v2566_v57, %v2553_v58  ;;  %v2568_v7 = vpop.f32.mrf.mxu1 }
 0x39a   :  { %v2554_v5 = vpop.f32.mrf.mxu2 }
 0x39b   :  { %v2580_v31 = vpop.f32.mrf.mxu3  ;;  %v2555_v2 = vadd.f32 %v2554_v5, %v2541_v35 }
 0x39c   :  { %v2581_v1 = vadd.f32 %v2580_v31, %v2567_v0  ;;  %v5094_v31 = vld [vmem:[%s7366_s5 + $0x68] sm:$0xff] }
 0x39d   :  { %v2569_v9 = vadd.f32 %v2568_v7, %v2555_v2  ;;  %3209 = vmatpush.bf16.msrb.mxu2 %v5094_v31  ;;  %v5110_v31 = vld [vmem:[%s7366_s5 + $0xe8] sm:$0xff] }
 0x3a3   :  { %v2582_v53 = vpop.f32.mrf.mxu3 }
 0x3a4   :  { %v2583_v10 = vadd.f32 %v2582_v53, %v2569_v9  ;;  %v5092_v9 = vld [vmem:[%s7366_s5 + $0x58] sm:$0xff] }
 0x3a7   :  { %v2594_v61 = vpop.f32.mrf.mxu0 }
 0x3a8   :  { %v2595_v19 = vadd.f32 %v2594_v61, %v2581_v1  ;;  %v5093_v1 = vld [vmem:[%s7366_s5 + $0x60] sm:$0xff] }
 0x3a9   :  { %3210 = vmatpush.bf16.msrb.mxu2 %v5093_v1  ;;  %v5126_v1 = vld [vmem:[%s7366_s5 + $0x168] sm:$0xff] }
 0x3ad   :  { %3211 = vmatpush.bf16.msrb.mxu2 %v5092_v9  ;;  %v5107_v9 = vld [vmem:[%s7366_s5 + $0xd0] sm:$0xff] }
 0x3ae   :  { %v2608_v3 = vpop.f32.mrf.mxu2 }
 0x3af   :  { %v2609_v6 = vadd.f32 %v2608_v3, %v2595_v19  ;;  %v2596_v4 = vpop.f32.mrf.mxu0 }
 0x3b0   :  { %v2597_v26 = vadd.f32 %v2596_v4, %v2583_v10 }
 0x3b1   :  { %v2615_v34 = vmul.f32 0.5, %v2609_v6  ;;  %3212 = vmatpush.bf16.msrb.mxu2 %v5091_v43 }
 0x3b3   :  { %5180 = vtanh.f32 %v2615_v34 }
 0x3b5   :  { %3213 = vmatpush.bf16.msrb.mxu2 %v5090_v8 }
 0x3b6   :  { %v2610_v30 = vpop.f32.mrf.mxu2 }
 0x3b7   :  { %v2611_v11 = vadd.f32 %v2610_v30, %v2597_v26 }
 0x3b9   :  { %v5181_v12 = vpop.eup %5180  ;;  %v2618_v15 = vmul.f32 0.5, %v2611_v11 }
 0x3ba   :  { %v2627_v16 = vadd.f32 1.0, %v5181_v12 }
 0x3bb   :  { %5182 = vtanh.f32 %v2618_v15 }
 0x3bc   :  { %v2633_v17 = vmul.f32 0.5, %v2627_v16  ;;  %5184 = vtanh.f32 %v2613_v14 }
 0x3bd   :  { %5186 = vtanh.f32 %v2616_v27 }
 0x3be   :  { %2643 = vrot.lane.b32.xlu1 %v2633_v17, %s5193_s3 }
 0x3c1   :  { %v5183_v51 = vpop.eup %5182 }
 0x3c2   :  { %v2630_v22 = vadd.f32 1.0, %v5183_v51  ;;  %v5185_v36 = vpop.eup %5184 }
 0x3c3   :  { %v2625_v37 = vadd.f32 1.0, %v5185_v36  ;;  %v5187_v41 = vpop.eup %5186 }
 0x3c4   :  { %v2636_v20 = vmul.f32 0.5, %v2630_v22  ;;  %v2628_v49 = vadd.f32 1.0, %v5187_v41 }
 0x3c5   :  { %v2631_v13 = vmul.f32 0.5, %v2625_v37 }
 0x3c6   :  { %2647 = vrot.lane.b32.xlu0 %v2636_v20, %s5193_s3  ;;  %v2634_v54 = vmul.f32 0.5, %v2628_v49 }
 0x3e6   :  { %v2646_v55 = vpop.permute.xlu2 %2645 }
 0x3f6   :  { %v2642_v39 = vpop.permute.xlu0 %2641 }
 0x430   :  { %v2644_v40 = vpop.permute.xlu1 %2643 }
 0x431   :  { %v2649_v46 = vsel %vm591_vm3, %v2642_v39, %v2644_v40  ;;  %v2656_v45 = vadd.f32 %v2644_v40, %v7100_v18  ;;  %v5120_v18 = vld [vmem:[%s7366_s5 + $0x138] sm:$0xff] }
 0x432   :  { %v2655_v60 = vadd.f32 %v2649_v46, %v2631_v13  ;;  %3249 = vmatpush.bf16.msra.mxu1 %v5120_v18  ;;  %v5112_v18 = vld [vmem:[%s7366_s5 + $0xf8] sm:$0xff] }
 0x433   :  { %v2660_v47 = vmul.f32 0.5, %v2656_v45  ;;  %3235 = vmatpush.bf16.msrb.mxu0 %v5112_v18 }
 0x434   :  { %v2659_v44 = vmul.f32 0.5, %v2655_v60 }
 0x436   :  { %v2663_v50 = vpack.c.bf16 %v2660_v47, %v2659_v44 }
 0x438   :  { %v2648_v33 = vpop.permute.xlu0 %2647  ;;  %v2667_v56 = vunpack.c.l.b16 %v2663_v50  ;;  %v2668_v59 = vunpack.c.h.b16 %v2663_v50  ;;  %v5119_v50 = vld [vmem:[%s7366_s5 + $0x130] sm:$0xff] }
 0x439   :  { %v2650_v57 = vsel %vm591_vm3, %v2646_v55, %v2648_v33  ;;  %v2658_v58 = vadd.f32 %v2648_v33, %v7104_v42  ;;  %3250 = vmatpush.bf16.msra.mxu1 %v5119_v50  ;;  %v5101_v55 = vld [vmem:[%s7366_s5 + $0xa0] sm:$0xff]  ;;  %v5111_v33 = vld [vmem:[%s7366_s5 + $0xf0] sm:$0xff] }
 0x43a   :  { %v2657_v5 = vadd.f32 %v2650_v57, %v2634_v54  ;;  %v2689_v0 = vpack.c.b16 %v2667_v56, %v2667_v56  ;;  %v7164_v2 = vpack.c.b16 %v2668_v59, %v2668_v59  ;;  %v5118_v54 = vld [vmem:[%s7366_s5 + $0x128] sm:$0xff]  ;;  %3224 = vmatpush.bf16.msrb.mxu3 %v5101_v55  ;;  %3236 = vmatpush.bf16.msrb.mxu0 %v5111_v33  ;;  %v5117_v57 = vld [vmem:[%s7366_s5 + $0x120] sm:$0xff] }
 0x43b   :  { %v2662_v61 = vmul.f32 0.5, %v2658_v58  ;;  %v5128_v58 = vld [vmem:[%s7366_s5 + $0x178] sm:$0xff] }
 0x43c   :  { %v2661_v62 = vmul.f32 0.5, %v2657_v5  ;;  %v2692_v3 = vshll.u32 %v2689_v0, 16  ;;  %v2721_v6 = vshrl.u32 %v2689_v0, 16  ;;  %v2705_v34 = vrot.slane %v2689_v0, 1  ;;  %v5100_v5 = vld [vmem:[%s7366_s5 + $0x98] sm:$0xff] }
 0x43d   :  { %v2696_v4 = vshll.u32 %v7164_v2, 16  ;;  %v2726_v10 = vshrl.u32 %v7164_v2, 16  ;;  %v2740_v26 = vrot.slane %v2689_v0, 2  ;;  %v2706_v48 = vrot.slane %v7164_v2, 1  ;;  %3251 = vmatpush.bf16.msra.mxu1 %v5118_v54  ;;  %v5109_v0 = vld [vmem:[%s7366_s5 + $0xe0] sm:$0xff] }
 0x43e   :  { %v2664_v35 = vpack.c.bf16 %v2662_v61, %v2661_v62  ;;  %v2723_v17 = vrot.slane %v2721_v6, 1  ;;  %v2724_v51 = vrot.slane %v2692_v3, 2  ;;  %v2694_v13 = vrot.slane %v2692_v3, 1  ;;  %3225 = vmatpush.bf16.msrb.mxu3 %v5100_v5  ;;  %v5127_v61 = vld [vmem:[%s7366_s5 + $0x170] sm:$0xff]  ;;  %3237 = vmatpush.bf16.msrb.mxu0 %v5110_v31  ;;  %v5114_v3 = vld [vmem:[%s7366_s5 + $0x108] sm:$0xff]  ;;  %v5125_v6 = vld [vmem:[%s7366_s5 + $0x160] sm:$0xff] }
 0x43f   :  { %v2698_v24 = vrot.slane %v2696_v4, 1  ;;  %v2728_v32 = vrot.slane %v2726_v10, 1  ;;  %v2729_v27 = vrot.slane %v2696_v4, 2  ;;  %v5099_v62 = vld [vmem:[%s7366_s5 + $0x90] sm:$0xff]  ;;  %v5124_v4 = vld [vmem:[%s7366_s5 + $0x158] sm:$0xff]  ;;  %v5106_v10 = vld [vmem:[%s7366_s5 + $0xc8] sm:$0xff] }
 0x440   :  { %v2669_v42 = vunpack.c.l.b16 %v2664_v35  ;;  %v2670_v19 = vunpack.c.h.b16 %v2664_v35  ;;  %v2725_v40 = vor.u32 %v2724_v51, %v2723_v17  ;;  %v5115_v35 = vld [vmem:[%s7366_s5 + $0x110] sm:$0xff]  ;;  %v5142_v54 = vld [vmem:[%s7370_s9 + $0x20] sm:$0xff]  ;;  %v5141_v31 = vld [vmem:[%s7370_s9 + $0x18] sm:$0xff] }
 0x441   :  { %v2730_v47 = vor.u32 %v2729_v27, %v2728_v32  ;;  %3252 = vmatpush.bf16.msra.mxu1 %v5117_v57  ;;  %v2741_v27 = vrot.slane %v7164_v2, 2  ;;  %v5136_v2 = vld [vmem:[%s7369_s7 + $0x28] sm:$0xff] }
 0x442   :  { %v2671_v7 = vpack.c.b16 %v2669_v42, %v2667_v56  ;;  %v7166_v53 = vpack.c.b16 %v2670_v19, %v2668_v59  ;;  %v5089_v56 = vld [vmem:[%s7366_s5 + $0x40] sm:$0xff]  ;;  %v5116_v59 = vld [vmem:[%s7366_s5 + $0x118] sm:$0xff]  ;;  %3226 = vmatpush.bf16.msrb.mxu3 %v5099_v62  ;;  %v5098_v42 = vld [vmem:[%s7366_s5 + $0x88] sm:$0xff]  ;;  %3238 = vmatpush.bf16.msrb.mxu0 %v5109_v0 }
 0x443   :  { %3214 = vmatpush.bf16.msrb.mxu2 %v5089_v56  ;;  %v5108_v19 = vld [vmem:[%s7366_s5 + $0xd8] sm:$0xff] }
 0x444   :  { %3201 = vmatmul.bf16.vlgmr.msrb.gmra.mxu1 %v2671_v7  ;;  %v2703_v30 = vrot.slane %v2671_v7, 1  ;;  %v2681_v11 = vshrl.u32 %v7166_v53, 16  ;;  %v2683_v12 = vshll.u32 %v7166_v53, 16  ;;  %v2674_v15 = vshrl.u32 %v2671_v7, 16 }
 0x445   :  { %v2676_v16 = vshll.u32 %v2671_v7, 16  ;;  %v2738_v22 = vrot.slane %v2671_v7, 2  ;;  %v2704_v44 = vrot.slane %v7166_v53, 1  ;;  %3253 = vmatpush.bf16.msra.mxu1 %v5116_v59  ;;  %v5097_v7 = vld [vmem:[%s7366_s5 + $0x80] sm:$0xff]  ;;  %v2739_v32 = vrot.slane %v7166_v53, 2 }
 0x446   :  { %v2709_v20 = vsel %vm958_vm7, %v2703_v30, %v2705_v34  ;;  %v2685_v28 = vrot.slane %v2683_v12, 1  ;;  %v2716_v21 = vrot.slane %v2681_v11, 1  ;;  %v2717_v23 = vrot.slane %v2683_v12, 2  ;;  %3227 = vmatpush.bf16.msrb.mxu3 %v5098_v42  ;;  %3239 = vmatpush.bf16.msrb.mxu0 %v5108_v19  ;;  %v5113_v34 = vld [vmem:[%s7366_s5 + $0x100] sm:$0xff]  ;;  %v5123_v30 = vld [vmem:[%s7366_s5 + $0x150] sm:$0xff]  ;;  %v5122_v12 = vld [vmem:[%s7366_s5 + $0x148] sm:$0xff] }
 0x447   :  { %2760 = vrot.lane.b32.xlu0 %v2709_v20, %s5194_s25  ;;  %v2678_v63 = vrot.slane %v2676_v16, 1  ;;  %v2713_v25 = vrot.slane %v2674_v15, 1  ;;  %v2714_v29 = vrot.slane %v2676_v16, 2  ;;  %v7179_v36 = vsel %vm2742_vm11, %v2738_v22, %v2740_v26  ;;  %3263 = vmatpush.bf16.msra.mxu2 %v5128_v58  ;;  %v5130_v26 = vld [vmem:[%s7366_s5 + $0x188] sm:$0xff]  ;;  %v5121_v16 = vld [vmem:[%s7366_s5 + $0x140] sm:$0xff] }
 0x448   :  { %v2686_v14 = vor.u32 %v2685_v28, %v2681_v11  ;;  %v2718_v46 = vor.u32 %v2717_v23, %v2716_v21  ;;  %v2712_v38 = vsel %vm958_vm7, %v2704_v44, %v2706_v48  ;;  %v5105_v11 = vld [vmem:[%s7366_s5 + $0xc0] sm:$0xff]  ;;  %v3389_v44 = vld [vmem:[%s7370_s9 + $0x28] sm:$0x3] }
 0x449   :  { %v2679_v37 = vor.u32 %v2678_v63, %v2674_v15  ;;  %v2715_v39 = vor.u32 %v2714_v29, %v2713_v25  ;;  %3254 = vmatpush.bf16.msra.mxu1 %v5115_v35  ;;  %v5129_v15 = vld [vmem:[%s7366_s5 + $0x180] sm:$0xff] }
 0x44a   :  { %v2702_v41 = vsel %vm5333_vm2, %v2686_v14, %v2698_v24  ;;  %v2737_v49 = vsel %vm2735_vm12, %v2718_v46, %v2730_v47  ;;  %3228 = vmatpush.bf16.msrb.mxu3 %v5097_v7  ;;  %3240 = vmatpush.bf16.msrb.mxu0 %v5107_v9  ;;  %v5134_v46 = vld [vmem:[%s7369_s7 + $0x18] sm:$0xff] }
 0x44b   :  { %2755 = vrot.lane.b32.xlu2 %v2702_v41, %s5192_s12  ;;  %v2701_v45 = vsel %vm5333_vm2, %v2679_v37, %v2694_v13  ;;  %v2736_v60 = vsel %vm2735_vm12, %v2715_v39, %v2725_v40  ;;  %3264 = vmatpush.bf16.msra.mxu2 %v5127_v61  ;;  %v2749_v37 = vsel %vm2742_vm11, %v2739_v32, %v2741_v27  ;;  %v3306_v13 = vld [vmem:[%s7369_s7 + $0x38] sm:$0xf]  ;;  %vm3449_vm2 = vcmask 80896  }
 0x44c   :  { %2753 = vrot.lane.b32.xlu1 %v2701_v45, %s5192_s12  ;;  %v3340_v39 = vunpack.c.l.b16 %v3306_v13  ;;  %v5133_v45 = vld [vmem:[%s7369_s7 + $0x10] sm:$0xff] }
 0x44d   :  { %3255 = vmatpush.bf16.msra.mxu1 %v5114_v3 }
 0x44e   :  { %3241 = vmatpush.bf16.msrb.mxu0 %v5106_v10  ;;  %3283 = vmatpush.bf16.msra.mxu3 %v5130_v26  ;;  %v3348_v40 = vpack.c.b16 %v3340_v39, %v3340_v39 }
 0x44f   :  { %2770 = vrot.lane.b32.xlu0 %v2737_v49, %s5193_s3  ;;  %3265 = vmatpush.bf16.msra.mxu2 %v5126_v1  ;;  %v5131_v49 = vld [vmem:[%s7369_s7] sm:$0xff] }
 0x450   :  { %v3362_v41 = vsel %vm3360_vm14, %v3348_v40, 0 }
 0x451   :  { %3256 = vmatpush.bf16.msra.mxu1 %v5113_v34 }
 0x452   :  { %3242 = vmatpush.bf16.msrb.mxu0 %v5105_v11  ;;  %3284 = vmatpush.bf16.msra.mxu3 %v5129_v15  ;;  %v5140_v15 = vld [vmem:[%s7370_s9 + $0x10] sm:$0xff] }
 0x453   :  { %2768 = vrot.lane.b32.xlu2 %v2736_v60, %s5193_s3  ;;  %3266 = vmatpush.bf16.msra.mxu2 %v5125_v6  ;;  %v5132_v60 = vld [vmem:[%s7369_s7 + $0x8] sm:$0xff] }
 0x454   :  { %2762 = vrot.lane.b32.xlu1 %v2712_v38, %s5194_s25  ;;  %v3415_v38 = vunpack.c.l.b16 %v3389_v44 }
 0x456   :  { %3364 = vmatpush.bf16.msra.mxu0 %v3362_v41  ;;  %v3421_v50 = vpack.c.b16 %v3415_v38, %v3415_v38 }
 0x457   :  { %3267 = vmatpush.bf16.msra.mxu2 %v5124_v4 }
 0x458   :  { %v3433_v8 = vsel %vm3431_vm15, %v3421_v50, 0 }
 0x45b   :  { %3268 = vmatpush.bf16.msra.mxu2 %v5123_v30 }
 0x45f   :  { %3269 = vmatpush.bf16.msra.mxu2 %v5122_v12 }
 0x463   :  { %3270 = vmatpush.bf16.msra.mxu2 %v5121_v16  ;;  %v5139_v16 = vld [vmem:[%s7370_s9 + $0x8] sm:$0xff] }
 0x4a5   :  { %v2756_v17 = vpop.permute.xlu2 %2755 }
 0x4ad   :  { %v2769_v23 = vpop.permute.xlu2 %2768 }
 0x4b9   :  { %v2761_v51 = vpop.permute.xlu0 %2760 }
 0x4be   :  { %v2754_v22 = vpop.permute.xlu1 %2753 }
 0x4bf   :  { %v2757_v20 = vsel %vm993_vm9, %v2754_v22, %v2756_v17  ;;  %v2776_v28 = vsel %vm993_vm9, %v7166_v53, %v2754_v22  ;;  %v5137_v53 = vld [vmem:[%s7369_s7 + $0x30] sm:$0xff]  ;;  %v5138_v17 = vld [vmem:[%s7370_s9] sm:$0xff] }
 0x4c0   :  { %3215 = vmatmul.bf16.vlgmr.msrb.gmra.mxu2 %v2776_v28  ;;  %v2781_v21 = vsel %vm2764_vm13, %v2757_v20, %v2761_v51  ;;  %3365 = vmatpush.bf16.msra.mxu0 %v5137_v53  ;;  %v5150_v22 = vld [vmem:[%s7368_s8] ss:$0 sm:$0xff] }
 0x4c1   :  { %3229 = vmatmul.bf16.vlgmr.msrb.gmra.mxu3 %v2781_v21  ;;  %v2771_v24 = vpop.permute.xlu0 %2770  ;;  %v3202_v47 = vpop.f32.mrf.mxu1 }
 0x4c2   :  { %v2773_v63 = vsel %vm591_vm3, %v2769_v23, %v2771_v24  ;;  %3437 = vmatpush.bf16.msrb.mxu3 %v3433_v8  ;;  %v3203_v33 = vadd.f32 %v5149_v52, %v3202_v47  ;;  %v5151_v24 = vld [vmem:[%s7371_s10] ss:$0 sm:$0xff] }
 0x4c3   :  { %3257 = vmatmul.bf16.vlgmr.msra.gmra.mxu1 %v2773_v63 }
 0x4c4   :  { %3366 = vmatpush.bf16.msra.mxu0 %v5136_v2 }
 0x4c6   :  { %v2763_v25 = vpop.permute.xlu1 %2762  ;;  %3438 = vmatpush.bf16.msrb.mxu3 %v5142_v54 }
 0x4c7   :  { %v2765_v29 = vsel %vm2764_vm13, %v2761_v51, %v2763_v25 }
 0x4c8   :  { %v2785_v14 = vsel %vm591_vm3, %v2765_v29, %v2769_v23 }
 0x4c9   :  { %3243 = vmatmul.bf16.vlgmr.msrb.gmra.mxu0 %v2785_v14  ;;  %v3204_v18 = vpop.f32.mrf.mxu1 }
 0x4ca   :  { %v3205_v57 = vadd.f32 %v5149_v52, %v3204_v18  ;;  %3439 = vmatpush.bf16.msrb.mxu3 %v5141_v31 }
 0x4ce   :  { %3440 = vmatpush.bf16.msrb.mxu3 %v5140_v15 }
 0x4d0   :  { %3271 = vmatmul.bf16.vlgmr.msra.gmra.mxu2 %v7179_v36  ;;  %v5135_v36 = vld [vmem:[%s7369_s7 + $0x20] sm:$0xff] }
 0x4d1   :  { %4757 = vmatmul.msk.bf16.vlgmr.msra.gmra.mxu3 %vm993_vm9, %v2749_v37  ;;  %3367 = vmatpush.bf16.msra.mxu0 %v5135_v36 }
 0x4d2   :  { %3441 = vmatpush.bf16.msrb.mxu3 %v5139_v16 }
 0x4d5   :  { %3368 = vmatpush.bf16.msra.mxu0 %v5134_v46 }
 0x4d6   :  { %3442 = vmatpush.bf16.msrb.mxu3 %v5138_v17 }
 0x4d9   :  { %3369 = vmatpush.bf16.msra.mxu0 %v5133_v45 }
 0x4dd   :  { %3370 = vmatpush.bf16.msra.mxu0 %v5132_v60 }
 0x4e1   :  { %3371 = vmatpush.bf16.msra.mxu0 %v5131_v49 }
 0x540   :  { %v3258_v61 = vpop.f32.mrf.mxu1 }
 0x543   :  { %v3216_v48 = vpop.f32.mrf.mxu2 }
 0x544   :  { %v3230_v43 = vpop.f32.mrf.mxu3  ;;  %v3217_v58 = vadd.f32 %v3216_v48, %v3203_v33 }
 0x546   :  { %v3244_v55 = vpop.f32.mrf.mxu0  ;;  %v3231_v62 = vadd.f32 %v3230_v43, %v3217_v58 }
 0x548   :  { %v3245_v42 = vadd.f32 %v3244_v55, %v3231_v62  ;;  %v3260_v7 = vpop.f32.mrf.mxu1 }
 0x54a   :  { %v3259_v6 = vadd.f32 %v3258_v61, %v3245_v42 }
 0x54b   :  { %v3218_v56 = vpop.f32.mrf.mxu2 }
 0x54c   :  { %v3232_v5 = vpop.f32.mrf.mxu3  ;;  %v3219_v59 = vadd.f32 %v3218_v56, %v3205_v57 }
 0x54e   :  { %v3233_v0 = vadd.f32 %v3232_v5, %v3219_v59  ;;  %v3246_v35 = vpop.f32.mrf.mxu0 }
 0x550   :  { %v3247_v3 = vadd.f32 %v3246_v35, %v3233_v0 }
 0x552   :  { %v3261_v34 = vadd.f32 %v3260_v7, %v3247_v3 }
 0x553   :  { %v3272_v1 = vpop.f32.mrf.mxu2 }
 0x554   :  { %v3286_v19 = vpop.f32.mrf.mxu3  ;;  %v3273_v9 = vadd.f32 %v3272_v1, %v3259_v6 }
 0x556   :  { %v3287_v30 = vadd.f32 %v3286_v19, %v3273_v9 }
 0x55b   :  { %v3274_v4 = vpop.f32.mrf.mxu2 }
 0x55c   :  { %v3275_v10 = vadd.f32 %v3274_v4, %v3261_v34  ;;  %v3288_v26 = vpop.f32.mrf.mxu3 }
 0x55e   :  { %v3289_v11 = vadd.f32 %v3288_v26, %v3275_v10 }
 0x560   :  { %v3291_v12 = vpack.c.bf16 %v3289_v11, %v3287_v30 }
 0x562   :  { %4786 = vmatmul.msk.bf16.vlgmr.msra.gmra.mxu0 %vm3356_vm0, %v3291_v12 }
 0x5df   :  { %v3373_v51 = vpop.f32.mrf.mxu0 }
 0x5e0   :  { %v3374_v28 = vadd.f32 %v5150_v22, %v3373_v51 }
 0x5e7   :  { %v3375_v20 = vpop.f32.mrf.mxu0 }
 0x5e8   :  { %v3376_v21 = vadd.f32 %v5150_v22, %v3375_v20 }
 0x5ea   :  { %v3378_v23 = vpack.c.bf16 %v3376_v21, %v3374_v28 }
 0x5ec   :  { %4807 = vmatmul.msk.bf16.vlgmr.msrb.gmra.mxu3 %vm3427_vm1, %v3378_v23 }
 0x66f   :  { %v3444_v63 = vpop.f32.mrf.mxu3 }
 0x670   :  { %v3445_v25 = vadd.f32 %v5151_v24, %v3444_v63 }
 0x672   :  { %3450 = vst.msk [vmem:[%s7372_s11] sm:$0xff] %vm3449_vm2, %v3445_v25 }
 0x677   :  { %v3446_v29 = vpop.f32.mrf.mxu3 }
 0x678   :  { %v3447_v14 = vadd.f32 %v5151_v24, %v3446_v29 }
 0x67a   :  { %3451 = vst.msk [vmem:[%s7372_s11 + $0x8] sm:$0xff] %vm3449_vm2, %v3447_v14 }

</bundles_post_ra>
